<compile_context>
chip_gen: v5e
topology: v5e:2x2
jax: 0.10.0
libtpu: 0.0.40
codegen_flags: <defaults>
</compile_context>

<pallas_src>
import jax
import jax.numpy as jnp
import numpy as np
from jax.experimental import pallas as pl
from jax.experimental.pallas import tpu as pltpu


def _round_up(x, m):
    return ((x + m - 1) // m) * m


# -----------------------------------------------------------------------------
# Fused kernel: all GRU layers + fc head, single invocation (no grid).
# -----------------------------------------------------------------------------
def _make_gru_kernel(num_layers, T, Bp, Hp, w_dtype):
    n_in = 1 + 4 * num_layers + 2  # x, per-layer (wih, whh, bcomb, bhn), fc_w, fc_b
    multi_layer = num_layers > 1

    def kernel(*refs):
        x_ref = refs[0]
        fcw_ref = refs[n_in - 2]
        fcb_ref = refs[n_in - 1]
        out_ref = refs[n_in]
        scratch = refs[n_in + 1:]
        if multi_layer:
            seq_ref, gi_ref, h_ref = scratch   # (T*Bp,Hp), (T*Bp,3Hp), (Bp,Hp)
        else:
            gi_ref, h_ref = scratch
            seq_ref = None

        def wdot(a, w):
            # Weights may be bf16; accumulate in f32 on the MXU.
            return jnp.dot(a.astype(w_dtype), w, preferred_element_type=jnp.float32)

        for layer in range(num_layers):
            wih_ref = refs[1 + 4 * layer]      # (in, 3Hp)
            whh_ref = refs[2 + 4 * layer]      # (Hp, 3Hp)
            bcomb_ref = refs[3 + 4 * layer]    # (1, 3Hp): bih + [bhr, bhz, 0]
            bhn_ref = refs[4 + 4 * layer]      # (1, Hp):  bhn

            # Hoisted input projection for ALL timesteps: one big MXU matmul.
            src = x_ref[...] if layer == 0 else seq_ref[...]
            gi_ref[...] = wdot(src, wih_ref[...]) + bcomb_ref[...]

            # h0 = zeros (matches the PyTorch forward)
            h_ref[...] = jnp.zeros_like(h_ref)

            # Hoist the bhn broadcast out of the (unrolled) time loop.
            bhn_b = jnp.broadcast_to(bhn_ref[...], (Bp, Hp))

            write_seq = layer < num_layers - 1   # last layer: only h feeds the fc head
            split_gh = Hp >= 512                 # limit vreg liveness at large Hp

            def step(t, carry, whh_ref=whh_ref, bhn_b=bhn_b,
                     write_seq=write_seq, split_gh=split_gh):
                row = pl.multiple_of(t * Bp, 8)
                gi_t = gi_ref[pl.ds(row, Bp), :]                       # (Bp, 3Hp)
                h = h_ref[...]                                         # (Bp, Hp)
                if split_gh:
                    gh_rz = wdot(h, whh_ref[:, :2 * Hp])               # (Bp, 2Hp)
                    r = jax.nn.sigmoid(gi_t[:, :Hp] + gh_rz[:, :Hp])
                    z = jax.nn.sigmoid(gi_t[:, Hp:2 * Hp] + gh_rz[:, Hp:2 * Hp])
                    gh_n = wdot(h, whh_ref[:, 2 * Hp:])                # (Bp, Hp)
                    n = jnp.tanh(gi_t[:, 2 * Hp:] + r * (gh_n + bhn_b))
                else:
                    gh = wdot(h, whh_ref[...])                         # (Bp, 3Hp)
                    r = jax.nn.sigmoid(gi_t[:, :Hp] + gh[:, :Hp])
                    z = jax.nn.sigmoid(gi_t[:, Hp:2 * Hp] + gh[:, Hp:2 * Hp])
                    n = jnp.tanh(gi_t[:, 2 * Hp:] + r * (gh[:, 2 * Hp:] + bhn_b))
                h_new = n + z * (h - n)          # == (1-z)*n + z*h, one fewer VPU op
                h_ref[...] = h_new
                if write_seq:
                    seq_ref[pl.ds(row, Bp), :] = h_new
                return carry

            # Serial recurrence; capped unroll keeps vreg pressure / code size bounded.
            jax.lax.fori_loop(0, T, step, 0, unroll=min(8, T))

        # Fused fc head on the last timestep's hidden state.
        out_ref[...] = (wdot(h_ref[...], fcw_ref[...]) + fcb_ref[...]).astype(out_ref.dtype)

    return kernel


# -----------------------------------------------------------------------------
# Padding helpers (zero-pad so padded lanes provably stay 0 through the recurrence)
# -----------------------------------------------------------------------------
def _pad_gate_mat(w, in_pad, H, Hp, dtype):
    """(in_dim, 3H) -> (in_pad, 3Hp); gate g goes to [0:in_dim, g*Hp : g*Hp+H]."""
    in_dim = w.shape[0]
    out = jnp.zeros((in_pad, 3 * Hp), jnp.float32)
    for g in range(3):
        out = out.at[:in_dim, g * Hp:g * Hp + H].set(w[:, g * H:(g + 1) * H])
    return out.astype(dtype)


def _pad_gate_vec(b, H, Hp):
    out = jnp.zeros((1, 3 * Hp), jnp.float32)
    for g in range(3):
        out = out.at[0, g * Hp:g * Hp + H].set(b[g * H:(g + 1) * H])
    return out


# -----------------------------------------------------------------------------
# Wrapper
# -----------------------------------------------------------------------------
def gru_forward(params, x_bti, weights_dtype=jnp.float32):
    """x_bti: (B, T, input_dim), batch_first like the PyTorch module. Returns (B, output_dim).

    weights_dtype=jnp.bfloat16 stores the matmul weights in bf16 (native MXU path on
    v6e/v7x, halves weight VMEM/HBM traffic); accumulation / elementwise stay f32.
    """
    B, T, I = x_bti.shape
    H = params["hidden_dim"]
    O = params["fc_w"].shape[-1]
    num_layers = len(params["layers"])

    Bp = _round_up(B, 8)     # sublane-dense batch
    Hp = _round_up(H, 128)   # lane-dense hidden
    Op = _round_up(O, 128)   # lane-dense fc output

    # (B,T,I) -> time-major (T,Bp,I) -> (T*Bp, I): per-step slice = aligned 8-row block.
    x = jnp.transpose(x_bti, (1, 0, 2)).astype(jnp.float32)
    x = jnp.pad(x, ((0, 0), (0, Bp - B), (0, 0))).reshape(T * Bp, I)

    args = [x]
    for li, (wih, whh, bih, bhh) in enumerate(params["layers"]):
        in_pad = I if li == 0 else Hp
        # Fold bih + bhh(r,z) into the hoisted projection; bhn must stay inside r*(...).
        b_comb = bih + jnp.concatenate([bhh[:2 * H], jnp.zeros((H,), jnp.float32)])
        args.append(_pad_gate_mat(wih, in_pad, H, Hp, weights_dtype))
        args.append(_pad_gate_mat(whh, Hp, H, Hp, weights_dtype))
        args.append(_pad_gate_vec(b_comb, H, Hp))
        args.append(jnp.zeros((1, Hp), jnp.float32).at[0, :H].set(bhh[2 * H:]))
    args.append(jnp.zeros((Hp, Op), jnp.float32).at[:H, :O].set(params["fc_w"])
                .astype(weights_dtype))
    args.append(jnp.zeros((1, Op), jnp.float32).at[0, :O].set(params["fc_b"]))

    # Scratch: per-layer output sequence (only needed when there is a next layer),
    # hoisted input projection, hidden state.
    scratch_shapes = []
    scratch_bytes = 0
    if num_layers > 1:
        scratch_shapes.append(pltpu.VMEM((T * Bp, Hp), jnp.float32))
        scratch_bytes += T * Bp * Hp * 4
    scratch_shapes.append(pltpu.VMEM((T * Bp, 3 * Hp), jnp.float32))
    scratch_bytes += T * Bp * 3 * Hp * 4
    scratch_shapes.append(pltpu.VMEM((Bp, Hp), jnp.float32))
    scratch_bytes += Bp * Hp * 4

    # Explicit VMEM budget (inputs + output + scratch) with headroom, so real T/H don't
    # hit the default scoped-VMEM limit (16 MiB v5e / 32 MiB v6e,v7x).
    arg_bytes = sum(int(np.prod(a.shape)) * a.dtype.itemsize for a in args)
    out_bytes = Bp * Op * 4
    resident = arg_bytes + out_bytes + scratch_bytes
    vmem_limit = min(max(2 * resident + (4 << 20), 32 << 20), 128 << 20)

    kernel = _make_gru_kernel(num_layers, T, Bp, Hp, weights_dtype)
    out = pl.pallas_call(
        kernel,
        out_shape=jax.ShapeDtypeStruct((Bp, Op), jnp.float32),
        in_specs=[pl.BlockSpec(a.shape, lambda: (0, 0)) for a in args],
        out_specs=pl.BlockSpec((Bp, Op), lambda: (0, 0)),
        scratch_shapes=scratch_shapes,
        compiler_params=pltpu.CompilerParams(vmem_limit_bytes=vmem_limit),
    )(*args)
    return out[:B, :O]


def init_params(key, input_dim, hidden_dim, num_layers, output_dim):
    """Deterministic params. Gate order (r,z,n) concatenated along the 3H axis, stored
    pre-transposed so kernels do x @ W."""
    params = {"hidden_dim": hidden_dim, "layers": []}
    k = 1.0 / np.sqrt(hidden_dim)
    for layer in range(num_layers):
        in_dim = input_dim if layer == 0 else hidden_dim
        key, k1, k2, k3, k4 = jax.random.split(key, 5)
        wih = jax.random.uniform(k1, (in_dim, 3 * hidden_dim), jnp.float32, -k, k)
        whh = jax.random.uniform(k2, (hidden_dim, 3 * hidden_dim), jnp.float32, -k, k)
        bih = jax.random.uniform(k3, (3 * hidden_dim,), jnp.float32, -k, k)
        bhh = jax.random.uniform(k4, (3 * hidden_dim,), jnp.float32, -k, k)
        params["layers"].append((wih, whh, bih, bhh))
    key, k5, k6 = jax.random.split(key, 3)
    params["fc_w"] = jax.random.uniform(k5, (hidden_dim, output_dim), jnp.float32, -k, k)
    params["fc_b"] = jax.random.uniform(k6, (output_dim,), jnp.float32, -k, k)
    return params


# -----------------------------------------------------------------------------
# Pure-JAX reference (correctness check only)
# -----------------------------------------------------------------------------
def gru_forward_ref(params, x_bti):
    H = params["hidden_dim"]
    hp = jax.lax.Precision.HIGHEST
    x = jnp.transpose(x_bti, (1, 0, 2)).astype(jnp.float32)  # (T, B, I)
    for (wih, whh, bih, bhh) in params["layers"]:
        B = x.shape[1]

        def step(h, xt, wih=wih, whh=whh, bih=bih, bhh=bhh):
            gi = jnp.dot(xt, wih, precision=hp) + bih
            gh = jnp.dot(h, whh, precision=hp) + bhh
            r = jax.nn.sigmoid(gi[:, :H] + gh[:, :H])
            z = jax.nn.sigmoid(gi[:, H:2 * H] + gh[:, H:2 * H])
            n = jnp.tanh(gi[:, 2 * H:] + r * gh[:, 2 * H:])
            h_new = (1.0 - z) * n + z * h
            return h_new, h_new

        _, ys = jax.lax.scan(step, jnp.zeros((B, H), jnp.float32), x)
        x = ys
    return jnp.dot(x[-1], params["fc_w"], precision=hp) + params["fc_b"][None, :]


# -----------------------------------------------------------------------------
if __name__ == "__main__":
    B, T, INPUT_DIM, HIDDEN_DIM, NUM_LAYERS, OUTPUT_DIM = 2, 8, 16, 32, 2, 4

    key = jax.random.PRNGKey(0)
    kx, kp = jax.random.split(key)
    x = jax.random.normal(kx, (B, T, INPUT_DIM), jnp.float32)
    params = init_params(kp, INPUT_DIM, HIDDEN_DIM, NUM_LAYERS, OUTPUT_DIM)

    ref = jax.block_until_ready(gru_forward_ref(params, x))

    # f32 weights: tight check against the reference.
    out = jax.block_until_ready(gru_forward(params, x))
    np.testing.assert_allclose(np.asarray(out), np.asarray(ref), rtol=1e-4, atol=1e-5)
    assert out.shape == (B, OUTPUT_DIM)

    # bf16 weight path (v6e/v7x MXU-native): loose check, accumulation stays f32.
    out_bf16 = jax.block_until_ready(gru_forward(params, x, weights_dtype=jnp.bfloat16))
    assert out_bf16.shape == (B, OUTPUT_DIM)
    assert bool(jnp.all(jnp.isfinite(out_bf16)))
    np.testing.assert_allclose(np.asarray(out_bf16), np.asarray(ref), rtol=5e-2, atol=5e-2)

    print("KERNEL_OK")
</pallas_src>

<mosaic_0001>
module attributes {stable_mosaic.version = 11 : i64} {
  func.func @kernel(%arg0: memref<64x16xf32, #tpu.memory_space<vmem>>, %arg1: memref<16x384xf32, #tpu.memory_space<vmem>>, %arg2: memref<128x384xf32, #tpu.memory_space<vmem>>, %arg3: memref<1x384xf32, #tpu.memory_space<vmem>>, %arg4: memref<1x128xf32, #tpu.memory_space<vmem>>, %arg5: memref<128x384xf32, #tpu.memory_space<vmem>>, %arg6: memref<128x384xf32, #tpu.memory_space<vmem>>, %arg7: memref<1x384xf32, #tpu.memory_space<vmem>>, %arg8: memref<1x128xf32, #tpu.memory_space<vmem>>, %arg9: memref<128x128xf32, #tpu.memory_space<vmem>>, %arg10: memref<1x128xf32, #tpu.memory_space<vmem>>, %arg11: memref<8x128xf32, #tpu.memory_space<vmem>>, %arg12: memref<64x128xf32, #tpu.memory_space<vmem>>, %arg13: memref<64x384xf32, #tpu.memory_space<vmem>>, %arg14: memref<8x128xf32, #tpu.memory_space<vmem>>) attributes {dimension_semantics = [], scalar_prefetch = 0 : i64, scratch_operands = 3 : i64, tpu.core_type = #tpu.core_type<tc>} {
    %c0 = arith.constant 0 : index
    %c0_0 = arith.constant 0 : index
    %0 = vector.load %arg0[%c0, %c0_0] : memref<64x16xf32, #tpu.memory_space<vmem>>, vector<64x16xf32>
    %c0_1 = arith.constant 0 : index
    %c0_2 = arith.constant 0 : index
    %1 = vector.load %arg1[%c0_1, %c0_2] : memref<16x384xf32, #tpu.memory_space<vmem>>, vector<16x384xf32>
    %cst = arith.constant dense<0.000000e+00> : vector<64x384xf32>
    %2 = tpu.matmul %0, %1, %cst {dimension_numbers = #tpu.dot_dimension_numbers<[1], [0], [0], [1], [0, 0, 1, 1], [], []>} : vector<64x16xf32>, vector<16x384xf32>, vector<64x384xf32> -> vector<64x384xf32>
    %c0_3 = arith.constant 0 : index
    %c0_4 = arith.constant 0 : index
    %3 = vector.load %arg3[%c0_3, %c0_4] : memref<1x384xf32, #tpu.memory_space<vmem>>, vector<1x384xf32>
    %4 = vector.broadcast %3 : vector<1x384xf32> to vector<64x384xf32>
    %5 = arith.addf %2, %4 : vector<64x384xf32>
    %c0_5 = arith.constant 0 : index
    %c0_6 = arith.constant 0 : index
    %6 = vector.load %arg13[%c0_5, %c0_6] : memref<64x384xf32, #tpu.memory_space<vmem>>, vector<64x384xf32>
    tpu.vector_store %arg13[%c0_5, %c0_6], %5 {strides = array<i32>} : memref<64x384xf32, #tpu.memory_space<vmem>>, vector<64x384xf32>,
    %cst_7 = arith.constant 0.000000e+00 : f32
    %7 = vector.broadcast %cst_7 : f32 to vector<8x128xf32>
    %c0_8 = arith.constant 0 : index
    %c0_9 = arith.constant 0 : index
    %8 = vector.load %arg14[%c0_8, %c0_9] : memref<8x128xf32, #tpu.memory_space<vmem>>, vector<8x128xf32>
    tpu.vector_store %arg14[%c0_8, %c0_9], %7 {strides = array<i32>} : memref<8x128xf32, #tpu.memory_space<vmem>>, vector<8x128xf32>,
    %c0_10 = arith.constant 0 : index
    %c0_11 = arith.constant 0 : index
    %9 = vector.load %arg4[%c0_10, %c0_11] : memref<1x128xf32, #tpu.memory_space<vmem>>, vector<1x128xf32>
    %10 = vector.shape_cast %9 : vector<1x128xf32> to vector<1x128xf32>
    %11 = vector.broadcast %10 : vector<1x128xf32> to vector<8x128xf32>
    %c0_i32 = arith.constant 0 : i32
    %c8_i32 = arith.constant 8 : i32
    %12 = arith.muli %c0_i32, %c8_i32 : i32
    %13 = tpu.assume_multiple %12, 8 : i32
    %14 = arith.index_cast %13 : i32 to index
    %c0_12 = arith.constant 0 : index
    %15 = vector.load %arg13[%14, %c0_12] : memref<64x384xf32, #tpu.memory_space<vmem>>, vector<8x384xf32>
    %c0_13 = arith.constant 0 : index
    %c0_14 = arith.constant 0 : index
    %16 = vector.load %arg14[%c0_13, %c0_14] : memref<8x128xf32, #tpu.memory_space<vmem>>, vector<8x128xf32>
    %c0_15 = arith.constant 0 : index
    %c0_16 = arith.constant 0 : index
    %17 = vector.load %arg2[%c0_15, %c0_16] : memref<128x384xf32, #tpu.memory_space<vmem>>, vector<128x384xf32>
    %cst_17 = arith.constant dense<0.000000e+00> : vector<8x384xf32>
    %18 = tpu.matmul %16, %17, %cst_17 {dimension_numbers = #tpu.dot_dimension_numbers<[1], [0], [0], [1], [0, 0, 1, 1], [], []>} : vector<8x128xf32>, vector<128x384xf32>, vector<8x384xf32> -> vector<8x384xf32>
    %19 = vector.extract_strided_slice %15 {offsets = [0, 0], sizes = [8, 128], strides = [1, 1]} : vector<8x384xf32> to vector<8x128xf32>
    %20 = vector.extract_strided_slice %18 {offsets = [0, 0], sizes = [8, 128], strides = [1, 1]} : vector<8x384xf32> to vector<8x128xf32>
    %21 = arith.addf %19, %20 : vector<8x128xf32>
    %22 = arith.negf %21 : vector<8x128xf32>
    %23 = math.exp %22 : vector<8x128xf32>
    %cst_18 = arith.constant 1.000000e+00 : f32
    %24 = vector.broadcast %cst_18 : f32 to vector<8x128xf32>
    %25 = arith.addf %24, %23 : vector<8x128xf32>
    %26 = arith.divf %24, %25 : vector<8x128xf32>
    %27 = vector.extract_strided_slice %15 {offsets = [0, 128], sizes = [8, 128], strides = [1, 1]} : vector<8x384xf32> to vector<8x128xf32>
    %28 = vector.extract_strided_slice %18 {offsets = [0, 128], sizes = [8, 128], strides = [1, 1]} : vector<8x384xf32> to vector<8x128xf32>
    %29 = arith.addf %27, %28 : vector<8x128xf32>
    %30 = arith.negf %29 : vector<8x128xf32>
    %31 = math.exp %30 : vector<8x128xf32>
    %cst_19 = arith.constant 1.000000e+00 : f32
    %32 = vector.broadcast %cst_19 : f32 to vector<8x128xf32>
    %33 = arith.addf %32, %31 : vector<8x128xf32>
    %34 = arith.divf %32, %33 : vector<8x128xf32>
    %35 = vector.extract_strided_slice %15 {offsets = [0, 256], sizes = [8, 128], strides = [1, 1]} : vector<8x384xf32> to vector<8x128xf32>
    %36 = vector.extract_strided_slice %18 {offsets = [0, 256], sizes = [8, 128], strides = [1, 1]} : vector<8x384xf32> to vector<8x128xf32>
    %37 = arith.addf %36, %11 : vector<8x128xf32>
    %38 = arith.mulf %26, %37 : vector<8x128xf32>
    %39 = arith.addf %35, %38 : vector<8x128xf32>
    %40 = math.tanh %39 : vector<8x128xf32>
    %41 = arith.subf %16, %40 : vector<8x128xf32>
    %42 = arith.mulf %34, %41 : vector<8x128xf32>
    %43 = arith.addf %40, %42 : vector<8x128xf32>
    %c0_20 = arith.constant 0 : index
    %c0_21 = arith.constant 0 : index
    %44 = vector.load %arg14[%c0_20, %c0_21] : memref<8x128xf32, #tpu.memory_space<vmem>>, vector<8x128xf32>
    tpu.vector_store %arg14[%c0_20, %c0_21], %43 {strides = array<i32>} : memref<8x128xf32, #tpu.memory_space<vmem>>, vector<8x128xf32>,
    %45 = arith.index_cast %13 : i32 to index
    %c0_22 = arith.constant 0 : index
    %46 = vector.load %arg12[%45, %c0_22] : memref<64x128xf32, #tpu.memory_space<vmem>>, vector<8x128xf32>
    tpu.vector_store %arg12[%45, %c0_22], %43 {strides = array<i32>} : memref<64x128xf32, #tpu.memory_space<vmem>>, vector<8x128xf32>,
    %c1_i32 = arith.constant 1 : i32
    %c8_i32_23 = arith.constant 8 : i32
    %47 = arith.muli %c1_i32, %c8_i32_23 : i32
    %48 = tpu.assume_multiple %47, 8 : i32
    %49 = arith.index_cast %48 : i32 to index
    %c0_24 = arith.constant 0 : index
    %50 = vector.load %arg13[%49, %c0_24] : memref<64x384xf32, #tpu.memory_space<vmem>>, vector<8x384xf32>
    %c0_25 = arith.constant 0 : index
    %c0_26 = arith.constant 0 : index
    %51 = vector.load %arg14[%c0_25, %c0_26] : memref<8x128xf32, #tpu.memory_space<vmem>>, vector<8x128xf32>
    %c0_27 = arith.constant 0 : index
    %c0_28 = arith.constant 0 : index
    %52 = vector.load %arg2[%c0_27, %c0_28] : memref<128x384xf32, #tpu.memory_space<vmem>>, vector<128x384xf32>
    %cst_29 = arith.constant dense<0.000000e+00> : vector<8x384xf32>
    %53 = tpu.matmul %51, %52, %cst_29 {dimension_numbers = #tpu.dot_dimension_numbers<[1], [0], [0], [1], [0, 0, 1, 1], [], []>} : vector<8x128xf32>, vector<128x384xf32>, vector<8x384xf32> -> vector<8x384xf32>
    %54 = vector.extract_strided_slice %50 {offsets = [0, 0], sizes = [8, 128], strides = [1, 1]} : vector<8x384xf32> to vector<8x128xf32>
    %55 = vector.extract_strided_slice %53 {offsets = [0, 0], sizes = [8, 128], strides = [1, 1]} : vector<8x384xf32> to vector<8x128xf32>
    %56 = arith.addf %54, %55 : vector<8x128xf32>
    %57 = arith.negf %56 : vector<8x128xf32>
    %58 = math.exp %57 : vector<8x128xf32>
    %cst_30 = arith.constant 1.000000e+00 : f32
    %59 = vector.broadcast %cst_30 : f32 to vector<8x128xf32>
    %60 = arith.addf %59, %58 : vector<8x128xf32>
    %61 = arith.divf %59, %60 : vector<8x128xf32>
    %62 = vector.extract_strided_slice %50 {offsets = [0, 128], sizes = [8, 128], strides = [1, 1]} : vector<8x384xf32> to vector<8x128xf32>
    %63 = vector.extract_strided_slice %53 {offsets = [0, 128], sizes = [8, 128], strides = [1, 1]} : vector<8x384xf32> to vector<8x128xf32>
    %64 = arith.addf %62, %63 : vector<8x128xf32>
    %65 = arith.negf %64 : vector<8x128xf32>
    %66 = math.exp %65 : vector<8x128xf32>
    %cst_31 = arith.constant 1.000000e+00 : f32
    %67 = vector.broadcast %cst_31 : f32 to vector<8x128xf32>
    %68 = arith.addf %67, %66 : vector<8x128xf32>
    %69 = arith.divf %67, %68 : vector<8x128xf32>
    %70 = vector.extract_strided_slice %50 {offsets = [0, 256], sizes = [8, 128], strides = [1, 1]} : vector<8x384xf32> to vector<8x128xf32>
    %71 = vector.extract_strided_slice %53 {offsets = [0, 256], sizes = [8, 128], strides = [1, 1]} : vector<8x384xf32> to vector<8x128xf32>
    %72 = arith.addf %71, %11 : vector<8x128xf32>
    %73 = arith.mulf %61, %72 : vector<8x128xf32>
    %74 = arith.addf %70, %73 : vector<8x128xf32>
    %75 = math.tanh %74 : vector<8x128xf32>
    %76 = arith.subf %51, %75 : vector<8x128xf32>
    %77 = arith.mulf %69, %76 : vector<8x128xf32>
    %78 = arith.addf %75, %77 : vector<8x128xf32>
    %c0_32 = arith.constant 0 : index
    %c0_33 = arith.constant 0 : index
    %79 = vector.load %arg14[%c0_32, %c0_33] : memref<8x128xf32, #tpu.memory_space<vmem>>, vector<8x128xf32>
    tpu.vector_store %arg14[%c0_32, %c0_33], %78 {strides = array<i32>} : memref<8x128xf32, #tpu.memory_space<vmem>>, vector<8x128xf32>,
    %80 = arith.index_cast %48 : i32 to index
    %c0_34 = arith.constant 0 : index
    %81 = vector.load %arg12[%80, %c0_34] : memref<64x128xf32, #tpu.memory_space<vmem>>, vector<8x128xf32>
    tpu.vector_store %arg12[%80, %c0_34], %78 {strides = array<i32>} : memref<64x128xf32, #tpu.memory_space<vmem>>, vector<8x128xf32>,
    %c2_i32 = arith.constant 2 : i32
    %c8_i32_35 = arith.constant 8 : i32
    %82 = arith.muli %c2_i32, %c8_i32_35 : i32
    %83 = tpu.assume_multiple %82, 8 : i32
    %84 = arith.index_cast %83 : i32 to index
    %c0_36 = arith.constant 0 : index
    %85 = vector.load %arg13[%84, %c0_36] : memref<64x384xf32, #tpu.memory_space<vmem>>, vector<8x384xf32>
    %c0_37 = arith.constant 0 : index
    %c0_38 = arith.constant 0 : index
    %86 = vector.load %arg14[%c0_37, %c0_38] : memref<8x128xf32, #tpu.memory_space<vmem>>, vector<8x128xf32>
    %c0_39 = arith.constant 0 : index
    %c0_40 = arith.constant 0 : index
    %87 = vector.load %arg2[%c0_39, %c0_40] : memref<128x384xf32, #tpu.memory_space<vmem>>, vector<128x384xf32>
    %cst_41 = arith.constant dense<0.000000e+00> : vector<8x384xf32>
    %88 = tpu.matmul %86, %87, %cst_41 {dimension_numbers = #tpu.dot_dimension_numbers<[1], [0], [0], [1], [0, 0, 1, 1], [], []>} : vector<8x128xf32>, vector<128x384xf32>, vector<8x384xf32> -> vector<8x384xf32>
    %89 = vector.extract_strided_slice %85 {offsets = [0, 0], sizes = [8, 128], strides = [1, 1]} : vector<8x384xf32> to vector<8x128xf32>
    %90 = vector.extract_strided_slice %88 {offsets = [0, 0], sizes = [8, 128], strides = [1, 1]} : vector<8x384xf32> to vector<8x128xf32>
    %91 = arith.addf %89, %90 : vector<8x128xf32>
    %92 = arith.negf %91 : vector<8x128xf32>
    %93 = math.exp %92 : vector<8x128xf32>
    %cst_42 = arith.constant 1.000000e+00 : f32
    %94 = vector.broadcast %cst_42 : f32 to vector<8x128xf32>
    %95 = arith.addf %94, %93 : vector<8x128xf32>
    %96 = arith.divf %94, %95 : vector<8x128xf32>
    %97 = vector.extract_strided_slice %85 {offsets = [0, 128], sizes = [8, 128], strides = [1, 1]} : vector<8x384xf32> to vector<8x128xf32>
    %98 = vector.extract_strided_slice %88 {offsets = [0, 128], sizes = [8, 128], strides = [1, 1]} : vector<8x384xf32> to vector<8x128xf32>
    %99 = arith.addf %97, %98 : vector<8x128xf32>
    %100 = arith.negf %99 : vector<8x128xf32>
    %101 = math.exp %100 : vector<8x128xf32>
    %cst_43 = arith.constant 1.000000e+00 : f32
    %102 = vector.broadcast %cst_43 : f32 to vector<8x128xf32>
    %103 = arith.addf %102, %101 : vector<8x128xf32>
    %104 = arith.divf %102, %103 : vector<8x128xf32>
    %105 = vector.extract_strided_slice %85 {offsets = [0, 256], sizes = [8, 128], strides = [1, 1]} : vector<8x384xf32> to vector<8x128xf32>
    %106 = vector.extract_strided_slice %88 {offsets = [0, 256], sizes = [8, 128], strides = [1, 1]} : vector<8x384xf32> to vector<8x128xf32>
    %107 = arith.addf %106, %11 : vector<8x128xf32>
    %108 = arith.mulf %96, %107 : vector<8x128xf32>
    %109 = arith.addf %105, %108 : vector<8x128xf32>
    %110 = math.tanh %109 : vector<8x128xf32>
    %111 = arith.subf %86, %110 : vector<8x128xf32>
    %112 = arith.mulf %104, %111 : vector<8x128xf32>
    %113 = arith.addf %110, %112 : vector<8x128xf32>
    %c0_44 = arith.constant 0 : index
    %c0_45 = arith.constant 0 : index
    %114 = vector.load %arg14[%c0_44, %c0_45] : memref<8x128xf32, #tpu.memory_space<vmem>>, vector<8x128xf32>
    tpu.vector_store %arg14[%c0_44, %c0_45], %113 {strides = array<i32>} : memref<8x128xf32, #tpu.memory_space<vmem>>, vector<8x128xf32>,
    %115 = arith.index_cast %83 : i32 to index
    %c0_46 = arith.constant 0 : index
    %116 = vector.load %arg12[%115, %c0_46] : memref<64x128xf32, #tpu.memory_space<vmem>>, vector<8x128xf32>
    tpu.vector_store %arg12[%115, %c0_46], %113 {strides = array<i32>} : memref<64x128xf32, #tpu.memory_space<vmem>>, vector<8x128xf32>,
    %c3_i32 = arith.constant 3 : i32
    %c8_i32_47 = arith.constant 8 : i32
    %117 = arith.muli %c3_i32, %c8_i32_47 : i32
    %118 = tpu.assume_multiple %117, 8 : i32
    %119 = arith.index_cast %118 : i32 to index
    %c0_48 = arith.constant 0 : index
    %120 = vector.load %arg13[%119, %c0_48] : memref<64x384xf32, #tpu.memory_space<vmem>>, vector<8x384xf32>
    %c0_49 = arith.constant 0 : index
    %c0_50 = arith.constant 0 : index
    %121 = vector.load %arg14[%c0_49, %c0_50] : memref<8x128xf32, #tpu.memory_space<vmem>>, vector<8x128xf32>
    %c0_51 = arith.constant 0 : index
    %c0_52 = arith.constant 0 : index
    %122 = vector.load %arg2[%c0_51, %c0_52] : memref<128x384xf32, #tpu.memory_space<vmem>>, vector<128x384xf32>
    %cst_53 = arith.constant dense<0.000000e+00> : vector<8x384xf32>
    %123 = tpu.matmul %121, %122, %cst_53 {dimension_numbers = #tpu.dot_dimension_numbers<[1], [0], [0], [1], [0, 0, 1, 1], [], []>} : vector<8x128xf32>, vector<128x384xf32>, vector<8x384xf32> -> vector<8x384xf32>
    %124 = vector.extract_strided_slice %120 {offsets = [0, 0], sizes = [8, 128], strides = [1, 1]} : vector<8x384xf32> to vector<8x128xf32>
    %125 = vector.extract_strided_slice %123 {offsets = [0, 0], sizes = [8, 128], strides = [1, 1]} : vector<8x384xf32> to vector<8x128xf32>
    %126 = arith.addf %124, %125 : vector<8x128xf32>
    %127 = arith.negf %126 : vector<8x128xf32>
    %128 = math.exp %127 : vector<8x128xf32>
    %cst_54 = arith.constant 1.000000e+00 : f32
    %129 = vector.broadcast %cst_54 : f32 to vector<8x128xf32>
    %130 = arith.addf %129, %128 : vector<8x128xf32>
    %131 = arith.divf %129, %130 : vector<8x128xf32>
    %132 = vector.extract_strided_slice %120 {offsets = [0, 128], sizes = [8, 128], strides = [1, 1]} : vector<8x384xf32> to vector<8x128xf32>
    %133 = vector.extract_strided_slice %123 {offsets = [0, 128], sizes = [8, 128], strides = [1, 1]} : vector<8x384xf32> to vector<8x128xf32>
    %134 = arith.addf %132, %133 : vector<8x128xf32>
    %135 = arith.negf %134 : vector<8x128xf32>
    %136 = math.exp %135 : vector<8x128xf32>
    %cst_55 = arith.constant 1.000000e+00 : f32
    %137 = vector.broadcast %cst_55 : f32 to vector<8x128xf32>
    %138 = arith.addf %137, %136 : vector<8x128xf32>
    %139 = arith.divf %137, %138 : vector<8x128xf32>
    %140 = vector.extract_strided_slice %120 {offsets = [0, 256], sizes = [8, 128], strides = [1, 1]} : vector<8x384xf32> to vector<8x128xf32>
    %141 = vector.extract_strided_slice %123 {offsets = [0, 256], sizes = [8, 128], strides = [1, 1]} : vector<8x384xf32> to vector<8x128xf32>
    %142 = arith.addf %141, %11 : vector<8x128xf32>
    %143 = arith.mulf %131, %142 : vector<8x128xf32>
    %144 = arith.addf %140, %143 : vector<8x128xf32>
    %145 = math.tanh %144 : vector<8x128xf32>
    %146 = arith.subf %121, %145 : vector<8x128xf32>
    %147 = arith.mulf %139, %146 : vector<8x128xf32>
    %148 = arith.addf %145, %147 : vector<8x128xf32>
    %c0_56 = arith.constant 0 : index
    %c0_57 = arith.constant 0 : index
    %149 = vector.load %arg14[%c0_56, %c0_57] : memref<8x128xf32, #tpu.memory_space<vmem>>, vector<8x128xf32>
    tpu.vector_store %arg14[%c0_56, %c0_57], %148 {strides = array<i32>} : memref<8x128xf32, #tpu.memory_space<vmem>>, vector<8x128xf32>,
    %150 = arith.index_cast %118 : i32 to index
    %c0_58 = arith.constant 0 : index
    %151 = vector.load %arg12[%150, %c0_58] : memref<64x128xf32, #tpu.memory_space<vmem>>, vector<8x128xf32>
    tpu.vector_store %arg12[%150, %c0_58], %148 {strides = array<i32>} : memref<64x128xf32, #tpu.memory_space<vmem>>, vector<8x128xf32>,
    %c4_i32 = arith.constant 4 : i32
    %c8_i32_59 = arith.constant 8 : i32
    %152 = arith.muli %c4_i32, %c8_i32_59 : i32
    %153 = tpu.assume_multiple %152, 8 : i32
    %154 = arith.index_cast %153 : i32 to index
    %c0_60 = arith.constant 0 : index
    %155 = vector.load %arg13[%154, %c0_60] : memref<64x384xf32, #tpu.memory_space<vmem>>, vector<8x384xf32>
    %c0_61 = arith.constant 0 : index
    %c0_62 = arith.constant 0 : index
    %156 = vector.load %arg14[%c0_61, %c0_62] : memref<8x128xf32, #tpu.memory_space<vmem>>, vector<8x128xf32>
    %c0_63 = arith.constant 0 : index
    %c0_64 = arith.constant 0 : index
    %157 = vector.load %arg2[%c0_63, %c0_64] : memref<128x384xf32, #tpu.memory_space<vmem>>, vector<128x384xf32>
    %cst_65 = arith.constant dense<0.000000e+00> : vector<8x384xf32>
    %158 = tpu.matmul %156, %157, %cst_65 {dimension_numbers = #tpu.dot_dimension_numbers<[1], [0], [0], [1], [0, 0, 1, 1], [], []>} : vector<8x128xf32>, vector<128x384xf32>, vector<8x384xf32> -> vector<8x384xf32>
    %159 = vector.extract_strided_slice %155 {offsets = [0, 0], sizes = [8, 128], strides = [1, 1]} : vector<8x384xf32> to vector<8x128xf32>
    %160 = vector.extract_strided_slice %158 {offsets = [0, 0], sizes = [8, 128], strides = [1, 1]} : vector<8x384xf32> to vector<8x128xf32>
    %161 = arith.addf %159, %160 : vector<8x128xf32>
    %162 = arith.negf %161 : vector<8x128xf32>
    %163 = math.exp %162 : vector<8x128xf32>
    %cst_66 = arith.constant 1.000000e+00 : f32
    %164 = vector.broadcast %cst_66 : f32 to vector<8x128xf32>
    %165 = arith.addf %164, %163 : vector<8x128xf32>
    %166 = arith.divf %164, %165 : vector<8x128xf32>
    %167 = vector.extract_strided_slice %155 {offsets = [0, 128], sizes = [8, 128], strides = [1, 1]} : vector<8x384xf32> to vector<8x128xf32>
    %168 = vector.extract_strided_slice %158 {offsets = [0, 128], sizes = [8, 128], strides = [1, 1]} : vector<8x384xf32> to vector<8x128xf32>
    %169 = arith.addf %167, %168 : vector<8x128xf32>
    %170 = arith.negf %169 : vector<8x128xf32>
    %171 = math.exp %170 : vector<8x128xf32>
    %cst_67 = arith.constant 1.000000e+00 : f32
    %172 = vector.broadcast %cst_67 : f32 to vector<8x128xf32>
    %173 = arith.addf %172, %171 : vector<8x128xf32>
    %174 = arith.divf %172, %173 : vector<8x128xf32>
    %175 = vector.extract_strided_slice %155 {offsets = [0, 256], sizes = [8, 128], strides = [1, 1]} : vector<8x384xf32> to vector<8x128xf32>
    %176 = vector.extract_strided_slice %158 {offsets = [0, 256], sizes = [8, 128], strides = [1, 1]} : vector<8x384xf32> to vector<8x128xf32>
    %177 = arith.addf %176, %11 : vector<8x128xf32>
    %178 = arith.mulf %166, %177 : vector<8x128xf32>
    %179 = arith.addf %175, %178 : vector<8x128xf32>
    %180 = math.tanh %179 : vector<8x128xf32>
    %181 = arith.subf %156, %180 : vector<8x128xf32>
    %182 = arith.mulf %174, %181 : vector<8x128xf32>
    %183 = arith.addf %180, %182 : vector<8x128xf32>
    %c0_68 = arith.constant 0 : index
    %c0_69 = arith.constant 0 : index
    %184 = vector.load %arg14[%c0_68, %c0_69] : memref<8x128xf32, #tpu.memory_space<vmem>>, vector<8x128xf32>
    tpu.vector_store %arg14[%c0_68, %c0_69], %183 {strides = array<i32>} : memref<8x128xf32, #tpu.memory_space<vmem>>, vector<8x128xf32>,
    %185 = arith.index_cast %153 : i32 to index
    %c0_70 = arith.constant 0 : index
    %186 = vector.load %arg12[%185, %c0_70] : memref<64x128xf32, #tpu.memory_space<vmem>>, vector<8x128xf32>
    tpu.vector_store %arg12[%185, %c0_70], %183 {strides = array<i32>} : memref<64x128xf32, #tpu.memory_space<vmem>>, vector<8x128xf32>,
    %c5_i32 = arith.constant 5 : i32
    %c8_i32_71 = arith.constant 8 : i32
    %187 = arith.muli %c5_i32, %c8_i32_71 : i32
    %188 = tpu.assume_multiple %187, 8 : i32
    %189 = arith.index_cast %188 : i32 to index
    %c0_72 = arith.constant 0 : index
    %190 = vector.load %arg13[%189, %c0_72] : memref<64x384xf32, #tpu.memory_space<vmem>>, vector<8x384xf32>
    %c0_73 = arith.constant 0 : index
    %c0_74 = arith.constant 0 : index
    %191 = vector.load %arg14[%c0_73, %c0_74] : memref<8x128xf32, #tpu.memory_space<vmem>>, vector<8x128xf32>
    %c0_75 = arith.constant 0 : index
    %c0_76 = arith.constant 0 : index
    %192 = vector.load %arg2[%c0_75, %c0_76] : memref<128x384xf32, #tpu.memory_space<vmem>>, vector<128x384xf32>
    %cst_77 = arith.constant dense<0.000000e+00> : vector<8x384xf32>
    %193 = tpu.matmul %191, %192, %cst_77 {dimension_numbers = #tpu.dot_dimension_numbers<[1], [0], [0], [1], [0, 0, 1, 1], [], []>} : vector<8x128xf32>, vector<128x384xf32>, vector<8x384xf32> -> vector<8x384xf32>
    %194 = vector.extract_strided_slice %190 {offsets = [0, 0], sizes = [8, 128], strides = [1, 1]} : vector<8x384xf32> to vector<8x128xf32>
    %195 = vector.extract_strided_slice %193 {offsets = [0, 0], sizes = [8, 128], strides = [1, 1]} : vector<8x384xf32> to vector<8x128xf32>
    %196 = arith.addf %194, %195 : vector<8x128xf32>
    %197 = arith.negf %196 : vector<8x128xf32>
    %198 = math.exp %197 : vector<8x128xf32>
    %cst_78 = arith.constant 1.000000e+00 : f32
    %199 = vector.broadcast %cst_78 : f32 to vector<8x128xf32>
    %200 = arith.addf %199, %198 : vector<8x128xf32>
    %201 = arith.divf %199, %200 : vector<8x128xf32>
    %202 = vector.extract_strided_slice %190 {offsets = [0, 128], sizes = [8, 128], strides = [1, 1]} : vector<8x384xf32> to vector<8x128xf32>
    %203 = vector.extract_strided_slice %193 {offsets = [0, 128], sizes = [8, 128], strides = [1, 1]} : vector<8x384xf32> to vector<8x128xf32>
    %204 = arith.addf %202, %203 : vector<8x128xf32>
    %205 = arith.negf %204 : vector<8x128xf32>
    %206 = math.exp %205 : vector<8x128xf32>
    %cst_79 = arith.constant 1.000000e+00 : f32
    %207 = vector.broadcast %cst_79 : f32 to vector<8x128xf32>
    %208 = arith.addf %207, %206 : vector<8x128xf32>
    %209 = arith.divf %207, %208 : vector<8x128xf32>
    %210 = vector.extract_strided_slice %190 {offsets = [0, 256], sizes = [8, 128], strides = [1, 1]} : vector<8x384xf32> to vector<8x128xf32>
    %211 = vector.extract_strided_slice %193 {offsets = [0, 256], sizes = [8, 128], strides = [1, 1]} : vector<8x384xf32> to vector<8x128xf32>
    %212 = arith.addf %211, %11 : vector<8x128xf32>
    %213 = arith.mulf %201, %212 : vector<8x128xf32>
    %214 = arith.addf %210, %213 : vector<8x128xf32>
    %215 = math.tanh %214 : vector<8x128xf32>
    %216 = arith.subf %191, %215 : vector<8x128xf32>
    %217 = arith.mulf %209, %216 : vector<8x128xf32>
    %218 = arith.addf %215, %217 : vector<8x128xf32>
    %c0_80 = arith.constant 0 : index
    %c0_81 = arith.constant 0 : index
    %219 = vector.load %arg14[%c0_80, %c0_81] : memref<8x128xf32, #tpu.memory_space<vmem>>, vector<8x128xf32>
    tpu.vector_store %arg14[%c0_80, %c0_81], %218 {strides = array<i32>} : memref<8x128xf32, #tpu.memory_space<vmem>>, vector<8x128xf32>,
    %220 = arith.index_cast %188 : i32 to index
    %c0_82 = arith.constant 0 : index
    %221 = vector.load %arg12[%220, %c0_82] : memref<64x128xf32, #tpu.memory_space<vmem>>, vector<8x128xf32>
    tpu.vector_store %arg12[%220, %c0_82], %218 {strides = array<i32>} : memref<64x128xf32, #tpu.memory_space<vmem>>, vector<8x128xf32>,
    %c6_i32 = arith.constant 6 : i32
    %c8_i32_83 = arith.constant 8 : i32
    %222 = arith.muli %c6_i32, %c8_i32_83 : i32
    %223 = tpu.assume_multiple %222, 8 : i32
    %224 = arith.index_cast %223 : i32 to index
    %c0_84 = arith.constant 0 : index
    %225 = vector.load %arg13[%224, %c0_84] : memref<64x384xf32, #tpu.memory_space<vmem>>, vector<8x384xf32>
    %c0_85 = arith.constant 0 : index
    %c0_86 = arith.constant 0 : index
    %226 = vector.load %arg14[%c0_85, %c0_86] : memref<8x128xf32, #tpu.memory_space<vmem>>, vector<8x128xf32>
    %c0_87 = arith.constant 0 : index
    %c0_88 = arith.constant 0 : index
    %227 = vector.load %arg2[%c0_87, %c0_88] : memref<128x384xf32, #tpu.memory_space<vmem>>, vector<128x384xf32>
    %cst_89 = arith.constant dense<0.000000e+00> : vector<8x384xf32>
    %228 = tpu.matmul %226, %227, %cst_89 {dimension_numbers = #tpu.dot_dimension_numbers<[1], [0], [0], [1], [0, 0, 1, 1], [], []>} : vector<8x128xf32>, vector<128x384xf32>, vector<8x384xf32> -> vector<8x384xf32>
    %229 = vector.extract_strided_slice %225 {offsets = [0, 0], sizes = [8, 128], strides = [1, 1]} : vector<8x384xf32> to vector<8x128xf32>
    %230 = vector.extract_strided_slice %228 {offsets = [0, 0], sizes = [8, 128], strides = [1, 1]} : vector<8x384xf32> to vector<8x128xf32>
    %231 = arith.addf %229, %230 : vector<8x128xf32>
    %232 = arith.negf %231 : vector<8x128xf32>
    %233 = math.exp %232 : vector<8x128xf32>
    %cst_90 = arith.constant 1.000000e+00 : f32
    %234 = vector.broadcast %cst_90 : f32 to vector<8x128xf32>
    %235 = arith.addf %234, %233 : vector<8x128xf32>
    %236 = arith.divf %234, %235 : vector<8x128xf32>
    %237 = vector.extract_strided_slice %225 {offsets = [0, 128], sizes = [8, 128], strides = [1, 1]} : vector<8x384xf32> to vector<8x128xf32>
    %238 = vector.extract_strided_slice %228 {offsets = [0, 128], sizes = [8, 128], strides = [1, 1]} : vector<8x384xf32> to vector<8x128xf32>
    %239 = arith.addf %237, %238 : vector<8x128xf32>
    %240 = arith.negf %239 : vector<8x128xf32>
    %241 = math.exp %240 : vector<8x128xf32>
    %cst_91 = arith.constant 1.000000e+00 : f32
    %242 = vector.broadcast %cst_91 : f32 to vector<8x128xf32>
    %243 = arith.addf %242, %241 : vector<8x128xf32>
    %244 = arith.divf %242, %243 : vector<8x128xf32>
    %245 = vector.extract_strided_slice %225 {offsets = [0, 256], sizes = [8, 128], strides = [1, 1]} : vector<8x384xf32> to vector<8x128xf32>
    %246 = vector.extract_strided_slice %228 {offsets = [0, 256], sizes = [8, 128], strides = [1, 1]} : vector<8x384xf32> to vector<8x128xf32>
    %247 = arith.addf %246, %11 : vector<8x128xf32>
    %248 = arith.mulf %236, %247 : vector<8x128xf32>
    %249 = arith.addf %245, %248 : vector<8x128xf32>
    %250 = math.tanh %249 : vector<8x128xf32>
    %251 = arith.subf %226, %250 : vector<8x128xf32>
    %252 = arith.mulf %244, %251 : vector<8x128xf32>
    %253 = arith.addf %250, %252 : vector<8x128xf32>
    %c0_92 = arith.constant 0 : index
    %c0_93 = arith.constant 0 : index
    %254 = vector.load %arg14[%c0_92, %c0_93] : memref<8x128xf32, #tpu.memory_space<vmem>>, vector<8x128xf32>
    tpu.vector_store %arg14[%c0_92, %c0_93], %253 {strides = array<i32>} : memref<8x128xf32, #tpu.memory_space<vmem>>, vector<8x128xf32>,
    %255 = arith.index_cast %223 : i32 to index
    %c0_94 = arith.constant 0 : index
    %256 = vector.load %arg12[%255, %c0_94] : memref<64x128xf32, #tpu.memory_space<vmem>>, vector<8x128xf32>
    tpu.vector_store %arg12[%255, %c0_94], %253 {strides = array<i32>} : memref<64x128xf32, #tpu.memory_space<vmem>>, vector<8x128xf32>,
    %c7_i32 = arith.constant 7 : i32
    %c8_i32_95 = arith.constant 8 : i32
    %257 = arith.muli %c7_i32, %c8_i32_95 : i32
    %258 = tpu.assume_multiple %257, 8 : i32
    %259 = arith.index_cast %258 : i32 to index
    %c0_96 = arith.constant 0 : index
    %260 = vector.load %arg13[%259, %c0_96] : memref<64x384xf32, #tpu.memory_space<vmem>>, vector<8x384xf32>
    %c0_97 = arith.constant 0 : index
    %c0_98 = arith.constant 0 : index
    %261 = vector.load %arg14[%c0_97, %c0_98] : memref<8x128xf32, #tpu.memory_space<vmem>>, vector<8x128xf32>
    %c0_99 = arith.constant 0 : index
    %c0_100 = arith.constant 0 : index
    %262 = vector.load %arg2[%c0_99, %c0_100] : memref<128x384xf32, #tpu.memory_space<vmem>>, vector<128x384xf32>
    %cst_101 = arith.constant dense<0.000000e+00> : vector<8x384xf32>
    %263 = tpu.matmul %261, %262, %cst_101 {dimension_numbers = #tpu.dot_dimension_numbers<[1], [0], [0], [1], [0, 0, 1, 1], [], []>} : vector<8x128xf32>, vector<128x384xf32>, vector<8x384xf32> -> vector<8x384xf32>
    %264 = vector.extract_strided_slice %260 {offsets = [0, 0], sizes = [8, 128], strides = [1, 1]} : vector<8x384xf32> to vector<8x128xf32>
    %265 = vector.extract_strided_slice %263 {offsets = [0, 0], sizes = [8, 128], strides = [1, 1]} : vector<8x384xf32> to vector<8x128xf32>
    %266 = arith.addf %264, %265 : vector<8x128xf32>
    %267 = arith.negf %266 : vector<8x128xf32>
    %268 = math.exp %267 : vector<8x128xf32>
    %cst_102 = arith.constant 1.000000e+00 : f32
    %269 = vector.broadcast %cst_102 : f32 to vector<8x128xf32>
    %270 = arith.addf %269, %268 : vector<8x128xf32>
    %271 = arith.divf %269, %270 : vector<8x128xf32>
    %272 = vector.extract_strided_slice %260 {offsets = [0, 128], sizes = [8, 128], strides = [1, 1]} : vector<8x384xf32> to vector<8x128xf32>
    %273 = vector.extract_strided_slice %263 {offsets = [0, 128], sizes = [8, 128], strides = [1, 1]} : vector<8x384xf32> to vector<8x128xf32>
    %274 = arith.addf %272, %273 : vector<8x128xf32>
    %275 = arith.negf %274 : vector<8x128xf32>
    %276 = math.exp %275 : vector<8x128xf32>
    %cst_103 = arith.constant 1.000000e+00 : f32
    %277 = vector.broadcast %cst_103 : f32 to vector<8x128xf32>
    %278 = arith.addf %277, %276 : vector<8x128xf32>
    %279 = arith.divf %277, %278 : vector<8x128xf32>
    %280 = vector.extract_strided_slice %260 {offsets = [0, 256], sizes = [8, 128], strides = [1, 1]} : vector<8x384xf32> to vector<8x128xf32>
    %281 = vector.extract_strided_slice %263 {offsets = [0, 256], sizes = [8, 128], strides = [1, 1]} : vector<8x384xf32> to vector<8x128xf32>
    %282 = arith.addf %281, %11 : vector<8x128xf32>
    %283 = arith.mulf %271, %282 : vector<8x128xf32>
    %284 = arith.addf %280, %283 : vector<8x128xf32>
    %285 = math.tanh %284 : vector<8x128xf32>
    %286 = arith.subf %261, %285 : vector<8x128xf32>
    %287 = arith.mulf %279, %286 : vector<8x128xf32>
    %288 = arith.addf %285, %287 : vector<8x128xf32>
    %c0_104 = arith.constant 0 : index
    %c0_105 = arith.constant 0 : index
    %289 = vector.load %arg14[%c0_104, %c0_105] : memref<8x128xf32, #tpu.memory_space<vmem>>, vector<8x128xf32>
    tpu.vector_store %arg14[%c0_104, %c0_105], %288 {strides = array<i32>} : memref<8x128xf32, #tpu.memory_space<vmem>>, vector<8x128xf32>,
    %290 = arith.index_cast %258 : i32 to index
    %c0_106 = arith.constant 0 : index
    %291 = vector.load %arg12[%290, %c0_106] : memref<64x128xf32, #tpu.memory_space<vmem>>, vector<8x128xf32>
    tpu.vector_store %arg12[%290, %c0_106], %288 {strides = array<i32>} : memref<64x128xf32, #tpu.memory_space<vmem>>, vector<8x128xf32>,
    %c8_i32_107 = arith.constant 8 : i32
    %c0_108 = arith.constant 0 : index
    %c0_109 = arith.constant 0 : index
    %292 = vector.load %arg12[%c0_108, %c0_109] : memref<64x128xf32, #tpu.memory_space<vmem>>, vector<64x128xf32>
    %c0_110 = arith.constant 0 : index
    %c0_111 = arith.constant 0 : index
    %293 = vector.load %arg5[%c0_110, %c0_111] : memref<128x384xf32, #tpu.memory_space<vmem>>, vector<128x384xf32>
    %cst_112 = arith.constant dense<0.000000e+00> : vector<64x384xf32>
    %294 = tpu.matmul %292, %293, %cst_112 {dimension_numbers = #tpu.dot_dimension_numbers<[1], [0], [0], [1], [0, 0, 1, 1], [], []>} : vector<64x128xf32>, vector<128x384xf32>, vector<64x384xf32> -> vector<64x384xf32>
    %c0_113 = arith.constant 0 : index
    %c0_114 = arith.constant 0 : index
    %295 = vector.load %arg7[%c0_113, %c0_114] : memref<1x384xf32, #tpu.memory_space<vmem>>, vector<1x384xf32>
    %296 = vector.broadcast %295 : vector<1x384xf32> to vector<64x384xf32>
    %297 = arith.addf %294, %296 : vector<64x384xf32>
    %c0_115 = arith.constant 0 : index
    %c0_116 = arith.constant 0 : index
    %298 = vector.load %arg13[%c0_115, %c0_116] : memref<64x384xf32, #tpu.memory_space<vmem>>, vector<64x384xf32>
    tpu.vector_store %arg13[%c0_115, %c0_116], %297 {strides = array<i32>} : memref<64x384xf32, #tpu.memory_space<vmem>>, vector<64x384xf32>,
    %cst_117 = arith.constant 0.000000e+00 : f32
    %299 = vector.broadcast %cst_117 : f32 to vector<8x128xf32>
    %c0_118 = arith.constant 0 : index
    %c0_119 = arith.constant 0 : index
    %300 = vector.load %arg14[%c0_118, %c0_119] : memref<8x128xf32, #tpu.memory_space<vmem>>, vector<8x128xf32>
    tpu.vector_store %arg14[%c0_118, %c0_119], %299 {strides = array<i32>} : memref<8x128xf32, #tpu.memory_space<vmem>>, vector<8x128xf32>,
    %c0_120 = arith.constant 0 : index
    %c0_121 = arith.constant 0 : index
    %301 = vector.load %arg8[%c0_120, %c0_121] : memref<1x128xf32, #tpu.memory_space<vmem>>, vector<1x128xf32>
    %302 = vector.shape_cast %301 : vector<1x128xf32> to vector<1x128xf32>
    %303 = vector.broadcast %302 : vector<1x128xf32> to vector<8x128xf32>
    %c0_i32_122 = arith.constant 0 : i32
    %c8_i32_123 = arith.constant 8 : i32
    %304 = arith.muli %c0_i32_122, %c8_i32_123 : i32
    %305 = tpu.assume_multiple %304, 8 : i32
    %306 = arith.index_cast %305 : i32 to index
    %c0_124 = arith.constant 0 : index
    %307 = vector.load %arg13[%306, %c0_124] : memref<64x384xf32, #tpu.memory_space<vmem>>, vector<8x384xf32>
    %c0_125 = arith.constant 0 : index
    %c0_126 = arith.constant 0 : index
    %308 = vector.load %arg14[%c0_125, %c0_126] : memref<8x128xf32, #tpu.memory_space<vmem>>, vector<8x128xf32>
    %c0_127 = arith.constant 0 : index
    %c0_128 = arith.constant 0 : index
    %309 = vector.load %arg6[%c0_127, %c0_128] : memref<128x384xf32, #tpu.memory_space<vmem>>, vector<128x384xf32>
    %cst_129 = arith.constant dense<0.000000e+00> : vector<8x384xf32>
    %310 = tpu.matmul %308, %309, %cst_129 {dimension_numbers = #tpu.dot_dimension_numbers<[1], [0], [0], [1], [0, 0, 1, 1], [], []>} : vector<8x128xf32>, vector<128x384xf32>, vector<8x384xf32> -> vector<8x384xf32>
    %311 = vector.extract_strided_slice %307 {offsets = [0, 0], sizes = [8, 128], strides = [1, 1]} : vector<8x384xf32> to vector<8x128xf32>
    %312 = vector.extract_strided_slice %310 {offsets = [0, 0], sizes = [8, 128], strides = [1, 1]} : vector<8x384xf32> to vector<8x128xf32>
    %313 = arith.addf %311, %312 : vector<8x128xf32>
    %314 = arith.negf %313 : vector<8x128xf32>
    %315 = math.exp %314 : vector<8x128xf32>
    %cst_130 = arith.constant 1.000000e+00 : f32
    %316 = vector.broadcast %cst_130 : f32 to vector<8x128xf32>
    %317 = arith.addf %316, %315 : vector<8x128xf32>
    %318 = arith.divf %316, %317 : vector<8x128xf32>
    %319 = vector.extract_strided_slice %307 {offsets = [0, 128], sizes = [8, 128], strides = [1, 1]} : vector<8x384xf32> to vector<8x128xf32>
    %320 = vector.extract_strided_slice %310 {offsets = [0, 128], sizes = [8, 128], strides = [1, 1]} : vector<8x384xf32> to vector<8x128xf32>
    %321 = arith.addf %319, %320 : vector<8x128xf32>
    %322 = arith.negf %321 : vector<8x128xf32>
    %323 = math.exp %322 : vector<8x128xf32>
    %cst_131 = arith.constant 1.000000e+00 : f32
    %324 = vector.broadcast %cst_131 : f32 to vector<8x128xf32>
    %325 = arith.addf %324, %323 : vector<8x128xf32>
    %326 = arith.divf %324, %325 : vector<8x128xf32>
    %327 = vector.extract_strided_slice %307 {offsets = [0, 256], sizes = [8, 128], strides = [1, 1]} : vector<8x384xf32> to vector<8x128xf32>
    %328 = vector.extract_strided_slice %310 {offsets = [0, 256], sizes = [8, 128], strides = [1, 1]} : vector<8x384xf32> to vector<8x128xf32>
    %329 = arith.addf %328, %303 : vector<8x128xf32>
    %330 = arith.mulf %318, %329 : vector<8x128xf32>
    %331 = arith.addf %327, %330 : vector<8x128xf32>
    %332 = math.tanh %331 : vector<8x128xf32>
    %333 = arith.subf %308, %332 : vector<8x128xf32>
    %334 = arith.mulf %326, %333 : vector<8x128xf32>
    %335 = arith.addf %332, %334 : vector<8x128xf32>
    %c0_132 = arith.constant 0 : index
    %c0_133 = arith.constant 0 : index
    %336 = vector.load %arg14[%c0_132, %c0_133] : memref<8x128xf32, #tpu.memory_space<vmem>>, vector<8x128xf32>
    tpu.vector_store %arg14[%c0_132, %c0_133], %335 {strides = array<i32>} : memref<8x128xf32, #tpu.memory_space<vmem>>, vector<8x128xf32>,
    %c1_i32_134 = arith.constant 1 : i32
    %c8_i32_135 = arith.constant 8 : i32
    %337 = arith.muli %c1_i32_134, %c8_i32_135 : i32
    %338 = tpu.assume_multiple %337, 8 : i32
    %339 = arith.index_cast %338 : i32 to index
    %c0_136 = arith.constant 0 : index
    %340 = vector.load %arg13[%339, %c0_136] : memref<64x384xf32, #tpu.memory_space<vmem>>, vector<8x384xf32>
    %c0_137 = arith.constant 0 : index
    %c0_138 = arith.constant 0 : index
    %341 = vector.load %arg14[%c0_137, %c0_138] : memref<8x128xf32, #tpu.memory_space<vmem>>, vector<8x128xf32>
    %c0_139 = arith.constant 0 : index
    %c0_140 = arith.constant 0 : index
    %342 = vector.load %arg6[%c0_139, %c0_140] : memref<128x384xf32, #tpu.memory_space<vmem>>, vector<128x384xf32>
    %cst_141 = arith.constant dense<0.000000e+00> : vector<8x384xf32>
    %343 = tpu.matmul %341, %342, %cst_141 {dimension_numbers = #tpu.dot_dimension_numbers<[1], [0], [0], [1], [0, 0, 1, 1], [], []>} : vector<8x128xf32>, vector<128x384xf32>, vector<8x384xf32> -> vector<8x384xf32>
    %344 = vector.extract_strided_slice %340 {offsets = [0, 0], sizes = [8, 128], strides = [1, 1]} : vector<8x384xf32> to vector<8x128xf32>
    %345 = vector.extract_strided_slice %343 {offsets = [0, 0], sizes = [8, 128], strides = [1, 1]} : vector<8x384xf32> to vector<8x128xf32>
    %346 = arith.addf %344, %345 : vector<8x128xf32>
    %347 = arith.negf %346 : vector<8x128xf32>
    %348 = math.exp %347 : vector<8x128xf32>
    %cst_142 = arith.constant 1.000000e+00 : f32
    %349 = vector.broadcast %cst_142 : f32 to vector<8x128xf32>
    %350 = arith.addf %349, %348 : vector<8x128xf32>
    %351 = arith.divf %349, %350 : vector<8x128xf32>
    %352 = vector.extract_strided_slice %340 {offsets = [0, 128], sizes = [8, 128], strides = [1, 1]} : vector<8x384xf32> to vector<8x128xf32>
    %353 = vector.extract_strided_slice %343 {offsets = [0, 128], sizes = [8, 128], strides = [1, 1]} : vector<8x384xf32> to vector<8x128xf32>
    %354 = arith.addf %352, %353 : vector<8x128xf32>
    %355 = arith.negf %354 : vector<8x128xf32>
    %356 = math.exp %355 : vector<8x128xf32>
    %cst_143 = arith.constant 1.000000e+00 : f32
    %357 = vector.broadcast %cst_143 : f32 to vector<8x128xf32>
    %358 = arith.addf %357, %356 : vector<8x128xf32>
    %359 = arith.divf %357, %358 : vector<8x128xf32>
    %360 = vector.extract_strided_slice %340 {offsets = [0, 256], sizes = [8, 128], strides = [1, 1]} : vector<8x384xf32> to vector<8x128xf32>
    %361 = vector.extract_strided_slice %343 {offsets = [0, 256], sizes = [8, 128], strides = [1, 1]} : vector<8x384xf32> to vector<8x128xf32>
    %362 = arith.addf %361, %303 : vector<8x128xf32>
    %363 = arith.mulf %351, %362 : vector<8x128xf32>
    %364 = arith.addf %360, %363 : vector<8x128xf32>
    %365 = math.tanh %364 : vector<8x128xf32>
    %366 = arith.subf %341, %365 : vector<8x128xf32>
    %367 = arith.mulf %359, %366 : vector<8x128xf32>
    %368 = arith.addf %365, %367 : vector<8x128xf32>
    %c0_144 = arith.constant 0 : index
    %c0_145 = arith.constant 0 : index
    %369 = vector.load %arg14[%c0_144, %c0_145] : memref<8x128xf32, #tpu.memory_space<vmem>>, vector<8x128xf32>
    tpu.vector_store %arg14[%c0_144, %c0_145], %368 {strides = array<i32>} : memref<8x128xf32, #tpu.memory_space<vmem>>, vector<8x128xf32>,
    %c2_i32_146 = arith.constant 2 : i32
    %c8_i32_147 = arith.constant 8 : i32
    %370 = arith.muli %c2_i32_146, %c8_i32_147 : i32
    %371 = tpu.assume_multiple %370, 8 : i32
    %372 = arith.index_cast %371 : i32 to index
    %c0_148 = arith.constant 0 : index
    %373 = vector.load %arg13[%372, %c0_148] : memref<64x384xf32, #tpu.memory_space<vmem>>, vector<8x384xf32>
    %c0_149 = arith.constant 0 : index
    %c0_150 = arith.constant 0 : index
    %374 = vector.load %arg14[%c0_149, %c0_150] : memref<8x128xf32, #tpu.memory_space<vmem>>, vector<8x128xf32>
    %c0_151 = arith.constant 0 : index
    %c0_152 = arith.constant 0 : index
    %375 = vector.load %arg6[%c0_151, %c0_152] : memref<128x384xf32, #tpu.memory_space<vmem>>, vector<128x384xf32>
    %cst_153 = arith.constant dense<0.000000e+00> : vector<8x384xf32>
    %376 = tpu.matmul %374, %375, %cst_153 {dimension_numbers = #tpu.dot_dimension_numbers<[1], [0], [0], [1], [0, 0, 1, 1], [], []>} : vector<8x128xf32>, vector<128x384xf32>, vector<8x384xf32> -> vector<8x384xf32>
    %377 = vector.extract_strided_slice %373 {offsets = [0, 0], sizes = [8, 128], strides = [1, 1]} : vector<8x384xf32> to vector<8x128xf32>
    %378 = vector.extract_strided_slice %376 {offsets = [0, 0], sizes = [8, 128], strides = [1, 1]} : vector<8x384xf32> to vector<8x128xf32>
    %379 = arith.addf %377, %378 : vector<8x128xf32>
    %380 = arith.negf %379 : vector<8x128xf32>
    %381 = math.exp %380 : vector<8x128xf32>
    %cst_154 = arith.constant 1.000000e+00 : f32
    %382 = vector.broadcast %cst_154 : f32 to vector<8x128xf32>
    %383 = arith.addf %382, %381 : vector<8x128xf32>
    %384 = arith.divf %382, %383 : vector<8x128xf32>
    %385 = vector.extract_strided_slice %373 {offsets = [0, 128], sizes = [8, 128], strides = [1, 1]} : vector<8x384xf32> to vector<8x128xf32>
    %386 = vector.extract_strided_slice %376 {offsets = [0, 128], sizes = [8, 128], strides = [1, 1]} : vector<8x384xf32> to vector<8x128xf32>
    %387 = arith.addf %385, %386 : vector<8x128xf32>
    %388 = arith.negf %387 : vector<8x128xf32>
    %389 = math.exp %388 : vector<8x128xf32>
    %cst_155 = arith.constant 1.000000e+00 : f32
    %390 = vector.broadcast %cst_155 : f32 to vector<8x128xf32>
    %391 = arith.addf %390, %389 : vector<8x128xf32>
    %392 = arith.divf %390, %391 : vector<8x128xf32>
    %393 = vector.extract_strided_slice %373 {offsets = [0, 256], sizes = [8, 128], strides = [1, 1]} : vector<8x384xf32> to vector<8x128xf32>
    %394 = vector.extract_strided_slice %376 {offsets = [0, 256], sizes = [8, 128], strides = [1, 1]} : vector<8x384xf32> to vector<8x128xf32>
    %395 = arith.addf %394, %303 : vector<8x128xf32>
    %396 = arith.mulf %384, %395 : vector<8x128xf32>
    %397 = arith.addf %393, %396 : vector<8x128xf32>
    %398 = math.tanh %397 : vector<8x128xf32>
    %399 = arith.subf %374, %398 : vector<8x128xf32>
    %400 = arith.mulf %392, %399 : vector<8x128xf32>
    %401 = arith.addf %398, %400 : vector<8x128xf32>
    %c0_156 = arith.constant 0 : index
    %c0_157 = arith.constant 0 : index
    %402 = vector.load %arg14[%c0_156, %c0_157] : memref<8x128xf32, #tpu.memory_space<vmem>>, vector<8x128xf32>
    tpu.vector_store %arg14[%c0_156, %c0_157], %401 {strides = array<i32>} : memref<8x128xf32, #tpu.memory_space<vmem>>, vector<8x128xf32>,
    %c3_i32_158 = arith.constant 3 : i32
    %c8_i32_159 = arith.constant 8 : i32
    %403 = arith.muli %c3_i32_158, %c8_i32_159 : i32
    %404 = tpu.assume_multiple %403, 8 : i32
    %405 = arith.index_cast %404 : i32 to index
    %c0_160 = arith.constant 0 : index
    %406 = vector.load %arg13[%405, %c0_160] : memref<64x384xf32, #tpu.memory_space<vmem>>, vector<8x384xf32>
    %c0_161 = arith.constant 0 : index
    %c0_162 = arith.constant 0 : index
    %407 = vector.load %arg14[%c0_161, %c0_162] : memref<8x128xf32, #tpu.memory_space<vmem>>, vector<8x128xf32>
    %c0_163 = arith.constant 0 : index
    %c0_164 = arith.constant 0 : index
    %408 = vector.load %arg6[%c0_163, %c0_164] : memref<128x384xf32, #tpu.memory_space<vmem>>, vector<128x384xf32>
    %cst_165 = arith.constant dense<0.000000e+00> : vector<8x384xf32>
    %409 = tpu.matmul %407, %408, %cst_165 {dimension_numbers = #tpu.dot_dimension_numbers<[1], [0], [0], [1], [0, 0, 1, 1], [], []>} : vector<8x128xf32>, vector<128x384xf32>, vector<8x384xf32> -> vector<8x384xf32>
    %410 = vector.extract_strided_slice %406 {offsets = [0, 0], sizes = [8, 128], strides = [1, 1]} : vector<8x384xf32> to vector<8x128xf32>
    %411 = vector.extract_strided_slice %409 {offsets = [0, 0], sizes = [8, 128], strides = [1, 1]} : vector<8x384xf32> to vector<8x128xf32>
    %412 = arith.addf %410, %411 : vector<8x128xf32>
    %413 = arith.negf %412 : vector<8x128xf32>
    %414 = math.exp %413 : vector<8x128xf32>
    %cst_166 = arith.constant 1.000000e+00 : f32
    %415 = vector.broadcast %cst_166 : f32 to vector<8x128xf32>
    %416 = arith.addf %415, %414 : vector<8x128xf32>
    %417 = arith.divf %415, %416 : vector<8x128xf32>
    %418 = vector.extract_strided_slice %406 {offsets = [0, 128], sizes = [8, 128], strides = [1, 1]} : vector<8x384xf32> to vector<8x128xf32>
    %419 = vector.extract_strided_slice %409 {offsets = [0, 128], sizes = [8, 128], strides = [1, 1]} : vector<8x384xf32> to vector<8x128xf32>
    %420 = arith.addf %418, %419 : vector<8x128xf32>
    %421 = arith.negf %420 : vector<8x128xf32>
    %422 = math.exp %421 : vector<8x128xf32>
    %cst_167 = arith.constant 1.000000e+00 : f32
    %423 = vector.broadcast %cst_167 : f32 to vector<8x128xf32>
    %424 = arith.addf %423, %422 : vector<8x128xf32>
    %425 = arith.divf %423, %424 : vector<8x128xf32>
    %426 = vector.extract_strided_slice %406 {offsets = [0, 256], sizes = [8, 128], strides = [1, 1]} : vector<8x384xf32> to vector<8x128xf32>
    %427 = vector.extract_strided_slice %409 {offsets = [0, 256], sizes = [8, 128], strides = [1, 1]} : vector<8x384xf32> to vector<8x128xf32>
    %428 = arith.addf %427, %303 : vector<8x128xf32>
    %429 = arith.mulf %417, %428 : vector<8x128xf32>
    %430 = arith.addf %426, %429 : vector<8x128xf32>
    %431 = math.tanh %430 : vector<8x128xf32>
    %432 = arith.subf %407, %431 : vector<8x128xf32>
    %433 = arith.mulf %425, %432 : vector<8x128xf32>
    %434 = arith.addf %431, %433 : vector<8x128xf32>
    %c0_168 = arith.constant 0 : index
    %c0_169 = arith.constant 0 : index
    %435 = vector.load %arg14[%c0_168, %c0_169] : memref<8x128xf32, #tpu.memory_space<vmem>>, vector<8x128xf32>
    tpu.vector_store %arg14[%c0_168, %c0_169], %434 {strides = array<i32>} : memref<8x128xf32, #tpu.memory_space<vmem>>, vector<8x128xf32>,
    %c4_i32_170 = arith.constant 4 : i32
    %c8_i32_171 = arith.constant 8 : i32
    %436 = arith.muli %c4_i32_170, %c8_i32_171 : i32
    %437 = tpu.assume_multiple %436, 8 : i32
    %438 = arith.index_cast %437 : i32 to index
    %c0_172 = arith.constant 0 : index
    %439 = vector.load %arg13[%438, %c0_172] : memref<64x384xf32, #tpu.memory_space<vmem>>, vector<8x384xf32>
    %c0_173 = arith.constant 0 : index
    %c0_174 = arith.constant 0 : index
    %440 = vector.load %arg14[%c0_173, %c0_174] : memref<8x128xf32, #tpu.memory_space<vmem>>, vector<8x128xf32>
    %c0_175 = arith.constant 0 : index
    %c0_176 = arith.constant 0 : index
    %441 = vector.load %arg6[%c0_175, %c0_176] : memref<128x384xf32, #tpu.memory_space<vmem>>, vector<128x384xf32>
    %cst_177 = arith.constant dense<0.000000e+00> : vector<8x384xf32>
    %442 = tpu.matmul %440, %441, %cst_177 {dimension_numbers = #tpu.dot_dimension_numbers<[1], [0], [0], [1], [0, 0, 1, 1], [], []>} : vector<8x128xf32>, vector<128x384xf32>, vector<8x384xf32> -> vector<8x384xf32>
    %443 = vector.extract_strided_slice %439 {offsets = [0, 0], sizes = [8, 128], strides = [1, 1]} : vector<8x384xf32> to vector<8x128xf32>
    %444 = vector.extract_strided_slice %442 {offsets = [0, 0], sizes = [8, 128], strides = [1, 1]} : vector<8x384xf32> to vector<8x128xf32>
    %445 = arith.addf %443, %444 : vector<8x128xf32>
    %446 = arith.negf %445 : vector<8x128xf32>
    %447 = math.exp %446 : vector<8x128xf32>
    %cst_178 = arith.constant 1.000000e+00 : f32
    %448 = vector.broadcast %cst_178 : f32 to vector<8x128xf32>
    %449 = arith.addf %448, %447 : vector<8x128xf32>
    %450 = arith.divf %448, %449 : vector<8x128xf32>
    %451 = vector.extract_strided_slice %439 {offsets = [0, 128], sizes = [8, 128], strides = [1, 1]} : vector<8x384xf32> to vector<8x128xf32>
    %452 = vector.extract_strided_slice %442 {offsets = [0, 128], sizes = [8, 128], strides = [1, 1]} : vector<8x384xf32> to vector<8x128xf32>
    %453 = arith.addf %451, %452 : vector<8x128xf32>
    %454 = arith.negf %453 : vector<8x128xf32>
    %455 = math.exp %454 : vector<8x128xf32>
    %cst_179 = arith.constant 1.000000e+00 : f32
    %456 = vector.broadcast %cst_179 : f32 to vector<8x128xf32>
    %457 = arith.addf %456, %455 : vector<8x128xf32>
    %458 = arith.divf %456, %457 : vector<8x128xf32>
    %459 = vector.extract_strided_slice %439 {offsets = [0, 256], sizes = [8, 128], strides = [1, 1]} : vector<8x384xf32> to vector<8x128xf32>
    %460 = vector.extract_strided_slice %442 {offsets = [0, 256], sizes = [8, 128], strides = [1, 1]} : vector<8x384xf32> to vector<8x128xf32>
    %461 = arith.addf %460, %303 : vector<8x128xf32>
    %462 = arith.mulf %450, %461 : vector<8x128xf32>
    %463 = arith.addf %459, %462 : vector<8x128xf32>
    %464 = math.tanh %463 : vector<8x128xf32>
    %465 = arith.subf %440, %464 : vector<8x128xf32>
    %466 = arith.mulf %458, %465 : vector<8x128xf32>
    %467 = arith.addf %464, %466 : vector<8x128xf32>
    %c0_180 = arith.constant 0 : index
    %c0_181 = arith.constant 0 : index
    %468 = vector.load %arg14[%c0_180, %c0_181] : memref<8x128xf32, #tpu.memory_space<vmem>>, vector<8x128xf32>
    tpu.vector_store %arg14[%c0_180, %c0_181], %467 {strides = array<i32>} : memref<8x128xf32, #tpu.memory_space<vmem>>, vector<8x128xf32>,
    %c5_i32_182 = arith.constant 5 : i32
    %c8_i32_183 = arith.constant 8 : i32
    %469 = arith.muli %c5_i32_182, %c8_i32_183 : i32
    %470 = tpu.assume_multiple %469, 8 : i32
    %471 = arith.index_cast %470 : i32 to index
    %c0_184 = arith.constant 0 : index
    %472 = vector.load %arg13[%471, %c0_184] : memref<64x384xf32, #tpu.memory_space<vmem>>, vector<8x384xf32>
    %c0_185 = arith.constant 0 : index
    %c0_186 = arith.constant 0 : index
    %473 = vector.load %arg14[%c0_185, %c0_186] : memref<8x128xf32, #tpu.memory_space<vmem>>, vector<8x128xf32>
    %c0_187 = arith.constant 0 : index
    %c0_188 = arith.constant 0 : index
    %474 = vector.load %arg6[%c0_187, %c0_188] : memref<128x384xf32, #tpu.memory_space<vmem>>, vector<128x384xf32>
    %cst_189 = arith.constant dense<0.000000e+00> : vector<8x384xf32>
    %475 = tpu.matmul %473, %474, %cst_189 {dimension_numbers = #tpu.dot_dimension_numbers<[1], [0], [0], [1], [0, 0, 1, 1], [], []>} : vector<8x128xf32>, vector<128x384xf32>, vector<8x384xf32> -> vector<8x384xf32>
    %476 = vector.extract_strided_slice %472 {offsets = [0, 0], sizes = [8, 128], strides = [1, 1]} : vector<8x384xf32> to vector<8x128xf32>
    %477 = vector.extract_strided_slice %475 {offsets = [0, 0], sizes = [8, 128], strides = [1, 1]} : vector<8x384xf32> to vector<8x128xf32>
    %478 = arith.addf %476, %477 : vector<8x128xf32>
    %479 = arith.negf %478 : vector<8x128xf32>
    %480 = math.exp %479 : vector<8x128xf32>
    %cst_190 = arith.constant 1.000000e+00 : f32
    %481 = vector.broadcast %cst_190 : f32 to vector<8x128xf32>
    %482 = arith.addf %481, %480 : vector<8x128xf32>
    %483 = arith.divf %481, %482 : vector<8x128xf32>
    %484 = vector.extract_strided_slice %472 {offsets = [0, 128], sizes = [8, 128], strides = [1, 1]} : vector<8x384xf32> to vector<8x128xf32>
    %485 = vector.extract_strided_slice %475 {offsets = [0, 128], sizes = [8, 128], strides = [1, 1]} : vector<8x384xf32> to vector<8x128xf32>
    %486 = arith.addf %484, %485 : vector<8x128xf32>
    %487 = arith.negf %486 : vector<8x128xf32>
    %488 = math.exp %487 : vector<8x128xf32>
    %cst_191 = arith.constant 1.000000e+00 : f32
    %489 = vector.broadcast %cst_191 : f32 to vector<8x128xf32>
    %490 = arith.addf %489, %488 : vector<8x128xf32>
    %491 = arith.divf %489, %490 : vector<8x128xf32>
    %492 = vector.extract_strided_slice %472 {offsets = [0, 256], sizes = [8, 128], strides = [1, 1]} : vector<8x384xf32> to vector<8x128xf32>
    %493 = vector.extract_strided_slice %475 {offsets = [0, 256], sizes = [8, 128], strides = [1, 1]} : vector<8x384xf32> to vector<8x128xf32>
    %494 = arith.addf %493, %303 : vector<8x128xf32>
    %495 = arith.mulf %483, %494 : vector<8x128xf32>
    %496 = arith.addf %492, %495 : vector<8x128xf32>
    %497 = math.tanh %496 : vector<8x128xf32>
    %498 = arith.subf %473, %497 : vector<8x128xf32>
    %499 = arith.mulf %491, %498 : vector<8x128xf32>
    %500 = arith.addf %497, %499 : vector<8x128xf32>
    %c0_192 = arith.constant 0 : index
    %c0_193 = arith.constant 0 : index
    %501 = vector.load %arg14[%c0_192, %c0_193] : memref<8x128xf32, #tpu.memory_space<vmem>>, vector<8x128xf32>
    tpu.vector_store %arg14[%c0_192, %c0_193], %500 {strides = array<i32>} : memref<8x128xf32, #tpu.memory_space<vmem>>, vector<8x128xf32>,
    %c6_i32_194 = arith.constant 6 : i32
    %c8_i32_195 = arith.constant 8 : i32
    %502 = arith.muli %c6_i32_194, %c8_i32_195 : i32
    %503 = tpu.assume_multiple %502, 8 : i32
    %504 = arith.index_cast %503 : i32 to index
    %c0_196 = arith.constant 0 : index
    %505 = vector.load %arg13[%504, %c0_196] : memref<64x384xf32, #tpu.memory_space<vmem>>, vector<8x384xf32>
    %c0_197 = arith.constant 0 : index
    %c0_198 = arith.constant 0 : index
    %506 = vector.load %arg14[%c0_197, %c0_198] : memref<8x128xf32, #tpu.memory_space<vmem>>, vector<8x128xf32>
    %c0_199 = arith.constant 0 : index
    %c0_200 = arith.constant 0 : index
    %507 = vector.load %arg6[%c0_199, %c0_200] : memref<128x384xf32, #tpu.memory_space<vmem>>, vector<128x384xf32>
    %cst_201 = arith.constant dense<0.000000e+00> : vector<8x384xf32>
    %508 = tpu.matmul %506, %507, %cst_201 {dimension_numbers = #tpu.dot_dimension_numbers<[1], [0], [0], [1], [0, 0, 1, 1], [], []>} : vector<8x128xf32>, vector<128x384xf32>, vector<8x384xf32> -> vector<8x384xf32>
    %509 = vector.extract_strided_slice %505 {offsets = [0, 0], sizes = [8, 128], strides = [1, 1]} : vector<8x384xf32> to vector<8x128xf32>
    %510 = vector.extract_strided_slice %508 {offsets = [0, 0], sizes = [8, 128], strides = [1, 1]} : vector<8x384xf32> to vector<8x128xf32>
    %511 = arith.addf %509, %510 : vector<8x128xf32>
    %512 = arith.negf %511 : vector<8x128xf32>
    %513 = math.exp %512 : vector<8x128xf32>
    %cst_202 = arith.constant 1.000000e+00 : f32
    %514 = vector.broadcast %cst_202 : f32 to vector<8x128xf32>
    %515 = arith.addf %514, %513 : vector<8x128xf32>
    %516 = arith.divf %514, %515 : vector<8x128xf32>
    %517 = vector.extract_strided_slice %505 {offsets = [0, 128], sizes = [8, 128], strides = [1, 1]} : vector<8x384xf32> to vector<8x128xf32>
    %518 = vector.extract_strided_slice %508 {offsets = [0, 128], sizes = [8, 128], strides = [1, 1]} : vector<8x384xf32> to vector<8x128xf32>
    %519 = arith.addf %517, %518 : vector<8x128xf32>
    %520 = arith.negf %519 : vector<8x128xf32>
    %521 = math.exp %520 : vector<8x128xf32>
    %cst_203 = arith.constant 1.000000e+00 : f32
    %522 = vector.broadcast %cst_203 : f32 to vector<8x128xf32>
    %523 = arith.addf %522, %521 : vector<8x128xf32>
    %524 = arith.divf %522, %523 : vector<8x128xf32>
    %525 = vector.extract_strided_slice %505 {offsets = [0, 256], sizes = [8, 128], strides = [1, 1]} : vector<8x384xf32> to vector<8x128xf32>
    %526 = vector.extract_strided_slice %508 {offsets = [0, 256], sizes = [8, 128], strides = [1, 1]} : vector<8x384xf32> to vector<8x128xf32>
    %527 = arith.addf %526, %303 : vector<8x128xf32>
    %528 = arith.mulf %516, %527 : vector<8x128xf32>
    %529 = arith.addf %525, %528 : vector<8x128xf32>
    %530 = math.tanh %529 : vector<8x128xf32>
    %531 = arith.subf %506, %530 : vector<8x128xf32>
    %532 = arith.mulf %524, %531 : vector<8x128xf32>
    %533 = arith.addf %530, %532 : vector<8x128xf32>
    %c0_204 = arith.constant 0 : index
    %c0_205 = arith.constant 0 : index
    %534 = vector.load %arg14[%c0_204, %c0_205] : memref<8x128xf32, #tpu.memory_space<vmem>>, vector<8x128xf32>
    tpu.vector_store %arg14[%c0_204, %c0_205], %533 {strides = array<i32>} : memref<8x128xf32, #tpu.memory_space<vmem>>, vector<8x128xf32>,
    %c7_i32_206 = arith.constant 7 : i32
    %c8_i32_207 = arith.constant 8 : i32
    %535 = arith.muli %c7_i32_206, %c8_i32_207 : i32
    %536 = tpu.assume_multiple %535, 8 : i32
    %537 = arith.index_cast %536 : i32 to index
    %c0_208 = arith.constant 0 : index
    %538 = vector.load %arg13[%537, %c0_208] : memref<64x384xf32, #tpu.memory_space<vmem>>, vector<8x384xf32>
    %c0_209 = arith.constant 0 : index
    %c0_210 = arith.constant 0 : index
    %539 = vector.load %arg14[%c0_209, %c0_210] : memref<8x128xf32, #tpu.memory_space<vmem>>, vector<8x128xf32>
    %c0_211 = arith.constant 0 : index
    %c0_212 = arith.constant 0 : index
    %540 = vector.load %arg6[%c0_211, %c0_212] : memref<128x384xf32, #tpu.memory_space<vmem>>, vector<128x384xf32>
    %cst_213 = arith.constant dense<0.000000e+00> : vector<8x384xf32>
    %541 = tpu.matmul %539, %540, %cst_213 {dimension_numbers = #tpu.dot_dimension_numbers<[1], [0], [0], [1], [0, 0, 1, 1], [], []>} : vector<8x128xf32>, vector<128x384xf32>, vector<8x384xf32> -> vector<8x384xf32>
    %542 = vector.extract_strided_slice %538 {offsets = [0, 0], sizes = [8, 128], strides = [1, 1]} : vector<8x384xf32> to vector<8x128xf32>
    %543 = vector.extract_strided_slice %541 {offsets = [0, 0], sizes = [8, 128], strides = [1, 1]} : vector<8x384xf32> to vector<8x128xf32>
    %544 = arith.addf %542, %543 : vector<8x128xf32>
    %545 = arith.negf %544 : vector<8x128xf32>
    %546 = math.exp %545 : vector<8x128xf32>
    %cst_214 = arith.constant 1.000000e+00 : f32
    %547 = vector.broadcast %cst_214 : f32 to vector<8x128xf32>
    %548 = arith.addf %547, %546 : vector<8x128xf32>
    %549 = arith.divf %547, %548 : vector<8x128xf32>
    %550 = vector.extract_strided_slice %538 {offsets = [0, 128], sizes = [8, 128], strides = [1, 1]} : vector<8x384xf32> to vector<8x128xf32>
    %551 = vector.extract_strided_slice %541 {offsets = [0, 128], sizes = [8, 128], strides = [1, 1]} : vector<8x384xf32> to vector<8x128xf32>
    %552 = arith.addf %550, %551 : vector<8x128xf32>
    %553 = arith.negf %552 : vector<8x128xf32>
    %554 = math.exp %553 : vector<8x128xf32>
    %cst_215 = arith.constant 1.000000e+00 : f32
    %555 = vector.broadcast %cst_215 : f32 to vector<8x128xf32>
    %556 = arith.addf %555, %554 : vector<8x128xf32>
    %557 = arith.divf %555, %556 : vector<8x128xf32>
    %558 = vector.extract_strided_slice %538 {offsets = [0, 256], sizes = [8, 128], strides = [1, 1]} : vector<8x384xf32> to vector<8x128xf32>
    %559 = vector.extract_strided_slice %541 {offsets = [0, 256], sizes = [8, 128], strides = [1, 1]} : vector<8x384xf32> to vector<8x128xf32>
    %560 = arith.addf %559, %303 : vector<8x128xf32>
    %561 = arith.mulf %549, %560 : vector<8x128xf32>
    %562 = arith.addf %558, %561 : vector<8x128xf32>
    %563 = math.tanh %562 : vector<8x128xf32>
    %564 = arith.subf %539, %563 : vector<8x128xf32>
    %565 = arith.mulf %557, %564 : vector<8x128xf32>
    %566 = arith.addf %563, %565 : vector<8x128xf32>
    %c0_216 = arith.constant 0 : index
    %c0_217 = arith.constant 0 : index
    %567 = vector.load %arg14[%c0_216, %c0_217] : memref<8x128xf32, #tpu.memory_space<vmem>>, vector<8x128xf32>
    tpu.vector_store %arg14[%c0_216, %c0_217], %566 {strides = array<i32>} : memref<8x128xf32, #tpu.memory_space<vmem>>, vector<8x128xf32>,
    %c8_i32_218 = arith.constant 8 : i32
    %c0_219 = arith.constant 0 : index
    %c0_220 = arith.constant 0 : index
    %568 = vector.load %arg14[%c0_219, %c0_220] : memref<8x128xf32, #tpu.memory_space<vmem>>, vector<8x128xf32>
    %c0_221 = arith.constant 0 : index
    %c0_222 = arith.constant 0 : index
    %569 = vector.load %arg9[%c0_221, %c0_222] : memref<128x128xf32, #tpu.memory_space<vmem>>, vector<128x128xf32>
    %cst_223 = arith.constant dense<0.000000e+00> : vector<8x128xf32>
    %570 = tpu.matmul %568, %569, %cst_223 {dimension_numbers = #tpu.dot_dimension_numbers<[1], [0], [0], [1], [0, 0, 1, 1], [], []>} : vector<8x128xf32>, vector<128x128xf32>, vector<8x128xf32> -> vector<8x128xf32>
    %c0_224 = arith.constant 0 : index
    %c0_225 = arith.constant 0 : index
    %571 = vector.load %arg10[%c0_224, %c0_225] : memref<1x128xf32, #tpu.memory_space<vmem>>, vector<1x128xf32>
    %572 = vector.broadcast %571 : vector<1x128xf32> to vector<8x128xf32>
    %573 = arith.addf %570, %572 : vector<8x128xf32>
    %c0_226 = arith.constant 0 : index
    %c0_227 = arith.constant 0 : index
    %574 = vector.load %arg11[%c0_226, %c0_227] : memref<8x128xf32, #tpu.memory_space<vmem>>, vector<8x128xf32>
    tpu.vector_store %arg11[%c0_226, %c0_227], %573 {strides = array<i32>} : memref<8x128xf32, #tpu.memory_space<vmem>>, vector<8x128xf32>,
    return
  }
}

</mosaic_0001>

<bundles_post_ra>
// kernel: tpu_custom_call.1
= control target key start
LH: loop header
LB: loop body
LE: loop exit
PB: predicated region body
PF: predicated region fallthrough
CT: control target
= control target key end

     0   :  { %16 = vsyncpa [#allocation6], 0  ;;  %s5157_s0 = inlined_call_operand.vmem [shape: f32[64,16], index: 0, kind: input, shape index: {}]   ;;  %s5158_s1 = inlined_call_operand.vmem [shape: f32[16,384], index: 1, kind: input, shape index: {}]   ;;  %s5159_s2 = inlined_call_operand.hbm [shape: f32[128,384], index: 2, kind: input, shape index: {}]   ;;  %s5160_s3 = inlined_call_operand.vmem [shape: f32[1,384], index: 3, kind: input, shape index: {}]   ;;  %s5161_s4 = inlined_call_operand.vmem [shape: f32[1,128], index: 4, kind: input, shape index: {}]   ;;  %s5162_s5 = inlined_call_operand.hbm [shape: f32[128,384], index: 5, kind: input, shape index: {}]   ;;  %s5163_s6 = inlined_call_operand.hbm [shape: f32[128,384], index: 6, kind: input, shape index: {}]   ;;  %s5164_s7 = inlined_call_operand.vmem [shape: f32[1,384], index: 7, kind: input, shape index: {}]   ;;  %s5165_s8 = inlined_call_operand.vmem [shape: f32[1,128], index: 8, kind: input, shape index: {}]   ;;  %s5166_s9 = inlined_call_operand.hbm [shape: f32[128,128], index: 9, kind: input, shape index: {}]   ;;  %s5167_s10 = inlined_call_operand.vmem [shape: f32[1,128], index: 10, kind: input, shape index: {}]   ;;  %s5168_s11 = inlined_call_operand.hbm [shape: f32[8,128], index: 11, kind: output, shape index: {}]  }
   0x1   :  { %17 = vsyncpa [#allocation9], 0 }
   0x2   :  { %18 = vsyncpa [#allocation12], 0 }
   0x3   :  { %19 = vsyncpa [#allocation7], 0  ;;  %s45_s19 = sshll.u32 %s5162_s5, 4  ;;  %s3545_s20 = smov [#allocation8]   ;;  %s46_s19 = int_to_ptr.hbm [resolvable:$true] %s45_s19 }
   0x4   :  { %s47_s21 = sshll.u32 %s3545_s20, 4  ;;  %s28_s24 = sshll.u32 %s5159_s2, 4  ;;  %s48_s21 = int_to_ptr.vmem [resolvable:$true] %s47_s21  ;;  %s29_s24 = int_to_ptr.hbm [resolvable:$true] %s28_s24 }
   0x5   :  { %s3546_s25 = smov 384   ;;  %s3547_s26 = smov 24  }
   0x6   :  { %53 = dma.hbm_to_vmem [thread:$0]  %s46_s19, 6144, %s48_s21, [#allocation9], %s3546_s25, %s3546_s25, %s3547_s26  }
   0x7   :  { %s3548_s27 = smov [#allocation5]   ;;  %s58_s12 = sshll.u32 %s5163_s6, 4  ;;  %s59_s12 = int_to_ptr.hbm [resolvable:$true] %s58_s12 }
   0x8   :  { %s30_s28 = sshll.u32 %s3548_s27, 4  ;;  %s75_s14 = sshll.u32 %s5166_s9, 4  ;;  %s31_s28 = int_to_ptr.vmem [resolvable:$true] %s30_s28  ;;  %s76_s14 = int_to_ptr.hbm [resolvable:$true] %s75_s14 }
   0x9   :  { %36 = dma.hbm_to_vmem [thread:$0]  %s29_s24, 6144, %s31_s28, [#allocation6], %s3546_s25, %s3546_s25, %s3547_s26  }
   0xa   :  { %s3549_s15 = smov [#allocation10]   ;;  %s3550_s2 = smov [#allocation11]  }
   0xb   :  { %s60_s16 = sshll.u32 %s3549_s15, 4  ;;  %s77_s17 = sshll.u32 %s3550_s2, 4  ;;  %s61_s16 = int_to_ptr.vmem [resolvable:$true] %s60_s16  ;;  %s78_s17 = int_to_ptr.vmem [resolvable:$true] %s77_s17 }
   0xc   :  { %66 = dma.hbm_to_vmem [thread:$0]  %s59_s12, 6144, %s61_s16, [#allocation9], %s3546_s25, %s3546_s25, %s3547_s26  }
   0xd   :  { %s3551_s18 = smov 128   ;;  %s3552_s19 = smov 8  }
   0xe   :  { %83 = dma.hbm_to_vmem [thread:$0]  %s76_s14, 2048, %s78_s17, [#allocation12], %s3551_s18, %s3551_s18, %s3552_s19  }
   0xf   :  { %3537 = dma.done.wait [#allocation6], 6144  }
  0x10   :  { %3538 = vsyncadd [#allocation6], 4294961152 }
  0x11   :  { %3539 = dma.done.wait [#allocation9], 12288  }
  0x12   :  { %3540 = vsyncadd [#allocation9], 4294955008 }
  0x13   :  { %3541 = dma.done.wait [#allocation12], 2048  }
  0x14   :  { %3542 = vsyncadd [#allocation12], 4294965248  ;;  %v3627_v0 = vld [vmem:[#allocation5 + $0x168] sm:$0xff]  ;;  %v3629_v1 = vld [vmem:[#allocation5 + $0x150] sm:$0xff]  ;;  %vm124_vm0 = vcmask 130048   ;;  %v5169_v42 = vmov 0.0  }
  0x15   :  { %356 = vmatpush.msra.mxu3 %v3627_v0  ;;  %v3632_v2 = vld [vmem:[#allocation5 + $0x138] sm:$0xff]  ;;  %v110_v4 = vld [vmem:[%s5158_s1] sm:$0xff]  ;;  %v3649_v7 = vld [vmem:[#allocation5 + $0x108] sm:$0xff]  ;;  %s3554_s12 = smov [#allocation13]   ;;  %s3165_s15 = sshll.u32 %s5168_s11, 4  ;;  %s3166_s15 = int_to_ptr.hbm [resolvable:$true] %s3165_s15 }
  0x16   :  { %v113_v3 = vld [vmem:[%s5158_s1 + $0x18] sm:$0xff]  ;;  %v3644_v5 = vld [vmem:[%s5157_s0] sm:$0xff]  ;;  %v3656_v9 = vld [vmem:[#allocation5 + $0xf0] sm:$0xff]  ;;  %s3163_s5 = sshll.u32 %s3554_s12, 4  ;;  %s3164_s5 = int_to_ptr.vmem [resolvable:$true] %s3163_s5 }
  0x17   :  { %357 = vmatpush.msra.mxu3 %v3629_v1  ;;  %163 = vmatpush.msra.mxu0 %v113_v3  ;;  %v3646_v6 = vld [vmem:[#allocation5 + $0x120] sm:$0xff]  ;;  %v3654_v8 = vld [vmem:[#allocation5 + $0x178] sm:$0xff]  ;;  %v3662_v11 = vld [vmem:[#allocation5 + $0x148] sm:$0xff] }
  0x18   :  { %3240 = vmatpush.msra.mxu1 %v113_v3  ;;  %v3659_v10 = vld [vmem:[#allocation5 + $0x160] sm:$0xff]  ;;  %v3664_v12 = vld [vmem:[#allocation5 + $0xd8] sm:$0xff]  ;;  %v3671_v13 = vld [vmem:[%s5157_s0 + $0x8] sm:$0xff] }
  0x19   :  { %358 = vmatpush.msra.mxu3 %v3632_v2  ;;  %164 = vmatpush.msra.mxu0 %v110_v4  ;;  %v3673_v14 = vld [vmem:[#allocation5 + $0xc0] sm:$0xff]  ;;  %v3676_v15 = vld [vmem:[#allocation5 + $0x130] sm:$0xff]  ;;  %v3679_v16 = vld [vmem:[#allocation5 + $0xa8] sm:$0xff] }
  0x1a   :  { %3184 = vmatmul.msk.f32.vlgmr.msra.gmra.mxu0 %vm124_vm0, %v3644_v5  ;;  %3241 = vmatpush.msra.mxu1 %v110_v4  ;;  %v3683_v17 = vld [vmem:[#allocation5 + $0x118] sm:$0xff]  ;;  %v3687_v18 = vld [vmem:[#allocation5 + $0x90] sm:$0xff]  ;;  %v3689_v19 = vld [vmem:[#allocation5 + $0x100] sm:$0xff] }
  0x1b   :  { %359 = vmatpush.msra.mxu3 %v3646_v6  ;;  %396 = vmatpush.msrb.mxu0 %v3654_v8  ;;  %v3693_v20 = vld [vmem:[#allocation5 + $0x78] sm:$0xff]  ;;  %v3695_v21 = vld [vmem:[#allocation5 + $0xe8] sm:$0xff]  ;;  %v3701_v22 = vld [vmem:[%s5157_s0 + $0x10] sm:$0xff] }
  0x1c   :  { %v3707_v23 = vld [vmem:[%s5157_s0 + $0x30] sm:$0xff]  ;;  %v114_v24 = vld [vmem:[%s5158_s1 + $0x20] sm:$0xff]  ;;  %v3720_v27 = vld [vmem:[#allocation5 + $0x48] sm:$0xff] }
  0x1d   :  { %360 = vmatpush.msra.mxu3 %v3649_v7  ;;  %397 = vmatpush.msrb.mxu0 %v3659_v10  ;;  %v3712_v25 = vld [vmem:[#allocation5 + $0x60] sm:$0xff]  ;;  %v3714_v26 = vld [vmem:[#allocation5 + $0xd0] sm:$0xff]  ;;  %v3724_v28 = vld [vmem:[#allocation5 + $0xb8] sm:$0xff] }
  0x1e   :  { %3190 = vmatmul.msk.f32.vlgmr.msra.gmra.mxu1 %vm124_vm0, %v3707_v23  ;;  %v3728_v29 = vld [vmem:[#allocation5 + $0x30] sm:$0xff]  ;;  %v3730_v30 = vld [vmem:[#allocation5 + $0xa0] sm:$0xff]  ;;  %v3734_v31 = vld [vmem:[#allocation5 + $0x18] sm:$0xff] }
  0x1f   :  { %361 = vmatpush.msra.mxu3 %v3656_v9  ;;  %398 = vmatpush.msrb.mxu0 %v3662_v11  ;;  %v3739_v32 = vld [vmem:[%s5157_s0 + $0x18] sm:$0xff]  ;;  %v3741_v33 = vld [vmem:[#allocation5 + $0x88] sm:$0xff]  ;;  %v3756_v37 = vld [vmem:[#allocation5] sm:$0xff] }
  0x20   :  { %204 = vmatpush.msrb.mxu1 %v114_v24  ;;  %v3748_v34 = vld [vmem:[%s5157_s0 + $0x38] sm:$0xff]  ;;  %v111_v35 = vld [vmem:[%s5158_s1 + $0x8] sm:$0xff]  ;;  %v3758_v38 = vld [vmem:[#allocation5 + $0x70] sm:$0xff] }
  0x21   :  { %362 = vmatpush.msra.mxu3 %v3664_v12  ;;  %399 = vmatpush.msrb.mxu0 %v3676_v15  ;;  %v115_v36 = vld [vmem:[%s5158_s1 + $0x28] sm:$0xff]  ;;  %v112_v39 = vld [vmem:[%s5158_s1 + $0x10] sm:$0xff]  ;;  %v3771_v41 = vld [vmem:[#allocation5 + $0x58] sm:$0xff] }
  0x22   :  { %3185 = vmatmul.msk.f32.gmra.mxu0 %vm124_vm0, %v3671_v13  ;;  %245 = vmatpush.msra.mxu2 %v115_v36  ;;  %v3767_v40 = vld [vmem:[#allocation5 + $0x170] sm:$0xff]  ;;  %v3776_v43 = vld [vmem:[#allocation5 + $0x158] sm:$0xff]  ;;  %v3778_v44 = vld [vmem:[#allocation5 + $0x40] sm:$0xff] }
  0x23   :  { %363 = vmatpush.msra.mxu3 %v3673_v14  ;;  %400 = vmatpush.msrb.mxu0 %v3683_v17  ;;  %v3782_v45 = vld [vmem:[#allocation5 + $0x140] sm:$0xff]  ;;  %v3786_v46 = vld [vmem:[#allocation5 + $0x28] sm:$0xff]  ;;  %v3798_v49 = vld [vmem:[#allocation5 + $0x10] sm:$0xff] }
  0x24   :  { %205 = vmatpush.msrb.mxu1 %v111_v35  ;;  %246 = vmatpush.msra.mxu2 %v112_v39  ;;  %v3793_v47 = vld [vmem:[%s5157_s0 + $0x20] sm:$0xff]  ;;  %v3796_v48 = vld [vmem:[#allocation5 + $0x128] sm:$0xff]  ;;  %v3805_v50 = vld [vmem:[#allocation5 + $0x110] sm:$0xff] }
  0x25   :  { %364 = vmatpush.msra.mxu3 %v3679_v16  ;;  %401 = vmatpush.msrb.mxu0 %v3689_v19  ;;  %v3812_v51 = vld [vmem:[#allocation5 + $0xf8] sm:$0xff]  ;;  %v3818_v52 = vld [vmem:[#allocation5 + $0xe0] sm:$0xff]  ;;  %v3827_v53 = vld [vmem:[%s5157_s0 + $0x28] sm:$0xff] }
  0x26   :  { %3191 = vmatmul.msk.f32.gmra.mxu1 %vm124_vm0, %v3748_v34  ;;  %3200 = vmatmul.msk.f32.vlgmr.msra.gmra.mxu2 %vm124_vm0, %v3644_v5  ;;  %v3830_v54 = vld [vmem:[#allocation5 + $0xc8] sm:$0xff]  ;;  %v3837_v55 = vld [vmem:[#allocation5 + $0xb0] sm:$0xff]  ;;  %v3844_v56 = vld [vmem:[#allocation5 + $0x98] sm:$0xff] }
  0x27   :  { %365 = vmatpush.msra.mxu3 %v3687_v18  ;;  %402 = vmatpush.msrb.mxu0 %v3695_v21  ;;  %v3850_v57 = vld [vmem:[#allocation5 + $0x80] sm:$0xff]  ;;  %v3857_v58 = vld [vmem:[#allocation5 + $0x68] sm:$0xff]  ;;  %v3864_v59 = vld [vmem:[#allocation5 + $0x50] sm:$0xff] }
  0x28   :  { %520 = vmatpush.msra.mxu1 %v3627_v0  ;;  %540 = vmatpush.msrb.mxu2 %v3767_v40  ;;  %v3870_v60 = vld [vmem:[#allocation5 + $0x38] sm:$0xff]  ;;  %v3876_v61 = vld [vmem:[#allocation5 + $0x20] sm:$0xff]  ;;  %v3883_v62 = vld [vmem:[#allocation5 + $0x8] sm:$0xff] }
  0x29   :  { %366 = vmatpush.msra.mxu3 %v3693_v20  ;;  %403 = vmatpush.msrb.mxu0 %v3714_v26 }
  0x2a   :  { %3186 = vmatmul.msk.f32.gmra.mxu0 %vm124_vm0, %v3701_v22  ;;  %521 = vmatpush.msra.mxu1 %v3629_v1 }
  0x2b   :  { %367 = vmatpush.msra.mxu3 %v3712_v25  ;;  %404 = vmatpush.msrb.mxu0 %v3724_v28 }
  0x2c   :  { %522 = vmatpush.msra.mxu1 %v3632_v2  ;;  %541 = vmatpush.msrb.mxu2 %v3776_v43 }
  0x2d   :  { %368 = vmatpush.msra.mxu3 %v3720_v27  ;;  %405 = vmatpush.msrb.mxu0 %v3730_v30 }
  0x2e   :  { %3192 = vmatmul.msk.f32.vlgmr.msrb.gmra.mxu1 %vm124_vm0, %v3644_v5  ;;  %3201 = vmatmul.msk.f32.gmra.mxu2 %vm124_vm0, %v3671_v13 }
  0x2f   :  { %369 = vmatpush.msra.mxu3 %v3728_v29  ;;  %406 = vmatpush.msrb.mxu0 %v3741_v33 }
  0x30   :  { %523 = vmatpush.msra.mxu1 %v3646_v6  ;;  %542 = vmatpush.msrb.mxu2 %v3782_v45 }
  0x31   :  { %370 = vmatpush.msra.mxu3 %v3734_v31  ;;  %407 = vmatpush.msrb.mxu0 %v3758_v38 }
  0x32   :  { %3187 = vmatmul.msk.f32.gmra.mxu0 %vm124_vm0, %v3739_v32  ;;  %524 = vmatpush.msra.mxu1 %v3649_v7 }
  0x33   :  { %371 = vmatpush.msra.mxu3 %v3756_v37  ;;  %408 = vmatpush.msrb.mxu0 %v3771_v41 }
  0x34   :  { %372 = vmatmul.f32.vlgmr.msra.gmra.mxu3 %v5169_v42  ;;  %543 = vmatpush.msrb.mxu2 %v3796_v48 }
  0x35   :  { %376 = vmatpush.msrb.mxu3 %v3767_v40  ;;  %409 = vmatpush.msrb.mxu0 %v3778_v44 }
  0x36   :  { %3193 = vmatmul.msk.f32.gmra.mxu1 %vm124_vm0, %v3671_v13  ;;  %544 = vmatpush.msrb.mxu2 %v3805_v50 }
  0x37   :  { %377 = vmatpush.msrb.mxu3 %v3776_v43  ;;  %410 = vmatpush.msrb.mxu0 %v3786_v46 }
  0x38   :  { %525 = vmatpush.msra.mxu1 %v3656_v9  ;;  %3202 = vmatmul.msk.f32.gmra.mxu2 %vm124_vm0, %v3701_v22 }
  0x39   :  { %378 = vmatpush.msrb.mxu3 %v3782_v45  ;;  %411 = vmatpush.msrb.mxu0 %v3798_v49 }
  0x3a   :  { %3188 = vmatmul.msk.f32.gmra.mxu0 %vm124_vm0, %v3793_v47  ;;  %526 = vmatpush.msra.mxu1 %v3664_v12 }
  0x3b   :  { %379 = vmatpush.msrb.mxu3 %v3796_v48  ;;  %685 = vmatpush.msra.mxu0 %v3627_v0 }
  0x3c   :  { %545 = vmatpush.msrb.mxu2 %v3812_v51  ;;  %527 = vmatpush.msra.mxu1 %v3673_v14 }
  0x3d   :  { %380 = vmatpush.msrb.mxu3 %v3805_v50  ;;  %686 = vmatpush.msra.mxu0 %v3629_v1  ;;  %v116_v1 = vld [vmem:[%s5160_s3] sm:$0x7] }
  0x3e   :  { %3194 = vmatmul.msk.f32.gmra.mxu1 %vm124_vm0, %v3701_v22  ;;  %546 = vmatpush.msrb.mxu2 %v3818_v52 }
  0x3f   :  { %381 = vmatpush.msrb.mxu3 %v3812_v51  ;;  %687 = vmatpush.msra.mxu0 %v3632_v2  ;;  %v3997_v2 = vperm.slane %v116_v1, 0 }
  0x40   :  { %528 = vmatpush.msra.mxu1 %v3679_v16  ;;  %547 = vmatpush.msrb.mxu2 %v3830_v54 }
  0x41   :  { %382 = vmatpush.msrb.mxu3 %v3818_v52  ;;  %688 = vmatpush.msra.mxu0 %v3646_v6 }
  0x42   :  { %3189 = vmatmul.msk.f32.gmra.mxu0 %vm124_vm0, %v3827_v53  ;;  %529 = vmatpush.msra.mxu1 %v3687_v18 }
  0x43   :  { %383 = vmatpush.msrb.mxu3 %v3830_v54  ;;  %689 = vmatpush.msra.mxu0 %v3649_v7 }
  0x44   :  { %3203 = vmatmul.msk.f32.gmra.mxu2 %vm124_vm0, %v3739_v32  ;;  %530 = vmatpush.msra.mxu1 %v3693_v20 }
  0x45   :  { %384 = vmatpush.msrb.mxu3 %v3837_v55  ;;  %690 = vmatpush.msra.mxu0 %v3656_v9 }
  0x46   :  { %548 = vmatpush.msrb.mxu2 %v3837_v55  ;;  %3195 = vmatmul.msk.f32.gmra.mxu1 %vm124_vm0, %v3739_v32 }
  0x47   :  { %385 = vmatpush.msrb.mxu3 %v3844_v56  ;;  %691 = vmatpush.msra.mxu0 %v3664_v12 }
  0x48   :  { %549 = vmatpush.msrb.mxu2 %v3844_v56  ;;  %531 = vmatpush.msra.mxu1 %v3712_v25 }
  0x49   :  { %386 = vmatpush.msrb.mxu3 %v3850_v57  ;;  %692 = vmatpush.msra.mxu0 %v3673_v14 }
  0x4a   :  { %412 = vmatmul.f32.vlgmr.msrb.gmra.mxu0 %v5169_v42  ;;  %550 = vmatpush.msrb.mxu2 %v3850_v57 }
  0x4b   :  { %387 = vmatpush.msrb.mxu3 %v3857_v58  ;;  %693 = vmatpush.msra.mxu0 %v3679_v16 }
  0x4c   :  { %532 = vmatpush.msra.mxu1 %v3720_v27  ;;  %3204 = vmatmul.msk.f32.gmra.mxu2 %vm124_vm0, %v3793_v47 }
  0x4d   :  { %388 = vmatpush.msrb.mxu3 %v3864_v59  ;;  %694 = vmatpush.msra.mxu0 %v3687_v18 }
  0x4e   :  { %551 = vmatpush.msrb.mxu2 %v3857_v58  ;;  %3196 = vmatmul.msk.f32.gmra.mxu1 %vm124_vm0, %v3793_v47 }
  0x4f   :  { %389 = vmatpush.msrb.mxu3 %v3870_v60  ;;  %695 = vmatpush.msra.mxu0 %v3693_v20 }
  0x50   :  { %533 = vmatpush.msra.mxu1 %v3728_v29  ;;  %552 = vmatpush.msrb.mxu2 %v3864_v59 }
  0x51   :  { %390 = vmatpush.msrb.mxu3 %v3876_v61  ;;  %696 = vmatpush.msra.mxu0 %v3712_v25 }
  0x52   :  { %534 = vmatpush.msra.mxu1 %v3734_v31  ;;  %553 = vmatpush.msrb.mxu2 %v3870_v60 }
  0x53   :  { %391 = vmatpush.msrb.mxu3 %v3883_v62  ;;  %697 = vmatpush.msra.mxu0 %v3720_v27 }
  0x54   :  { %392 = vmatmul.f32.vlgmr.msrb.gmra.mxu3 %v5169_v42  ;;  %535 = vmatpush.msra.mxu1 %v3756_v37  ;;  %v4281_v42 = vld [vmem:[#allocation5 + $0x40] sm:$0xff] }
  0x55   :  { %560 = vmatpush.msra.mxu3 %v3654_v8  ;;  %3205 = vmatmul.msk.f32.gmra.mxu2 %vm124_vm0, %v3827_v53 }
  0x56   :  { %705 = vmatpush.msrb.mxu1 %v3767_v40  ;;  %554 = vmatpush.msrb.mxu2 %v3876_v61 }
  0x57   :  { %561 = vmatpush.msra.mxu3 %v3659_v10  ;;  %3197 = vmatmul.msk.f32.gmra.mxu1 %vm124_vm0, %v3827_v53 }
  0x58   :  { %698 = vmatpush.msra.mxu0 %v3728_v29  ;;  %555 = vmatpush.msrb.mxu2 %v3883_v62 }
  0x59   :  { %562 = vmatpush.msra.mxu3 %v3662_v11  ;;  %706 = vmatpush.msrb.mxu1 %v3776_v43 }
  0x5a   :  { %725 = vmatpush.msra.mxu2 %v3654_v8  ;;  %699 = vmatpush.msra.mxu0 %v3734_v31 }
  0x5b   :  { %563 = vmatpush.msra.mxu3 %v3676_v15  ;;  %707 = vmatpush.msrb.mxu1 %v3782_v45 }
  0x5c   :  { %726 = vmatpush.msra.mxu2 %v3659_v10  ;;  %700 = vmatpush.msra.mxu0 %v3756_v37 }
  0x5d   :  { %564 = vmatpush.msra.mxu3 %v3683_v17  ;;  %3206 = vmatmul.msk.f32.gmra.mxu2 %vm124_vm0, %v3707_v23 }
  0x5e   :  { %708 = vmatpush.msrb.mxu1 %v3796_v48  ;;  %727 = vmatpush.msra.mxu2 %v3662_v11 }
  0x5f   :  { %565 = vmatpush.msra.mxu3 %v3689_v19  ;;  %3198 = vmatmul.msk.f32.gmra.mxu1 %vm124_vm0, %v3707_v23 }
  0x60   :  { %870 = vmatpush.msrb.mxu0 %v3767_v40  ;;  %728 = vmatpush.msra.mxu2 %v3676_v15 }
  0x61   :  { %566 = vmatpush.msra.mxu3 %v3695_v21  ;;  %709 = vmatpush.msrb.mxu1 %v3805_v50 }
  0x62   :  { %871 = vmatpush.msrb.mxu0 %v3776_v43  ;;  %729 = vmatpush.msra.mxu2 %v3683_v17 }
  0x63   :  { %567 = vmatpush.msra.mxu3 %v3714_v26  ;;  %710 = vmatpush.msrb.mxu1 %v3812_v51 }
  0x64   :  { %872 = vmatpush.msrb.mxu0 %v3782_v45  ;;  %730 = vmatpush.msra.mxu2 %v3689_v19 }
  0x65   :  { %568 = vmatpush.msra.mxu3 %v3724_v28  ;;  %3207 = vmatmul.msk.f32.gmra.mxu2 %vm124_vm0, %v3748_v34 }
  0x66   :  { %711 = vmatpush.msrb.mxu1 %v3818_v52  ;;  %731 = vmatpush.msra.mxu2 %v3695_v21 }
  0x67   :  { %569 = vmatpush.msra.mxu3 %v3730_v30  ;;  %3199 = vmatmul.msk.f32.gmra.mxu1 %vm124_vm0, %v3748_v34  ;;  %v4018_v34 = vperm.slane %v116_v1, 1 }
  0x68   :  { %873 = vmatpush.msrb.mxu0 %v3796_v48  ;;  %712 = vmatpush.msrb.mxu1 %v3830_v54 }
  0x69   :  { %570 = vmatpush.msra.mxu3 %v3741_v33  ;;  %732 = vmatpush.msra.mxu2 %v3714_v26 }
  0x6a   :  { %874 = vmatpush.msrb.mxu0 %v3805_v50  ;;  %713 = vmatpush.msrb.mxu1 %v3837_v55  ;;  %v4024_v50 = vld [vmem:[%s5161_s4] ss:$0 sm:$0xff] }
  0x6b   :  { %571 = vmatpush.msra.mxu3 %v3758_v38  ;;  %733 = vmatpush.msra.mxu2 %v3724_v28 }
  0x6c   :  { %875 = vmatpush.msrb.mxu0 %v3812_v51  ;;  %714 = vmatpush.msrb.mxu1 %v3844_v56 }
  0x6d   :  { %572 = vmatpush.msra.mxu3 %v3771_v41  ;;  %734 = vmatpush.msra.mxu2 %v3730_v30 }
  0x6e   :  { %876 = vmatpush.msrb.mxu0 %v3818_v52  ;;  %715 = vmatpush.msrb.mxu1 %v3850_v57 }
  0x6f   :  { %573 = vmatpush.msra.mxu3 %v3778_v44  ;;  %735 = vmatpush.msra.mxu2 %v3741_v33 }
  0x70   :  { %877 = vmatpush.msrb.mxu0 %v3830_v54  ;;  %716 = vmatpush.msrb.mxu1 %v3857_v58 }
  0x71   :  { %574 = vmatpush.msra.mxu3 %v3786_v46  ;;  %736 = vmatpush.msra.mxu2 %v3758_v38 }
  0x72   :  { %878 = vmatpush.msrb.mxu0 %v3837_v55  ;;  %717 = vmatpush.msrb.mxu1 %v3864_v59 }
  0x73   :  { %575 = vmatpush.msra.mxu3 %v3798_v49  ;;  %737 = vmatpush.msra.mxu2 %v3771_v41 }
  0x74   :  { %879 = vmatpush.msrb.mxu0 %v3844_v56  ;;  %718 = vmatpush.msrb.mxu1 %v3870_v60  ;;  %v4027_v56 = vperm.slane %v116_v1, 2 }
  0x75   :  { %738 = vmatpush.msra.mxu2 %v3778_v44 }
  0x76   :  { %880 = vmatpush.msrb.mxu0 %v3850_v57  ;;  %719 = vmatpush.msrb.mxu1 %v3876_v61 }
  0x77   :  { %739 = vmatpush.msra.mxu2 %v3786_v46 }
  0x78   :  { %881 = vmatpush.msrb.mxu0 %v3857_v58  ;;  %720 = vmatpush.msrb.mxu1 %v3883_v62 }
  0x79   :  { %740 = vmatpush.msra.mxu2 %v3798_v49 }
  0x7a   :  { %882 = vmatpush.msrb.mxu0 %v3864_v59 }
  0x7c   :  { %883 = vmatpush.msrb.mxu0 %v3870_v60 }
  0x7e   :  { %884 = vmatpush.msrb.mxu0 %v3876_v61 }
  0x80   :  { %885 = vmatpush.msrb.mxu0 %v3883_v62 }
  0x97   :  { %v166_v63 = vpop.f32.mrf.mxu0 }
  0x98   :  { %v167_v14 = vadd.f32 %v166_v63, %v3997_v2 }
  0x9b   :  { %v184_v3 = vpop.f32.mrf.mxu1 }
  0x9c   :  { %v4000_v4 = vadd.f32 %v184_v3, %v3997_v2 }
  0x9e   :  { %5175 = vst [vmem:[#allocation18_spill] sm:$0xff] %v4000_v4 }
  0x9f   :  { %v3992_v0 = vpop.f32.mrf.mxu0 }
  0xa3   :  { %v187_v7 = vpop.f32.mrf.mxu1 }
  0xa4   :  { %v4006_v9 = vadd.f32 %v187_v7, %v3997_v2 }
  0xa6   :  { %5176 = vst [vmem:[#allocation19_spill] sm:$0xff] %v4006_v9 }
  0xa7   :  { %v172_v5 = vpop.f32.mrf.mxu0 }
  0xa8   :  { %v4003_v6 = vadd.f32 %v172_v5, %v3997_v2 }
  0xa9   :  { %v248_v58 = vpop.f32.mrf.mxu2 }
  0xaa   :  { %v249_v61 = vadd.f32 %v248_v58, %v4027_v56 }
  0xab   :  { %v207_v36 = vpop.f32.mrf.mxu1 }
  0xac   :  { %v208_v37 = vadd.f32 %v207_v36, %v4018_v34 }
  0xaf   :  { %v175_v12 = vpop.f32.mrf.mxu0 }
  0xb0   :  { %v4009_v13 = vadd.f32 %v175_v12, %v3997_v2 }
  0xb7   :  { %v373_v16 = vpop.f32.mrf.mxu3  ;;  %v178_v18 = vpop.f32.mrf.mxu0 }
  0xb8   :  { %v416_v20 = vadd.f32 %v373_v16, %v167_v14  ;;  %v4013_v22 = vadd.f32 %v178_v18, %v3997_v2 }
  0xba   :  { %5177 = vst [vmem:[#allocation20_spill] sm:$0xff] %v4013_v22  ;;  %v3208_v23 = vmul.f32 -1.442695, %v416_v20 }
  0xbc   :  { %3255 = vpow2.f32 %v3208_v23 }
  0xbf   :  { %v181_v24 = vpop.f32.mrf.mxu0 }
  0xc0   :  { %v4016_v25 = vadd.f32 %v181_v24, %v3997_v2 }
  0xc2   :  { %5178 = vst [vmem:[#allocation21_spill] sm:$0xff] %v4016_v25  ;;  %v3256_v27 = vpop.eup %3255 }
  0xc3   :  { %v420_v29 = vadd.f32 1.0, %v3256_v27 }
  0xc5   :  { %3257 = vrcp.f32 %v420_v29  ;;  %v432_v47 = vand.u32 2147483648, %v420_v29  ;;  %vm426_vm2 = vweird.f32 %v420_v29  ;;  %v430_v51 = vand.u32 2147483647, %v420_v29 }
  0xc7   :  { %v413_v52 = vpop.f32.mrf.mxu0  ;;  %v433_v54 = vor.u32 1.1754944e-38, %v432_v47  ;;  %vm431_vm4 = vcmp.eq.f32.partialorder %v430_v51, 8.507059e+37 }
  0xc8   :  { %v456_v55 = vadd.f32 %v4024_v50, %v413_v52 }
  0xcb   :  { %v3258_v31 = vpop.eup %3257 }
  0xcc   :  { %v422_v32 = vmul.f32 %v3258_v31, %v420_v29  ;;  %vm427_vm1 = vweird.f32 %v3258_v31 }
  0xcd   :  { %vm428_vm3 = vmor %vm426_vm2, %vm427_vm1 }
  0xce   :  { %v423_v35 = vsub.f32 1.0, %v422_v32 }
  0xd0   :  { %v424_v39 = vmul.f32 %v3258_v31, %v423_v35 }
  0xd2   :  { %v425_v45 = vadd.f32 %v3258_v31, %v424_v39 }
  0xd4   :  { %v429_v53 = vsel %vm428_vm3, %v3258_v31, %v425_v45 }
  0xd5   :  { %v434_v57 = vsel %vm431_vm4, %v433_v54, %v429_v53 }
  0xd6   :  { %v457_v60 = vmul.f32 %v456_v55, %v434_v57 }
  0xd7   :  { %v393_v40 = vpop.f32.mrf.mxu3 }
  0xd8   :  { %v436_v43 = vadd.f32 %v393_v40, %v208_v37  ;;  %v458_v63 = vadd.f32 %v457_v60, %v249_v61 }
  0xda   :  { %v3209_v48 = vmul.f32 -1.442695, %v436_v43 }
  0xdc   :  { %3259 = vpow2.f32 %v3209_v48 }
  0xe2   :  { %v3260_v59 = vpop.eup %3259 }
  0xe3   :  { %v440_v62 = vadd.f32 1.0, %v3260_v59 }
  0xe5   :  { %3261 = vrcp.f32 %v440_v62  ;;  %v452_v12 = vand.u32 2147483648, %v440_v62  ;;  %v450_v16 = vand.u32 2147483647, %v440_v62  ;;  %vm446_vm6 = vweird.f32 %v440_v62 }
  0xe6   :  { %3263 = vtanh.f32 %v458_v63 }
  0xe7   :  { %v453_v20 = vor.u32 1.1754944e-38, %v452_v12  ;;  %vm451_vm8 = vcmp.eq.f32.partialorder %v450_v16, 8.507059e+37 }
  0xeb   :  { %v3262_v3 = vpop.eup %3261 }
  0xec   :  { %v442_v5 = vmul.f32 %v3262_v3, %v440_v62  ;;  %vm447_vm5 = vweird.f32 %v3262_v3  ;;  %v3264_v18 = vpop.eup %3263 }
  0xed   :  { %vm448_vm7 = vmor %vm446_vm6, %vm447_vm5  ;;  %v460_v23 = vsub.f32 0.0, %v3264_v18 }
  0xee   :  { %v443_v7 = vsub.f32 1.0, %v442_v5 }
  0xf0   :  { %v444_v14 = vmul.f32 %v3262_v3, %v443_v7 }
  0xf2   :  { %v445_v1 = vadd.f32 %v3262_v3, %v444_v14 }
  0xf4   :  { %v449_v24 = vsel %vm448_vm7, %v3262_v3, %v445_v1 }
  0xf5   :  { %v454_v27 = vsel %vm451_vm8, %v453_v20, %v449_v24 }
  0xf6   :  { %v461_v29 = vmul.f32 %v460_v23, %v454_v27 }
  0xf8   :  { %v4030_v31 = vadd.f32 %v3264_v18, %v461_v29 }
  0xfa   :  { %5179 = vst [vmem:[#allocation22_spill] sm:$0xff] %v4030_v31  ;;  %536 = vmatmul.f32.vlgmr.msra.gmra.mxu1 %v4030_v31  ;;  %556 = vmatmul.f32.vlgmr.msrb.gmra.mxu2 %v4030_v31 }
  0xfb   :  { %576 = vmatmul.f32.vlgmr.msra.gmra.mxu3 %v4030_v31  ;;  %890 = vmatpush.msra.mxu1 %v3654_v8  ;;  %v210_v8 = vpop.f32.mrf.mxu1 }
  0xfc   :  { %v211_v36 = vadd.f32 %v210_v8, %v4018_v34 }
  0xfd   :  { %891 = vmatpush.msra.mxu1 %v3659_v10  ;;  %v251_v10 = vpop.f32.mrf.mxu2 }
  0xfe   :  { %v252_v5 = vadd.f32 %v251_v10, %v4027_v56  ;;  %v4086_v10 = vld [vmem:[#allocation5 + $0x168] sm:$0xff] }
  0xff   :  { %892 = vmatpush.msra.mxu1 %v3662_v11  ;;  %850 = vmatpush.msrb.mxu3 %v4086_v10 }
 0x100   :  { %1015 = vmatpush.msrb.mxu2 %v4086_v10 }
 0x101   :  { %893 = vmatpush.msra.mxu1 %v3676_v15 }
 0x103   :  { %894 = vmatpush.msra.mxu1 %v3683_v17  ;;  %v4051_v11 = vpop.f32.mrf.mxu1 }
 0x105   :  { %895 = vmatpush.msra.mxu1 %v3689_v19  ;;  %v4053_v15 = vpop.f32.mrf.mxu2 }
 0x107   :  { %896 = vmatpush.msra.mxu1 %v3695_v21 }
 0x109   :  { %897 = vmatpush.msra.mxu1 %v3714_v26 }
 0x10b   :  { %898 = vmatpush.msra.mxu1 %v3724_v28  ;;  %v4055_v17 = vpop.f32.mrf.mxu1 }
 0x10d   :  { %899 = vmatpush.msra.mxu1 %v3730_v30  ;;  %v4057_v19 = vpop.f32.mrf.mxu2 }
 0x10f   :  { %900 = vmatpush.msra.mxu1 %v3741_v33 }
 0x111   :  { %901 = vmatpush.msra.mxu1 %v3758_v38 }
 0x113   :  { %902 = vmatpush.msra.mxu1 %v3771_v41  ;;  %v4059_v21 = vpop.f32.mrf.mxu1 }
 0x114   :  { %5180 = vst [vmem:[#allocation23_spill] sm:$0xff] %v4059_v21 }
 0x115   :  { %903 = vmatpush.msra.mxu1 %v3778_v44  ;;  %v4061_v26 = vpop.f32.mrf.mxu2 }
 0x116   :  { %5181 = vst [vmem:[#allocation24_spill] sm:$0xff] %v4061_v26 }
 0x117   :  { %904 = vmatpush.msra.mxu1 %v3786_v46  ;;  %v170_v46 = vadd.f32 %v3992_v0, %v3997_v2 }
 0x119   :  { %905 = vmatpush.msra.mxu1 %v3798_v49 }
 0x11b   :  { %v4063_v28 = vpop.f32.mrf.mxu1 }
 0x11c   :  { %5182 = vst [vmem:[#allocation25_spill] sm:$0xff] %v4063_v28 }
 0x11d   :  { %v4065_v30 = vpop.f32.mrf.mxu2 }
 0x11e   :  { %5183 = vst [vmem:[#allocation26_spill] sm:$0xff] %v4065_v30 }
 0x123   :  { %v4067_v33 = vpop.f32.mrf.mxu1 }
 0x124   :  { %5184 = vst [vmem:[#allocation27_spill] sm:$0xff] %v4067_v33  ;;  %v4297_v33 = vld [vmem:[#allocation5 + $0x8] sm:$0xff] }
 0x125   :  { %v4069_v38 = vpop.f32.mrf.mxu2 }
 0x126   :  { %5185 = vst [vmem:[#allocation28_spill] sm:$0xff] %v4069_v38  ;;  %v4291_v38 = vld [vmem:[#allocation5 + $0x28] sm:$0xff] }
 0x12b   :  { %v4071_v41 = vpop.f32.mrf.mxu1 }
 0x12c   :  { %5186 = vst [vmem:[#allocation29_spill] sm:$0xff] %v4071_v41  ;;  %v4289_v41 = vld [vmem:[#allocation5 + $0x20] sm:$0xff] }
 0x12d   :  { %v4073_v44 = vpop.f32.mrf.mxu2 }
 0x12e   :  { %5187 = vst [vmem:[#allocation30_spill] sm:$0xff] %v4073_v44 }
 0x177   :  { %v537_v49 = vpop.f32.mrf.mxu1 }
 0x178   :  { %v580_v32 = vadd.f32 %v537_v49, %v170_v46  ;;  %v4090_v49 = vld [vmem:[#allocation5 + $0x150] sm:$0xff] }
 0x179   :  { %851 = vmatpush.msrb.mxu3 %v4090_v49  ;;  %1016 = vmatpush.msrb.mxu2 %v4090_v49 }
 0x17a   :  { %v3210_v35 = vmul.f32 -1.442695, %v580_v32  ;;  %v4095_v32 = vld [vmem:[#allocation5 + $0x138] sm:$0xff] }
 0x17b   :  { %852 = vmatpush.msrb.mxu3 %v4095_v32  ;;  %1017 = vmatpush.msrb.mxu2 %v4095_v32 }
 0x17c   :  { %3265 = vpow2.f32 %v3210_v35  ;;  %v4100_v35 = vld [vmem:[#allocation5 + $0x120] sm:$0xff] }
 0x17d   :  { %v557_v37 = vpop.f32.mrf.mxu2  ;;  %853 = vmatpush.msrb.mxu3 %v4100_v35  ;;  %1018 = vmatpush.msrb.mxu2 %v4100_v35 }
 0x17e   :  { %v600_v39 = vadd.f32 %v557_v37, %v211_v36  ;;  %v577_v57 = vpop.f32.mrf.mxu3  ;;  %v4105_v36 = vld [vmem:[#allocation5 + $0x108] sm:$0xff]  ;;  %v4110_v37 = vld [vmem:[#allocation5 + $0xf0] sm:$0xff] }
 0x17f   :  { %v620_v63 = vadd.f32 %v4024_v50, %v577_v57  ;;  %854 = vmatpush.msrb.mxu3 %v4105_v36  ;;  %1019 = vmatpush.msrb.mxu2 %v4105_v36  ;;  %v4153_v57 = vld [vmem:[#allocation5 + $0x30] sm:$0xff] }
 0x180   :  { %v3211_v40 = vmul.f32 -1.442695, %v600_v39  ;;  %v4115_v39 = vld [vmem:[#allocation5 + $0xd8] sm:$0xff] }
 0x181   :  { %855 = vmatpush.msrb.mxu3 %v4110_v37  ;;  %1020 = vmatpush.msrb.mxu2 %v4110_v37 }
 0x182   :  { %v3266_v43 = vpop.eup %3265  ;;  %3267 = vpow2.f32 %v3211_v40  ;;  %v214_v40 = vadd.f32 %v4051_v11, %v4018_v34 }
 0x183   :  { %v584_v45 = vadd.f32 1.0, %v3266_v43  ;;  %856 = vmatpush.msrb.mxu3 %v4115_v39  ;;  %1021 = vmatpush.msrb.mxu2 %v4115_v39  ;;  %v4122_v43 = vld [vmem:[#allocation5 + $0xc0] sm:$0xff] }
 0x185   :  { %3269 = vrcp.f32 %v584_v45  ;;  %v596_v0 = vand.u32 2147483648, %v584_v45  ;;  %v594_v54 = vand.u32 2147483647, %v584_v45  ;;  %vm590_vm10 = vweird.f32 %v584_v45  ;;  %857 = vmatpush.msrb.mxu3 %v4122_v43  ;;  %1022 = vmatpush.msrb.mxu2 %v4122_v43 }
 0x187   :  { %v597_v60 = vor.u32 1.1754944e-38, %v596_v0  ;;  %vm595_vm12 = vcmp.eq.f32.partialorder %v594_v54, 8.507059e+37  ;;  %v4133_v0 = vld [vmem:[#allocation5 + $0x90] sm:$0xff]  ;;  %v4148_v54 = vld [vmem:[#allocation5 + $0x48] sm:$0xff] }
 0x188   :  { %v3268_v47 = vpop.eup %3267 }
 0x189   :  { %v604_v48 = vadd.f32 1.0, %v3268_v47 }
 0x18b   :  { %v3270_v51 = vpop.eup %3269  ;;  %3271 = vrcp.f32 %v604_v48  ;;  %v616_v18 = vand.u32 2147483648, %v604_v48  ;;  %vm610_vm14 = vweird.f32 %v604_v48  ;;  %v614_v1 = vand.u32 2147483647, %v604_v48 }
 0x18c   :  { %v586_v52 = vmul.f32 %v3270_v51, %v584_v45  ;;  %vm591_vm9 = vweird.f32 %v3270_v51 }
 0x18d   :  { %vm592_vm11 = vmor %vm590_vm10, %vm591_vm9  ;;  %v617_v24 = vor.u32 1.1754944e-38, %v616_v18  ;;  %vm615_vm0 = vcmp.eq.f32.partialorder %v614_v1, 8.507059e+37 }
 0x18e   :  { %v587_v53 = vsub.f32 1.0, %v586_v52  ;;  %v4128_v52 = vld [vmem:[#allocation5 + $0xa8] sm:$0xff] }
 0x18f   :  { %858 = vmatpush.msrb.mxu3 %v4128_v52  ;;  %1023 = vmatpush.msrb.mxu2 %v4128_v52 }
 0x190   :  { %v588_v2 = vmul.f32 %v3270_v51, %v587_v53 }
 0x191   :  { %v3272_v55 = vpop.eup %3271  ;;  %859 = vmatpush.msrb.mxu3 %v4133_v0  ;;  %1024 = vmatpush.msrb.mxu2 %v4133_v0 }
 0x192   :  { %v606_v58 = vmul.f32 %v3272_v55, %v604_v48  ;;  %v589_v59 = vadd.f32 %v3270_v51, %v588_v2  ;;  %vm611_vm13 = vweird.f32 %v3272_v55  ;;  %v4143_v2 = vld [vmem:[#allocation5 + $0x60] sm:$0xff] }
 0x193   :  { %vm612_vm15 = vmor %vm610_vm14, %vm611_vm13 }
 0x194   :  { %v607_v61 = vsub.f32 1.0, %v606_v58  ;;  %v593_v62 = vsel %vm592_vm11, %v3270_v51, %v589_v59 }
 0x195   :  { %v598_v3 = vsel %vm595_vm12, %v597_v60, %v593_v62  ;;  %v4162_v62 = vld [vmem:[#allocation5] sm:$0xff] }
 0x196   :  { %v621_v7 = vmul.f32 %v620_v63, %v598_v3  ;;  %v608_v12 = vmul.f32 %v3272_v55, %v607_v61  ;;  %v4158_v61 = vld [vmem:[#allocation5 + $0x18] sm:$0xff] }
 0x198   :  { %v622_v14 = vadd.f32 %v621_v7, %v252_v5  ;;  %v609_v16 = vadd.f32 %v3272_v55, %v608_v12 }
 0x19a   :  { %3273 = vtanh.f32 %v622_v14  ;;  %v613_v20 = vsel %vm612_vm15, %v3272_v55, %v609_v16 }
 0x19b   :  { %v618_v29 = vsel %vm615_vm0, %v617_v24, %v613_v20 }
 0x1a0   :  { %v3274_v23 = vpop.eup %3273 }
 0x1a1   :  { %v624_v27 = vsub.f32 %v4030_v31, %v3274_v23 }
 0x1a3   :  { %v625_v8 = vmul.f32 %v624_v27, %v618_v29 }
 0x1a5   :  { %v4081_v46 = vadd.f32 %v3274_v23, %v625_v8 }
 0x1a7   :  { %5188 = vst [vmem:[#allocation31_spill] sm:$0xff] %v4081_v46  ;;  %701 = vmatmul.f32.vlgmr.msra.gmra.mxu0 %v4081_v46  ;;  %721 = vmatmul.f32.vlgmr.msrb.gmra.mxu1 %v4081_v46 }
 0x1a8   :  { %741 = vmatmul.f32.vlgmr.msra.gmra.mxu2 %v4081_v46  ;;  %1180 = vmatpush.msrb.mxu1 %v4086_v10 }
 0x1aa   :  { %1181 = vmatpush.msrb.mxu1 %v4090_v49 }
 0x1ac   :  { %1182 = vmatpush.msrb.mxu1 %v4095_v32 }
 0x1ae   :  { %1183 = vmatpush.msrb.mxu1 %v4100_v35 }
 0x1b0   :  { %1184 = vmatpush.msrb.mxu1 %v4105_v36 }
 0x1b2   :  { %1185 = vmatpush.msrb.mxu1 %v4110_v37 }
 0x1b4   :  { %1186 = vmatpush.msrb.mxu1 %v4115_v39 }
 0x1b6   :  { %1187 = vmatpush.msrb.mxu1 %v4122_v43 }
 0x1b8   :  { %1188 = vmatpush.msrb.mxu1 %v4128_v52 }
 0x1ba   :  { %1189 = vmatpush.msrb.mxu1 %v4133_v0 }
 0x224   :  { %v702_v45 = vpop.f32.mrf.mxu0  ;;  %v722_v47 = vpop.f32.mrf.mxu1 }
 0x225   :  { %v745_v48 = vadd.f32 %v702_v45, %v4003_v6  ;;  %v765_v51 = vadd.f32 %v722_v47, %v214_v40  ;;  %v4138_v6 = vld [vmem:[#allocation5 + $0x78] sm:$0xff]  ;;  %v255_v40 = vadd.f32 %v4053_v15, %v4027_v56  ;;  %v4178_v15 = vld [vmem:[#allocation5 + $0x170] sm:$0xff] }
 0x226   :  { %860 = vmatpush.msrb.mxu3 %v4138_v6  ;;  %1025 = vmatpush.msrb.mxu2 %v4138_v6 }
 0x227   :  { %v3212_v11 = vmul.f32 -1.442695, %v745_v48  ;;  %v3213_v53 = vmul.f32 -1.442695, %v765_v51  ;;  %1190 = vmatpush.msrb.mxu1 %v4138_v6 }
 0x228   :  { %861 = vmatpush.msrb.mxu3 %v4143_v2  ;;  %1026 = vmatpush.msrb.mxu2 %v4143_v2 }
 0x229   :  { %3275 = vpow2.f32 %v3212_v11  ;;  %1191 = vmatpush.msrb.mxu1 %v4143_v2 }
 0x22a   :  { %3277 = vpow2.f32 %v3213_v53  ;;  %862 = vmatpush.msrb.mxu3 %v4148_v54  ;;  %1027 = vmatpush.msrb.mxu2 %v4148_v54 }
 0x22b   :  { %1192 = vmatpush.msrb.mxu1 %v4148_v54  ;;  %v742_v1 = vpop.f32.mrf.mxu2 }
 0x22c   :  { %863 = vmatpush.msrb.mxu3 %v4153_v57  ;;  %1028 = vmatpush.msrb.mxu2 %v4153_v57  ;;  %v785_v29 = vadd.f32 %v4024_v50, %v742_v1  ;;  %v4200_v1 = vld [vmem:[#allocation5 + $0x128] sm:$0xff] }
 0x22d   :  { %1193 = vmatpush.msrb.mxu1 %v4153_v57 }
 0x22e   :  { %864 = vmatpush.msrb.mxu3 %v4158_v61  ;;  %1029 = vmatpush.msrb.mxu2 %v4158_v61 }
 0x22f   :  { %v3276_v55 = vpop.eup %3275  ;;  %1194 = vmatpush.msrb.mxu1 %v4158_v61 }
 0x230   :  { %v3278_v58 = vpop.eup %3277  ;;  %v749_v59 = vadd.f32 1.0, %v3276_v55  ;;  %865 = vmatpush.msrb.mxu3 %v4162_v62  ;;  %1030 = vmatpush.msrb.mxu2 %v4162_v62 }
 0x231   :  { %v769_v60 = vadd.f32 1.0, %v3278_v58  ;;  %1195 = vmatpush.msrb.mxu1 %v4162_v62 }
 0x232   :  { %3279 = vrcp.f32 %v749_v59  ;;  %v761_v14 = vand.u32 2147483648, %v749_v59  ;;  %v759_v18 = vand.u32 2147483647, %v749_v59  ;;  %vm755_vm2 = vweird.f32 %v749_v59  ;;  %1035 = vmatpush.msra.mxu3 %v4178_v15  ;;  %1200 = vmatpush.msra.mxu2 %v4178_v15 }
 0x233   :  { %3281 = vrcp.f32 %v769_v60  ;;  %v781_v11 = vand.u32 2147483648, %v769_v60  ;;  %vm775_vm6 = vweird.f32 %v769_v60  ;;  %v779_v53 = vand.u32 2147483647, %v769_v60 }
 0x234   :  { %v762_v24 = vor.u32 1.1754944e-38, %v761_v14  ;;  %vm760_vm4 = vcmp.eq.f32.partialorder %v759_v18, 8.507059e+37  ;;  %v4186_v14 = vld [vmem:[#allocation5 + $0x160] sm:$0xff]  ;;  %v4194_v18 = vld [vmem:[#allocation5 + $0x148] sm:$0xff] }
 0x235   :  { %vm780_vm8 = vcmp.eq.f32.partialorder %v779_v53, 8.507059e+37 }
 0x238   :  { %v3280_v63 = vpop.eup %3279 }
 0x239   :  { %v3282_v3 = vpop.eup %3281  ;;  %v751_v5 = vmul.f32 %v3280_v63, %v749_v59  ;;  %vm756_vm1 = vweird.f32 %v3280_v63  ;;  %v782_v59 = vor.u32 1.1754944e-38, %v781_v11  ;;  %v4236_v11 = vld [vmem:[#allocation5 + $0xd0] sm:$0xff] }
 0x23a   :  { %v771_v12 = vmul.f32 %v3282_v3, %v769_v60  ;;  %vm757_vm3 = vmor %vm755_vm2, %vm756_vm1  ;;  %vm776_vm5 = vweird.f32 %v3282_v3  ;;  %v4180_v60 = vld [vmem:[#allocation5 + $0x178] sm:$0xff] }
 0x23b   :  { %v752_v7 = vsub.f32 1.0, %v751_v5  ;;  %vm777_vm7 = vmor %vm775_vm6, %vm776_vm5  ;;  %1055 = vmatpush.msra.mxu0 %v4180_v60 }
 0x23c   :  { %v772_v23 = vsub.f32 1.0, %v771_v12 }
 0x23d   :  { %v753_v16 = vmul.f32 %v3280_v63, %v752_v7  ;;  %1056 = vmatpush.msra.mxu0 %v4186_v14 }
 0x23e   :  { %v773_v47 = vmul.f32 %v3282_v3, %v772_v23  ;;  %v217_v23 = vadd.f32 %v4055_v17, %v4018_v34  ;;  %v4226_v17 = vld [vmem:[#allocation5 + $0xe0] sm:$0xff] }
 0x23f   :  { %v754_v20 = vadd.f32 %v3280_v63, %v753_v16  ;;  %v4192_v16 = vld [vmem:[#allocation5 + $0x140] sm:$0xff]  ;;  %1057 = vmatpush.msra.mxu0 %v4194_v18 }
 0x240   :  { %v774_v51 = vadd.f32 %v3282_v3, %v773_v47  ;;  %v4228_v47 = vld [vmem:[#allocation5 + $0xe8] sm:$0xff] }
 0x241   :  { %v758_v27 = vsel %vm757_vm3, %v3280_v63, %v754_v20  ;;  %v4202_v20 = vld [vmem:[#allocation5 + $0x130] sm:$0xff] }
 0x242   :  { %v763_v8 = vsel %vm760_vm4, %v762_v24, %v758_v27  ;;  %v778_v55 = vsel %vm777_vm7, %v3282_v3, %v774_v51  ;;  %v4184_v3 = vld [vmem:[#allocation5 + $0x158] sm:$0xff]  ;;  %1058 = vmatpush.msra.mxu0 %v4202_v20  ;;  %v4210_v24 = vld [vmem:[#allocation5 + $0x110] sm:$0xff]  ;;  %v4234_v51 = vld [vmem:[#allocation5 + $0xc8] sm:$0xff] }
 0x243   :  { %v786_v45 = vmul.f32 %v785_v29, %v763_v8  ;;  %v783_v5 = vsel %vm780_vm8, %v782_v59, %v778_v55  ;;  %1036 = vmatpush.msra.mxu3 %v4184_v3  ;;  %1201 = vmatpush.msra.mxu2 %v4184_v3  ;;  %v4212_v27 = vld [vmem:[#allocation5 + $0x118] sm:$0xff] }
 0x244   :  { %1059 = vmatpush.msra.mxu0 %v4212_v27  ;;  %v4245_v59 = vld [vmem:[#allocation5 + $0xb8] sm:$0xff] }
 0x245   :  { %v787_v48 = vadd.f32 %v786_v45, %v255_v40  ;;  %1037 = vmatpush.msra.mxu3 %v4192_v16  ;;  %1202 = vmatpush.msra.mxu2 %v4192_v16  ;;  %v4218_v40 = vld [vmem:[#allocation5 + $0xf8] sm:$0xff]  ;;  %v4220_v45 = vld [vmem:[#allocation5 + $0x100] sm:$0xff] }
 0x246   :  { %1060 = vmatpush.msra.mxu0 %v4220_v45 }
 0x247   :  { %3283 = vtanh.f32 %v787_v48  ;;  %1038 = vmatpush.msra.mxu3 %v4200_v1  ;;  %1203 = vmatpush.msra.mxu2 %v4200_v1 }
 0x248   :  { %1061 = vmatpush.msra.mxu0 %v4228_v47 }
 0x249   :  { %1039 = vmatpush.msra.mxu3 %v4210_v24  ;;  %1204 = vmatpush.msra.mxu2 %v4210_v24 }
 0x24a   :  { %1062 = vmatpush.msra.mxu0 %v4236_v11 }
 0x24b   :  { %1040 = vmatpush.msra.mxu3 %v4218_v40  ;;  %1205 = vmatpush.msra.mxu2 %v4218_v40 }
 0x24c   :  { %1063 = vmatpush.msra.mxu0 %v4245_v59 }
 0x24d   :  { %v3284_v58 = vpop.eup %3283  ;;  %1041 = vmatpush.msra.mxu3 %v4226_v17  ;;  %1206 = vmatpush.msra.mxu2 %v4226_v17 }
 0x24e   :  { %v789_v63 = vsub.f32 %v4081_v46, %v3284_v58  ;;  %v4299_v46 = vld [vmem:[#allocation5 + $0x10] sm:$0xff] }
 0x24f   :  { %1042 = vmatpush.msra.mxu3 %v4234_v51  ;;  %1207 = vmatpush.msra.mxu2 %v4234_v51 }
 0x250   :  { %v790_v7 = vmul.f32 %v789_v63, %v783_v5  ;;  %v4251_v5 = vld [vmem:[#allocation5 + $0x98] sm:$0xff] }
 0x252   :  { %v4173_v12 = vadd.f32 %v3284_v58, %v790_v7  ;;  %v4243_v58 = vld [vmem:[#allocation5 + $0xb0] sm:$0xff]  ;;  %v4253_v7 = vld [vmem:[#allocation5 + $0xa0] sm:$0xff] }
 0x253   :  { %1043 = vmatpush.msra.mxu3 %v4243_v58  ;;  %1208 = vmatpush.msra.mxu2 %v4243_v58 }
 0x254   :  { %866 = vmatmul.f32.vlgmr.msrb.gmra.mxu3 %v4173_v12  ;;  %886 = vmatmul.f32.vlgmr.msrb.gmra.mxu0 %v4173_v12 }
 0x255   :  { %906 = vmatmul.f32.vlgmr.msra.gmra.mxu1 %v4173_v12  ;;  %1044 = vmatpush.msra.mxu3 %v4251_v5 }
 0x256   :  { %1365 = vmatpush.msra.mxu1 %v4178_v15  ;;  %1064 = vmatpush.msra.mxu0 %v4253_v7 }
 0x257   :  { %1209 = vmatpush.msra.mxu2 %v4251_v5 }
 0x258   :  { %1366 = vmatpush.msra.mxu1 %v4184_v3 }
 0x25a   :  { %1367 = vmatpush.msra.mxu1 %v4192_v16 }
 0x25c   :  { %1368 = vmatpush.msra.mxu1 %v4200_v1 }
 0x25e   :  { %1369 = vmatpush.msra.mxu1 %v4210_v24 }
 0x260   :  { %1370 = vmatpush.msra.mxu1 %v4218_v40 }
 0x262   :  { %1371 = vmatpush.msra.mxu1 %v4226_v17 }
 0x264   :  { %1372 = vmatpush.msra.mxu1 %v4234_v51 }
 0x266   :  { %1373 = vmatpush.msra.mxu1 %v4243_v58 }
 0x268   :  { %1374 = vmatpush.msra.mxu1 %v4251_v5 }
 0x2d1   :  { %v887_v29 = vpop.f32.mrf.mxu0 }
 0x2d2   :  { %v930_v8 = vadd.f32 %v887_v29, %v217_v23  ;;  %v4255_v23 = vld [vmem:[#allocation5 + $0x80] sm:$0xff]  ;;  %v4263_v29 = vld [vmem:[#allocation5 + $0x68] sm:$0xff] }
 0x2d3   :  { %1045 = vmatpush.msra.mxu3 %v4255_v23  ;;  %1210 = vmatpush.msra.mxu2 %v4255_v23 }
 0x2d4   :  { %v3215_v48 = vmul.f32 -1.442695, %v930_v8  ;;  %v4265_v8 = vld [vmem:[#allocation5 + $0x70] sm:$0xff]  ;;  %1375 = vmatpush.msra.mxu1 %v4255_v23 }
 0x2d5   :  { %1046 = vmatpush.msra.mxu3 %v4263_v29  ;;  %1211 = vmatpush.msra.mxu2 %v4263_v29 }
 0x2d6   :  { %3285 = vpow2.f32 %v3215_v48  ;;  %v4271_v48 = vld [vmem:[#allocation5 + $0x50] sm:$0xff]  ;;  %1376 = vmatpush.msra.mxu1 %v4263_v29 }
 0x2d7   :  { %v867_v53 = vpop.f32.mrf.mxu3  ;;  %1047 = vmatpush.msra.mxu3 %v4271_v48  ;;  %1212 = vmatpush.msra.mxu2 %v4271_v48 }
 0x2d8   :  { %v910_v55 = vadd.f32 %v867_v53, %v4009_v13  ;;  %v4261_v13 = vld [vmem:[#allocation5 + $0x88] sm:$0xff]  ;;  %v4273_v53 = vld [vmem:[#allocation5 + $0x58] sm:$0xff]  ;;  %1377 = vmatpush.msra.mxu1 %v4271_v48 }
 0x2d9   :  { %1065 = vmatpush.msra.mxu0 %v4261_v13 }
 0x2da   :  { %v3214_v63 = vmul.f32 -1.442695, %v910_v55 }
 0x2db   :  { %1066 = vmatpush.msra.mxu0 %v4265_v8 }
 0x2dc   :  { %3287 = vpow2.f32 %v3214_v63  ;;  %v3286_v55 = vpop.eup %3285  ;;  %v4279_v63 = vld [vmem:[#allocation5 + $0x38] sm:$0xff] }
 0x2dd   :  { %1067 = vmatpush.msra.mxu0 %v4273_v53  ;;  %v4287_v9 = vadd.f32 1.0, %v3286_v55  ;;  %1048 = vmatpush.msra.mxu3 %v4279_v63 }
 0x2de   :  { %1213 = vmatpush.msra.mxu2 %v4279_v63  ;;  %1378 = vmatpush.msra.mxu1 %v4279_v63 }
 0x2df   :  { %1068 = vmatpush.msra.mxu0 %v4281_v42  ;;  %1049 = vmatpush.msra.mxu3 %v4289_v41  ;;  %vm940_vm14 = vweird.f32 %v4287_v9 }
 0x2e0   :  { %1214 = vmatpush.msra.mxu2 %v4289_v41  ;;  %1379 = vmatpush.msra.mxu1 %v4289_v41 }
 0x2e1   :  { %1069 = vmatpush.msra.mxu0 %v4291_v38  ;;  %1050 = vmatpush.msra.mxu3 %v4297_v33 }
 0x2e2   :  { %v3288_v44 = vpop.eup %3287  ;;  %1215 = vmatpush.msra.mxu2 %v4297_v33  ;;  %1380 = vmatpush.msra.mxu1 %v4297_v33 }
 0x2e3   :  { %v914_v4 = vadd.f32 1.0, %v3288_v44  ;;  %1070 = vmatpush.msra.mxu0 %v4299_v46  ;;  %1220 = vmatpush.msrb.mxu3 %v4180_v60 }
 0x2e5   :  { %3289 = vrcp.f32 %v914_v4  ;;  %1345 = vmatpush.msrb.mxu0 %v4086_v10  ;;  %1221 = vmatpush.msrb.mxu3 %v4186_v14  ;;  %v926_v25 = vand.u32 2147483648, %v914_v4  ;;  %v924_v26 = vand.u32 2147483647, %v914_v4  ;;  %vm920_vm10 = vweird.f32 %v914_v4 }
 0x2e6   :  { %3291 = vrcp.f32 %v4287_v9 }
 0x2e7   :  { %1346 = vmatpush.msrb.mxu0 %v4090_v49  ;;  %1222 = vmatpush.msrb.mxu3 %v4194_v18  ;;  %v907_v49 = vpop.f32.mrf.mxu1  ;;  %vm925_vm12 = vcmp.eq.f32.partialorder %v924_v26, 8.507059e+37 }
 0x2e8   :  { %v950_v21 = vadd.f32 %v4024_v50, %v907_v49 }
 0x2e9   :  { %1347 = vmatpush.msrb.mxu0 %v4095_v32  ;;  %1223 = vmatpush.msrb.mxu3 %v4202_v20  ;;  %v927_v32 = vor.u32 1.1754944e-38, %v926_v25 }
 0x2eb   :  { %v3290_v44 = vpop.eup %3289  ;;  %1348 = vmatpush.msrb.mxu0 %v4100_v35  ;;  %1224 = vmatpush.msrb.mxu3 %v4212_v27 }
 0x2ec   :  { %v3292_v55 = vpop.eup %3291  ;;  %v916_v31 = vmul.f32 %v3290_v44, %v914_v4  ;;  %vm921_vm9 = vweird.f32 %v3290_v44 }
 0x2ed   :  { %v936_v28 = vmul.f32 %v3292_v55, %v4287_v9  ;;  %1349 = vmatpush.msrb.mxu0 %v4105_v36  ;;  %1225 = vmatpush.msrb.mxu3 %v4220_v45  ;;  %vm922_vm11 = vmor %vm920_vm10, %vm921_vm9  ;;  %v258_v36 = vadd.f32 %v4057_v19, %v4027_v56  ;;  %vm941_vm13 = vweird.f32 %v3292_v55  ;;  %v946_v19 = vand.u32 2147483648, %v4287_v9 }
 0x2ee   :  { %v917_v30 = vsub.f32 1.0, %v916_v31  ;;  %vm942_vm15 = vmor %vm940_vm14, %vm941_vm13 }
 0x2ef   :  { %v937_v31 = vsub.f32 1.0, %v936_v28  ;;  %1350 = vmatpush.msrb.mxu0 %v4110_v37  ;;  %1226 = vmatpush.msrb.mxu3 %v4228_v47 }
 0x2f0   :  { %v918_v10 = vmul.f32 %v3290_v44, %v917_v30 }
 0x2f1   :  { %1351 = vmatpush.msrb.mxu0 %v4115_v39  ;;  %1227 = vmatpush.msrb.mxu3 %v4236_v11  ;;  %v938_v28 = vmul.f32 %v3292_v55, %v937_v31  ;;  %v947_v39 = vor.u32 1.1754944e-38, %v946_v19 }
 0x2f2   :  { %v919_v22 = vadd.f32 %v3290_v44, %v918_v10 }
 0x2f3   :  { %1352 = vmatpush.msrb.mxu0 %v4122_v43  ;;  %1228 = vmatpush.msrb.mxu3 %v4245_v59 }
 0x2f4   :  { %v923_v35 = vsel %vm922_vm11, %v3290_v44, %v919_v22  ;;  %v939_v22 = vadd.f32 %v3292_v55, %v938_v28 }
 0x2f5   :  { %v928_v30 = vsel %vm925_vm12, %v927_v32, %v923_v35  ;;  %1353 = vmatpush.msrb.mxu0 %v4128_v52  ;;  %1229 = vmatpush.msrb.mxu3 %v4253_v7  ;;  %v5191_v35 = vld [vmem:[#allocation24_spill] sm:$0xff] }
 0x2f6   :  { %v951_v4 = vmul.f32 %v950_v21, %v928_v30  ;;  %v944_v21 = vand.u32 2147483647, %v4287_v9  ;;  %v943_v26 = vsel %vm942_vm15, %v3292_v55, %v939_v22  ;;  %v261_v30 = vadd.f32 %v5191_v35, %v4027_v56  ;;  %v5194_v35 = vld [vmem:[#allocation26_spill] sm:$0xff] }
 0x2f7   :  { %1354 = vmatpush.msrb.mxu0 %v4133_v0  ;;  %1230 = vmatpush.msrb.mxu3 %v4261_v13 }
 0x2f8   :  { %v952_v25 = vadd.f32 %v951_v4, %v258_v36  ;;  %vm945_vm0 = vcmp.eq.f32.partialorder %v944_v21, 8.507059e+37 }
 0x2f9   :  { %1355 = vmatpush.msrb.mxu0 %v4138_v6  ;;  %1231 = vmatpush.msrb.mxu3 %v4265_v8  ;;  %v948_v52 = vsel %vm945_vm0, %v947_v39, %v943_v26  ;;  %v5189_v6 = vld [vmem:[#allocation23_spill] sm:$0xff] }
 0x2fa   :  { %3293 = vtanh.f32 %v952_v25 }
 0x2fb   :  { %1356 = vmatpush.msrb.mxu0 %v4143_v2  ;;  %1232 = vmatpush.msrb.mxu3 %v4273_v53  ;;  %v220_v2 = vadd.f32 %v5189_v6, %v4018_v34  ;;  %v1649_v6 = vld [vmem:[#allocation8 + $0xa8] sm:$0xff] }
 0x2fd   :  { %1357 = vmatpush.msrb.mxu0 %v4148_v54  ;;  %1233 = vmatpush.msrb.mxu3 %v4281_v42 }
 0x2ff   :  { %1358 = vmatpush.msrb.mxu0 %v4153_v57  ;;  %1234 = vmatpush.msrb.mxu3 %v4291_v38 }
 0x300   :  { %v3294_v37 = vpop.eup %3293 }
 0x301   :  { %v954_v43 = vsub.f32 %v4173_v12, %v3294_v37  ;;  %1359 = vmatpush.msrb.mxu0 %v4158_v61  ;;  %1235 = vmatpush.msrb.mxu3 %v4299_v46  ;;  %v5190_v61 = vld [vmem:[#allocation20_spill] sm:$0xff] }
 0x303   :  { %v955_v9 = vmul.f32 %v954_v43, %v948_v52  ;;  %1360 = vmatpush.msrb.mxu0 %v4162_v62 }
 0x305   :  { %v4349_v0 = vadd.f32 %v3294_v37, %v955_v9 }
 0x307   :  { %1031 = vmatmul.f32.vlgmr.msrb.gmra.mxu2 %v4349_v0  ;;  %1051 = vmatmul.f32.vlgmr.msra.gmra.mxu3 %v4349_v0 }
 0x308   :  { %1071 = vmatmul.f32.vlgmr.msra.gmra.mxu0 %v4349_v0  ;;  %1385 = vmatpush.msrb.mxu2 %v4180_v60 }
 0x309   :  { %1530 = vmatpush.msra.mxu0 %v4178_v15 }
 0x30a   :  { %1386 = vmatpush.msrb.mxu2 %v4186_v14 }
 0x30b   :  { %1531 = vmatpush.msra.mxu0 %v4184_v3 }
 0x30c   :  { %1387 = vmatpush.msrb.mxu2 %v4194_v18 }
 0x30d   :  { %1532 = vmatpush.msra.mxu0 %v4192_v16 }
 0x30e   :  { %1388 = vmatpush.msrb.mxu2 %v4202_v20 }
 0x30f   :  { %1533 = vmatpush.msra.mxu0 %v4200_v1 }
 0x310   :  { %1389 = vmatpush.msrb.mxu2 %v4212_v27 }
 0x311   :  { %1534 = vmatpush.msra.mxu0 %v4210_v24 }
 0x312   :  { %1390 = vmatpush.msrb.mxu2 %v4220_v45 }
 0x313   :  { %1535 = vmatpush.msra.mxu0 %v4218_v40 }
 0x314   :  { %1391 = vmatpush.msrb.mxu2 %v4228_v47 }
 0x315   :  { %1536 = vmatpush.msra.mxu0 %v4226_v17 }
 0x316   :  { %1392 = vmatpush.msrb.mxu2 %v4236_v11 }
 0x317   :  { %1537 = vmatpush.msra.mxu0 %v4234_v51 }
 0x318   :  { %1393 = vmatpush.msrb.mxu2 %v4245_v59 }
 0x319   :  { %1538 = vmatpush.msra.mxu0 %v4243_v58 }
 0x31a   :  { %1394 = vmatpush.msrb.mxu2 %v4253_v7 }
 0x31b   :  { %1539 = vmatpush.msra.mxu0 %v4251_v5 }
 0x31c   :  { %1395 = vmatpush.msrb.mxu2 %v4261_v13 }
 0x31d   :  { %1540 = vmatpush.msra.mxu0 %v4255_v23 }
 0x31e   :  { %1396 = vmatpush.msrb.mxu2 %v4265_v8 }
 0x31f   :  { %1541 = vmatpush.msra.mxu0 %v4263_v29 }
 0x320   :  { %1397 = vmatpush.msrb.mxu2 %v4273_v53 }
 0x321   :  { %1542 = vmatpush.msra.mxu0 %v4271_v48 }
 0x322   :  { %1398 = vmatpush.msrb.mxu2 %v4281_v42 }
 0x323   :  { %1543 = vmatpush.msra.mxu0 %v4279_v63 }
 0x324   :  { %1399 = vmatpush.msrb.mxu2 %v4291_v38 }
 0x325   :  { %1544 = vmatpush.msra.mxu0 %v4289_v41 }
 0x326   :  { %1400 = vmatpush.msrb.mxu2 %v4299_v46 }
 0x327   :  { %1545 = vmatpush.msra.mxu0 %v4297_v33 }
 0x385   :  { %v1072_v63 = vpop.f32.mrf.mxu0 }
 0x386   :  { %v1115_v49 = vadd.f32 %v4024_v50, %v1072_v63 }
 0x38a   :  { %v1032_v54 = vpop.f32.mrf.mxu2  ;;  %v1052_v57 = vpop.f32.mrf.mxu3 }
 0x38b   :  { %v1075_v62 = vadd.f32 %v1032_v54, %v5190_v61  ;;  %v1095_v15 = vadd.f32 %v1052_v57, %v220_v2  ;;  %v1646_v54 = vld [vmem:[#allocation8 + $0x90] sm:$0xff]  ;;  %v1643_v61 = vld [vmem:[#allocation8 + $0x78] sm:$0xff] }
 0x38d   :  { %v3216_v3 = vmul.f32 -1.442695, %v1075_v62  ;;  %v3217_v16 = vmul.f32 -1.442695, %v1095_v15  ;;  %v1640_v62 = vld [vmem:[#allocation8 + $0x60] sm:$0xff] }
 0x38f   :  { %3295 = vpow2.f32 %v3216_v3  ;;  %v1637_v3 = vld [vmem:[#allocation8 + $0x48] sm:$0xff] }
 0x390   :  { %3297 = vpow2.f32 %v3217_v16  ;;  %v1634_v16 = vld [vmem:[#allocation8 + $0x30] sm:$0xff] }
 0x395   :  { %v3296_v1 = vpop.eup %3295 }
 0x396   :  { %v3298_v24 = vpop.eup %3297  ;;  %v1079_v40 = vadd.f32 1.0, %v3296_v1 }
 0x397   :  { %v1099_v17 = vadd.f32 1.0, %v3298_v24  ;;  %v1631_v24 = vld [vmem:[#allocation8 + $0x18] sm:$0xff] }
 0x398   :  { %3299 = vrcp.f32 %v1079_v40  ;;  %v1091_v5 = vand.u32 2147483648, %v1079_v40  ;;  %v1089_v48 = vand.u32 2147483647, %v1079_v40  ;;  %vm1085_vm2 = vweird.f32 %v1079_v40 }
 0x399   :  { %3301 = vrcp.f32 %v1099_v17  ;;  %v1111_v22 = vand.u32 2147483648, %v1099_v17  ;;  %vm1105_vm6 = vweird.f32 %v1099_v17  ;;  %v1109_v19 = vand.u32 2147483647, %v1099_v17 }
 0x39a   :  { %v1092_v55 = vor.u32 1.1754944e-38, %v1091_v5  ;;  %vm1090_vm4 = vcmp.eq.f32.partialorder %v1089_v48, 8.507059e+37 }
 0x39b   :  { %v1112_v37 = vor.u32 1.1754944e-38, %v1111_v22  ;;  %vm1110_vm8 = vcmp.eq.f32.partialorder %v1109_v19, 8.507059e+37 }
 0x39e   :  { %v3300_v41 = vpop.eup %3299 }
 0x39f   :  { %v3302_v33 = vpop.eup %3301  ;;  %v1081_v51 = vmul.f32 %v3300_v41, %v1079_v40  ;;  %vm1086_vm1 = vweird.f32 %v3300_v41 }
 0x3a0   :  { %v1101_v23 = vmul.f32 %v3302_v33, %v1099_v17  ;;  %vm1087_vm3 = vmor %vm1085_vm2, %vm1086_vm1  ;;  %vm1106_vm5 = vweird.f32 %v3302_v33 }
 0x3a1   :  { %v1082_v58 = vsub.f32 1.0, %v1081_v51  ;;  %vm1107_vm7 = vmor %vm1105_vm6, %vm1106_vm5 }
 0x3a2   :  { %v1102_v10 = vsub.f32 1.0, %v1101_v23 }
 0x3a3   :  { %v1083_v29 = vmul.f32 %v3300_v41, %v1082_v58 }
 0x3a4   :  { %v1103_v4 = vmul.f32 %v3302_v33, %v1102_v10 }
 0x3a5   :  { %v1084_v44 = vadd.f32 %v3300_v41, %v1083_v29 }
 0x3a6   :  { %v1104_v25 = vadd.f32 %v3302_v33, %v1103_v4 }
 0x3a7   :  { %v1088_v31 = vsel %vm1087_vm3, %v3300_v41, %v1084_v44  ;;  %v1628_v41 = vld [vmem:[#allocation8] sm:$0xff] }
 0x3a8   :  { %v1093_v32 = vsel %vm1090_vm4, %v1092_v55, %v1088_v31  ;;  %v1108_v21 = vsel %vm1107_vm7, %v3302_v33, %v1104_v25 }
 0x3a9   :  { %v1116_v36 = vmul.f32 %v1115_v49, %v1093_v32  ;;  %v1113_v39 = vsel %vm1110_vm8, %v1112_v37, %v1108_v21  ;;  %v4423_v49 = vld [vmem:[%s5161_s4] ss:$0 sm:$0xff] }
 0x3ab   :  { %v1117_v28 = vadd.f32 %v1116_v36, %v261_v30  ;;  %v264_v30 = vadd.f32 %v5194_v35, %v4027_v56  ;;  %v4467_v35 = vld [vmem:[#allocation10 + $0xa8] sm:$0xff] }
 0x3ad   :  { %3303 = vtanh.f32 %v1117_v28 }
 0x3b3   :  { %v3304_v26 = vpop.eup %3303 }
 0x3b4   :  { %v1119_v50 = vsub.f32 %v4349_v0, %v3304_v26 }
 0x3b6   :  { %v1120_v43 = vmul.f32 %v1119_v50, %v1113_v39 }
 0x3b8   :  { %v4396_v52 = vadd.f32 %v3304_v26, %v1120_v43 }
 0x3ba   :  { %1196 = vmatmul.f32.vlgmr.msrb.gmra.mxu1 %v4396_v52  ;;  %1216 = vmatmul.f32.vlgmr.msra.gmra.mxu2 %v4396_v52 }
 0x3bb   :  { %1236 = vmatmul.f32.vlgmr.msrb.gmra.mxu3 %v4396_v52  ;;  %1550 = vmatpush.msrb.mxu1 %v4180_v60  ;;  %v1673_v60 = vld [vmem:[#allocation8 + $0x168] sm:$0xff] }
 0x3bc   :  { %1684 = vmatpush.msra.mxu2 %v1673_v60 }
 0x3bd   :  { %1551 = vmatpush.msrb.mxu1 %v4186_v14  ;;  %v1670_v14 = vld [vmem:[#allocation8 + $0x150] sm:$0xff] }
 0x3be   :  { %1685 = vmatpush.msra.mxu2 %v1670_v14  ;;  %v5195_v14 = vld [vmem:[#allocation22_spill] sm:$0xff] }
 0x3bf   :  { %1552 = vmatpush.msrb.mxu1 %v4194_v18  ;;  %v1667_v18 = vld [vmem:[#allocation8 + $0x138] sm:$0xff] }
 0x3c0   :  { %1686 = vmatpush.msra.mxu2 %v1667_v18  ;;  %v5196_v18 = vld [vmem:[#allocation31_spill] sm:$0xff] }
 0x3c1   :  { %1553 = vmatpush.msrb.mxu1 %v4202_v20  ;;  %v1664_v20 = vld [vmem:[#allocation8 + $0x120] sm:$0xff] }
 0x3c2   :  { %1687 = vmatpush.msra.mxu2 %v1664_v20  ;;  %v1507_v20 = vld [vmem:[#allocation5 + $0x168] sm:$0xff] }
 0x3c3   :  { %1554 = vmatpush.msrb.mxu1 %v4212_v27  ;;  %1510 = vmatpush.msra.mxu3 %v1507_v20  ;;  %v4479_v20 = vld [vmem:[#allocation10 + $0x48] sm:$0xff] }
 0x3c5   :  { %1555 = vmatpush.msrb.mxu1 %v4220_v45  ;;  %v5192_v45 = vld [vmem:[#allocation21_spill] sm:$0xff] }
 0x3c7   :  { %1556 = vmatpush.msrb.mxu1 %v4228_v47 }
 0x3c9   :  { %1557 = vmatpush.msrb.mxu1 %v4236_v11  ;;  %v1661_v11 = vld [vmem:[#allocation8 + $0x108] sm:$0xff] }
 0x3ca   :  { %1688 = vmatpush.msra.mxu2 %v1661_v11  ;;  %v1495_v11 = vld [vmem:[#allocation5 + $0x108] sm:$0xff] }
 0x3cb   :  { %1558 = vmatpush.msrb.mxu1 %v4245_v59 }
 0x3cd   :  { %1559 = vmatpush.msrb.mxu1 %v4253_v7  ;;  %v1658_v7 = vld [vmem:[#allocation8 + $0xf0] sm:$0xff] }
 0x3ce   :  { %1689 = vmatpush.msra.mxu2 %v1658_v7  ;;  %v1489_v7 = vld [vmem:[#allocation5 + $0xd8] sm:$0xff] }
 0x3cf   :  { %1560 = vmatpush.msrb.mxu1 %v4261_v13 }
 0x3d1   :  { %1561 = vmatpush.msrb.mxu1 %v4265_v8 }
 0x3d3   :  { %1562 = vmatpush.msrb.mxu1 %v4273_v53  ;;  %v1652_v53 = vld [vmem:[#allocation8 + $0xc0] sm:$0xff] }
 0x3d5   :  { %1563 = vmatpush.msrb.mxu1 %v4281_v42  ;;  %v5193_v42 = vld [vmem:[#allocation25_spill] sm:$0xff] }
 0x3d7   :  { %1564 = vmatpush.msrb.mxu1 %v4291_v38  ;;  %v223_v38 = vadd.f32 %v5193_v42, %v4018_v34  ;;  %v1486_v42 = vld [vmem:[#allocation5 + $0xc0] sm:$0xff] }
 0x3d9   :  { %1565 = vmatpush.msrb.mxu1 %v4299_v46  ;;  %v1655_v46 = vld [vmem:[#allocation8 + $0xd8] sm:$0xff] }
 0x3da   :  { %1690 = vmatpush.msra.mxu2 %v1655_v46  ;;  %v1480_v46 = vld [vmem:[#allocation5 + $0x90] sm:$0xff] }
 0x3dc   :  { %1691 = vmatpush.msra.mxu2 %v1652_v53  ;;  %v4440_v53 = vld [vmem:[#allocation10 + $0x168] sm:$0xff] }
 0x3de   :  { %1692 = vmatpush.msra.mxu2 %v1649_v6  ;;  %v4443_v6 = vld [vmem:[#allocation10 + $0x150] sm:$0xff] }
 0x3e0   :  { %1693 = vmatpush.msra.mxu2 %v1646_v54  ;;  %v4446_v54 = vld [vmem:[#allocation10 + $0x138] sm:$0xff] }
 0x3e2   :  { %1694 = vmatpush.msra.mxu2 %v1643_v61  ;;  %v4449_v61 = vld [vmem:[#allocation10 + $0x120] sm:$0xff] }
 0x3e4   :  { %1695 = vmatpush.msra.mxu2 %v1640_v62  ;;  %v1462_v62 = vld [vmem:[#allocation5] sm:$0xff] }
 0x3e6   :  { %1696 = vmatpush.msra.mxu2 %v1637_v3  ;;  %v1675_v3 = vld [vmem:[#allocation8 + $0x178] sm:$0xff] }
 0x3e8   :  { %1697 = vmatpush.msra.mxu2 %v1634_v16  ;;  %v4452_v16 = vld [vmem:[#allocation10 + $0x108] sm:$0xff] }
 0x3ea   :  { %1698 = vmatpush.msra.mxu2 %v1631_v24  ;;  %v1672_v24 = vld [vmem:[#allocation8 + $0x160] sm:$0xff] }
 0x3ec   :  { %1699 = vmatpush.msra.mxu2 %v1628_v41  ;;  %v1669_v41 = vld [vmem:[#allocation8 + $0x148] sm:$0xff] }
 0x437   :  { %v1197_v27 = vpop.f32.mrf.mxu1 }
 0x438   :  { %v1240_v47 = vadd.f32 %v1197_v27, %v5192_v45  ;;  %v1504_v27 = vld [vmem:[#allocation5 + $0x150] sm:$0xff]  ;;  %v1501_v45 = vld [vmem:[#allocation5 + $0x138] sm:$0xff] }
 0x439   :  { %1511 = vmatpush.msra.mxu3 %v1504_v27 }
 0x43a   :  { %v3218_v59 = vmul.f32 -1.442695, %v1240_v47  ;;  %v1498_v47 = vld [vmem:[#allocation5 + $0x120] sm:$0xff] }
 0x43b   :  { %1512 = vmatpush.msra.mxu3 %v1501_v45  ;;  %v1647_v45 = vld [vmem:[#allocation8 + $0x98] sm:$0xff] }
 0x43c   :  { %3305 = vpow2.f32 %v3218_v59  ;;  %v1492_v59 = vld [vmem:[#allocation5 + $0xf0] sm:$0xff] }
 0x43d   :  { %v1217_v13 = vpop.f32.mrf.mxu2  ;;  %1513 = vmatpush.msra.mxu3 %v1498_v47  ;;  %v1648_v47 = vld [vmem:[#allocation8 + $0xa0] sm:$0xff] }
 0x43e   :  { %v1260_v8 = vadd.f32 %v1217_v13, %v223_v38  ;;  %v1237_v29 = vpop.f32.mrf.mxu3  ;;  %v1483_v38 = vld [vmem:[#allocation5 + $0xa8] sm:$0xff]  ;;  %v1477_v13 = vld [vmem:[#allocation5 + $0x78] sm:$0xff] }
 0x43f   :  { %v1280_v31 = vadd.f32 %v4423_v49, %v1237_v29  ;;  %1514 = vmatpush.msra.mxu3 %v1495_v11  ;;  %v4463_v29 = vld [vmem:[#allocation10 + $0xc0] sm:$0xff]  ;;  %v4482_v11 = vld [vmem:[#allocation10 + $0x30] sm:$0xff] }
 0x440   :  { %v3219_v9 = vmul.f32 -1.442695, %v1260_v8  ;;  %v1474_v8 = vld [vmem:[#allocation5 + $0x60] sm:$0xff] }
 0x441   :  { %1515 = vmatpush.msra.mxu3 %v1492_v59 }
 0x442   :  { %v3306_v2 = vpop.eup %3305  ;;  %3307 = vpow2.f32 %v3219_v9  ;;  %v1471_v9 = vld [vmem:[#allocation5 + $0x48] sm:$0xff] }
 0x443   :  { %v1244_v57 = vadd.f32 1.0, %v3306_v2  ;;  %1516 = vmatpush.msra.mxu3 %v1489_v7  ;;  %v1468_v2 = vld [vmem:[#allocation5 + $0x30] sm:$0xff] }
 0x445   :  { %3309 = vrcp.f32 %v1244_v57  ;;  %v1256_v51 = vand.u32 2147483648, %v1244_v57  ;;  %v1254_v5 = vand.u32 2147483647, %v1244_v57  ;;  %vm1250_vm10 = vweird.f32 %v1244_v57  ;;  %1517 = vmatpush.msra.mxu3 %v1486_v42 }
 0x447   :  { %v1257_v44 = vor.u32 1.1754944e-38, %v1256_v51  ;;  %vm1255_vm12 = vcmp.eq.f32.partialorder %v1254_v5, 8.507059e+37  ;;  %1518 = vmatpush.msra.mxu3 %v1483_v38  ;;  %v5197_v51 = vld [vmem:[#allocation27_spill] sm:$0xff]  ;;  %v1665_v5 = vld [vmem:[#allocation8 + $0x128] sm:$0xff]  ;;  %v1644_v38 = vld [vmem:[#allocation8 + $0x80] sm:$0xff] }
 0x448   :  { %v3308_v15 = vpop.eup %3307 }
 0x449   :  { %v1264_v1 = vadd.f32 1.0, %v3308_v15  ;;  %1519 = vmatpush.msra.mxu3 %v1480_v46  ;;  %v1674_v15 = vld [vmem:[#allocation8 + $0x170] sm:$0xff]  ;;  %v1645_v46 = vld [vmem:[#allocation8 + $0x88] sm:$0xff] }
 0x44b   :  { %v3310_v40 = vpop.eup %3309  ;;  %3311 = vrcp.f32 %v1264_v1  ;;  %v1276_v22 = vand.u32 2147483648, %v1264_v1  ;;  %vm1270_vm14 = vweird.f32 %v1264_v1  ;;  %v1274_v19 = vand.u32 2147483647, %v1264_v1  ;;  %1520 = vmatpush.msra.mxu3 %v1477_v13  ;;  %v4487_v13 = vld [vmem:[#allocation10 + $0x18] sm:$0xff] }
 0x44c   :  { %v1246_v17 = vmul.f32 %v3310_v40, %v1244_v57  ;;  %vm1251_vm9 = vweird.f32 %v3310_v40  ;;  %v1465_v57 = vld [vmem:[#allocation5 + $0x18] sm:$0xff] }
 0x44d   :  { %vm1252_vm11 = vmor %vm1250_vm10, %vm1251_vm9  ;;  %v1277_v37 = vor.u32 1.1754944e-38, %v1276_v22  ;;  %vm1275_vm0 = vcmp.eq.f32.partialorder %v1274_v19, 8.507059e+37  ;;  %1521 = vmatpush.msra.mxu3 %v1474_v8  ;;  %v1656_v22 = vld [vmem:[#allocation8 + $0xe0] sm:$0xff]  ;;  %v1657_v19 = vld [vmem:[#allocation8 + $0xe8] sm:$0xff] }
 0x44e   :  { %v1247_v33 = vsub.f32 1.0, %v1246_v17  ;;  %v1668_v17 = vld [vmem:[#allocation8 + $0x140] sm:$0xff]  ;;  %v1641_v8 = vld [vmem:[#allocation8 + $0x68] sm:$0xff] }
 0x44f   :  { %1522 = vmatpush.msra.mxu3 %v1471_v9  ;;  %v1642_v9 = vld [vmem:[#allocation8 + $0x70] sm:$0xff] }
 0x450   :  { %v1248_v58 = vmul.f32 %v3310_v40, %v1247_v33  ;;  %v4458_v33 = vld [vmem:[#allocation10 + $0xd8] sm:$0xff] }
 0x451   :  { %v3312_v23 = vpop.eup %3311  ;;  %1523 = vmatpush.msra.mxu3 %v1468_v2  ;;  %v4491_v2 = vld [vmem:[#allocation10] sm:$0xff] }
 0x452   :  { %v1266_v48 = vmul.f32 %v3312_v23, %v1264_v1  ;;  %v1249_v63 = vadd.f32 %v3310_v40, %v1248_v58  ;;  %vm1271_vm13 = vweird.f32 %v3312_v23  ;;  %v1671_v1 = vld [vmem:[#allocation8 + $0x158] sm:$0xff]  ;;  %v226_v58 = vadd.f32 %v5197_v51, %v4018_v34  ;;  %v1633_v51 = vld [vmem:[#allocation8 + $0x28] sm:$0xff] }
 0x453   :  { %vm1272_vm15 = vmor %vm1270_vm14, %vm1271_vm13  ;;  %1524 = vmatpush.msra.mxu3 %v1465_v57  ;;  %v1638_v57 = vld [vmem:[#allocation8 + $0x50] sm:$0xff] }
 0x454   :  { %v1267_v55 = vsub.f32 1.0, %v1266_v48  ;;  %v1253_v10 = vsel %vm1252_vm11, %v3310_v40, %v1249_v63  ;;  %v4455_v40 = vld [vmem:[#allocation10 + $0xf0] sm:$0xff] }
 0x455   :  { %v1258_v32 = vsel %vm1255_vm12, %v1257_v44, %v1253_v10  ;;  %1525 = vmatpush.msra.mxu3 %v1462_v62  ;;  %v5198_v44 = vld [vmem:[#allocation18_spill] sm:$0xff]  ;;  %v1639_v62 = vld [vmem:[#allocation8 + $0x58] sm:$0xff] }
 0x456   :  { %v1281_v36 = vmul.f32 %v1280_v31, %v1258_v32  ;;  %v1268_v4 = vmul.f32 %v3312_v23, %v1267_v55  ;;  %v1662_v31 = vld [vmem:[#allocation8 + $0x110] sm:$0xff]  ;;  %v1663_v32 = vld [vmem:[#allocation8 + $0x118] sm:$0xff] }
 0x457   :  { %1725 = vmatpush.msrb.mxu3 %v1674_v15 }
 0x458   :  { %v1282_v28 = vadd.f32 %v1281_v36, %v264_v30  ;;  %v1269_v25 = vadd.f32 %v3312_v23, %v1268_v4  ;;  %v1659_v4 = vld [vmem:[#allocation8 + $0xf8] sm:$0xff] }
 0x459   :  { %1726 = vmatpush.msrb.mxu3 %v1671_v1  ;;  %v1636_v1 = vld [vmem:[#allocation8 + $0x40] sm:$0xff] }
 0x45a   :  { %3313 = vtanh.f32 %v1282_v28  ;;  %v1273_v21 = vsel %vm1272_vm15, %v3312_v23, %v1269_v25  ;;  %v1666_v23 = vld [vmem:[#allocation8 + $0x130] sm:$0xff]  ;;  %v1660_v28 = vld [vmem:[#allocation8 + $0x100] sm:$0xff] }
 0x45b   :  { %v1278_v39 = vsel %vm1275_vm0, %v1277_v37, %v1273_v21  ;;  %1727 = vmatpush.msrb.mxu3 %v1668_v17  ;;  %v4470_v25 = vld [vmem:[#allocation10 + $0x90] sm:$0xff]  ;;  %v4473_v21 = vld [vmem:[#allocation10 + $0x78] sm:$0xff] }
 0x45c   :  { %v1654_v37 = vld [vmem:[#allocation8 + $0xd0] sm:$0xff] }
 0x45d   :  { %1728 = vmatpush.msrb.mxu3 %v1665_v5 }
 0x45f   :  { %1729 = vmatpush.msrb.mxu3 %v1662_v31 }
 0x460   :  { %v3314_v26 = vpop.eup %3313 }
 0x461   :  { %v1284_v50 = vsub.f32 %v4396_v52, %v3314_v26  ;;  %1730 = vmatpush.msrb.mxu3 %v1659_v4 }
 0x463   :  { %v1285_v43 = vmul.f32 %v1284_v50, %v1278_v39  ;;  %1731 = vmatpush.msrb.mxu3 %v1656_v22  ;;  %v4476_v50 = vld [vmem:[#allocation10 + $0x60] sm:$0xff]  ;;  %v1650_v39 = vld [vmem:[#allocation8 + $0xb0] sm:$0xff]  ;;  %v5199_v22 = vld [vmem:[#allocation28_spill] sm:$0xff] }
 0x465   :  { %v4429_v60 = vadd.f32 %v3314_v26, %v1285_v43  ;;  %v1653_v26 = vld [vmem:[#allocation8 + $0xc8] sm:$0xff]  ;;  %v1651_v43 = vld [vmem:[#allocation8 + $0xb8] sm:$0xff] }
 0x466   :  { %1732 = vmatpush.msrb.mxu3 %v1653_v26 }
 0x467   :  { %1361 = vmatmul.f32.vlgmr.msrb.gmra.mxu0 %v4429_v60  ;;  %1381 = vmatmul.f32.vlgmr.msra.gmra.mxu1 %v4429_v60 }
 0x468   :  { %1401 = vmatmul.f32.vlgmr.msrb.gmra.mxu2 %v4429_v60  ;;  %1888 = vmatpush.msra.mxu1 %v4440_v53 }
 0x469   :  { %1766 = vmatpush.msrb.mxu0 %v1675_v3  ;;  %1733 = vmatpush.msrb.mxu3 %v1650_v39  ;;  %v1635_v3 = vld [vmem:[#allocation8 + $0x38] sm:$0xff] }
 0x46a   :  { %1889 = vmatpush.msra.mxu1 %v4443_v6 }
 0x46b   :  { %1767 = vmatpush.msrb.mxu0 %v1672_v24  ;;  %1734 = vmatpush.msrb.mxu3 %v1647_v45 }
 0x46c   :  { %1890 = vmatpush.msra.mxu1 %v4446_v54 }
 0x46d   :  { %1768 = vmatpush.msrb.mxu0 %v1669_v41  ;;  %1735 = vmatpush.msrb.mxu3 %v1644_v38  ;;  %v1632_v41 = vld [vmem:[#allocation8 + $0x20] sm:$0xff] }
 0x46e   :  { %1891 = vmatpush.msra.mxu1 %v4449_v61 }
 0x46f   :  { %1769 = vmatpush.msrb.mxu0 %v1666_v23  ;;  %1736 = vmatpush.msrb.mxu3 %v1641_v8 }
 0x470   :  { %1700 = vmatmul.f32.vlgmr.msra.gmra.mxu2 %v5195_v14  ;;  %1892 = vmatpush.msra.mxu1 %v4452_v16 }
 0x471   :  { %1770 = vmatpush.msrb.mxu0 %v1663_v32  ;;  %1737 = vmatpush.msrb.mxu3 %v1638_v57  ;;  %v4504_v57 = vld [vmem:[#allocation10 + $0x170] sm:$0xff] }
 0x472   :  { %1893 = vmatpush.msra.mxu1 %v4455_v40 }
 0x473   :  { %1771 = vmatpush.msrb.mxu0 %v1660_v28  ;;  %1738 = vmatpush.msrb.mxu3 %v1635_v3  ;;  %v4524_v3 = vld [vmem:[#allocation10 + $0x110] sm:$0xff] }
 0x474   :  { %1894 = vmatpush.msra.mxu1 %v4458_v33 }
 0x475   :  { %1772 = vmatpush.msrb.mxu0 %v1657_v19  ;;  %1739 = vmatpush.msrb.mxu3 %v1632_v41  ;;  %v267_v19 = vadd.f32 %v5199_v22, %v4027_v56  ;;  %v4540_v41 = vld [vmem:[#allocation10 + $0xc8] sm:$0xff] }
 0x476   :  { %1895 = vmatpush.msra.mxu1 %v4463_v29  ;;  %v4609_v22 = vld [vmem:[#allocation10 + $0xe8] sm:$0xff] }
 0x477   :  { %1773 = vmatpush.msrb.mxu0 %v1654_v37 }
 0x478   :  { %1703 = vmatmul.f32.gmra.mxu2 %v5196_v18  ;;  %1896 = vmatpush.msra.mxu1 %v4467_v35 }
 0x479   :  { %1774 = vmatpush.msrb.mxu0 %v1651_v43 }
 0x47a   :  { %1897 = vmatpush.msra.mxu1 %v4470_v25 }
 0x47b   :  { %1775 = vmatpush.msrb.mxu0 %v1648_v47 }
 0x47c   :  { %1898 = vmatpush.msra.mxu1 %v4473_v21 }
 0x47d   :  { %1776 = vmatpush.msrb.mxu0 %v1645_v46 }
 0x47e   :  { %1899 = vmatpush.msra.mxu1 %v4476_v50 }
 0x47f   :  { %1777 = vmatpush.msrb.mxu0 %v1642_v9 }
 0x480   :  { %1706 = vmatmul.f32.gmra.mxu2 %v4173_v12  ;;  %1900 = vmatpush.msra.mxu1 %v4479_v20 }
 0x481   :  { %1778 = vmatpush.msrb.mxu0 %v1639_v62  ;;  %v4514_v62 = vld [vmem:[#allocation10 + $0x140] sm:$0xff] }
 0x482   :  { %1901 = vmatpush.msra.mxu1 %v4482_v11 }
 0x483   :  { %1779 = vmatpush.msrb.mxu0 %v1636_v1  ;;  %v5200_v1 = vmov 0.0  }
 0x484   :  { %1902 = vmatpush.msra.mxu1 %v4487_v13 }
 0x485   :  { %1780 = vmatpush.msrb.mxu0 %v1633_v51  ;;  %v1859_v51 = vld [vmem:[#allocation10 + $0x98] sm:$0xff] }
 0x486   :  { %1903 = vmatpush.msra.mxu1 %v4491_v2 }
 0x488   :  { %1709 = vmatmul.f32.gmra.mxu2 %v4349_v0 }
 0x490   :  { %1712 = vmatmul.f32.gmra.mxu2 %v4396_v52 }
 0x498   :  { %1715 = vmatmul.f32.gmra.mxu2 %v4429_v60 }
 0x4e4   :  { %v1362_v48 = vpop.f32.mrf.mxu0  ;;  %v1382_v63 = vpop.f32.mrf.mxu1 }
 0x4e5   :  { %v1405_v55 = vadd.f32 %v1362_v48, %v5198_v44  ;;  %v1425_v10 = vadd.f32 %v1382_v63, %v226_v58  ;;  %v1629_v48 = vld [vmem:[#allocation8 + $0x8] sm:$0xff]  ;;  %v1630_v63 = vld [vmem:[#allocation8 + $0x10] sm:$0xff] }
 0x4e6   :  { %1740 = vmatpush.msrb.mxu3 %v1629_v48  ;;  %1781 = vmatpush.msrb.mxu0 %v1630_v63  ;;  %v4557_v48 = vld [vmem:[#allocation10 + $0x178] sm:$0xff]  ;;  %v1844_v63 = vld [vmem:[#allocation10 + $0x20] sm:$0xff] }
 0x4e7   :  { %v3220_v30 = vmul.f32 -1.442695, %v1405_v55  ;;  %v3221_v36 = vmul.f32 -1.442695, %v1425_v10  ;;  %1928 = vmatpush.msrb.mxu2 %v4557_v48 }
 0x4e9   :  { %3315 = vpow2.f32 %v3220_v30 }
 0x4ea   :  { %3317 = vpow2.f32 %v3221_v36 }
 0x4eb   :  { %v1402_v10 = vpop.f32.mrf.mxu2 }
 0x4ec   :  { %v1445_v4 = vadd.f32 %v4423_v49, %v1402_v10  ;;  %v4592_v10 = vld [vmem:[#allocation10 + $0x148] sm:$0xff] }
 0x4ef   :  { %v3316_v27 = vpop.eup %3315 }
 0x4f0   :  { %v3318_v59 = vpop.eup %3317  ;;  %v1409_v7 = vadd.f32 1.0, %v3316_v27 }
 0x4f1   :  { %v4484_v42 = vadd.f32 1.0, %v3318_v59 }
 0x4f2   :  { %3319 = vrcp.f32 %v1409_v7  ;;  %v1421_v23 = vand.u32 2147483648, %v1409_v7  ;;  %v1419_v55 = vand.u32 2147483647, %v1409_v7  ;;  %vm1415_vm2 = vweird.f32 %v1409_v7 }
 0x4f3   :  { %3321 = vrcp.f32 %v4484_v42  ;;  %v1441_v27 = vand.u32 2147483648, %v4484_v42  ;;  %vm1435_vm6 = vweird.f32 %v4484_v42  ;;  %v1439_v45 = vand.u32 2147483647, %v4484_v42 }
 0x4f4   :  { %v1422_v30 = vor.u32 1.1754944e-38, %v1421_v23  ;;  %vm1420_vm4 = vcmp.eq.f32.partialorder %v1419_v55, 8.507059e+37  ;;  %v1850_v23 = vld [vmem:[#allocation10 + $0x50] sm:$0xff] }
 0x4f5   :  { %vm1440_vm8 = vcmp.eq.f32.partialorder %v1439_v45, 8.507059e+37 }
 0x4f8   :  { %v3320_v15 = vpop.eup %3319 }
 0x4f9   :  { %v3322_v24 = vpop.eup %3321  ;;  %v1411_v17 = vmul.f32 %v3320_v15, %v1409_v7  ;;  %vm1416_vm1 = vweird.f32 %v3320_v15  ;;  %v1442_v7 = vor.u32 1.1754944e-38, %v1441_v27 }
 0x4fa   :  { %v1431_v5 = vmul.f32 %v3322_v24, %v4484_v42  ;;  %vm1417_vm3 = vmor %vm1415_vm2, %vm1416_vm1  ;;  %vm1436_vm5 = vweird.f32 %v3322_v24  ;;  %v4510_v42 = vld [vmem:[#allocation10 + $0x158] sm:$0xff] }
 0x4fb   :  { %v1412_v58 = vsub.f32 1.0, %v1411_v17  ;;  %vm1437_vm7 = vmor %vm1435_vm6, %vm1436_vm5  ;;  %v4535_v17 = vld [vmem:[#allocation10 + $0xe0] sm:$0xff] }
 0x4fc   :  { %v1432_v32 = vsub.f32 1.0, %v1431_v5  ;;  %v1853_v5 = vld [vmem:[#allocation10 + $0x68] sm:$0xff] }
 0x4fd   :  { %v1413_v44 = vmul.f32 %v3320_v15, %v1412_v58  ;;  %v1856_v58 = vld [vmem:[#allocation10 + $0x80] sm:$0xff] }
 0x4fe   :  { %v1433_v37 = vmul.f32 %v3322_v24, %v1432_v32  ;;  %v4598_v32 = vld [vmem:[#allocation10 + $0x118] sm:$0xff] }
 0x4ff   :  { %v1414_v31 = vadd.f32 %v3320_v15, %v1413_v44  ;;  %v1841_v44 = vld [vmem:[#allocation10 + $0x8] sm:$0xff] }
 0x500   :  { %v1434_v43 = vadd.f32 %v3322_v24, %v1433_v37  ;;  %v4619_v37 = vld [vmem:[#allocation10 + $0xb8] sm:$0xff] }
 0x501   :  { %v1418_v36 = vsel %vm1417_vm3, %v3320_v15, %v1414_v31  ;;  %v4519_v15 = vld [vmem:[#allocation10 + $0x128] sm:$0xff]  ;;  %v4594_v31 = vld [vmem:[#allocation10 + $0x130] sm:$0xff] }
 0x502   :  { %v1423_v28 = vsel %vm1420_vm4, %v1422_v30, %v1418_v36  ;;  %v1438_v47 = vsel %vm1437_vm7, %v3322_v24, %v1434_v43  ;;  %v4531_v24 = vld [vmem:[#allocation10 + $0xf8] sm:$0xff] }
 0x503   :  { %v1446_v26 = vmul.f32 %v1445_v4, %v1423_v28  ;;  %v1443_v46 = vsel %vm1440_vm8, %v1442_v7, %v1438_v47  ;;  %v5202_v4 = vld [vmem:[#allocation19_spill] sm:$0xff]  ;;  %v4630_v47 = vld [vmem:[#allocation10 + $0xa0] sm:$0xff] }
 0x504   :  { %v4640_v7 = vld [vmem:[#allocation10 + $0x70] sm:$0xff] }
 0x505   :  { %v1447_v39 = vadd.f32 %v1446_v26, %v267_v19  ;;  %v4614_v26 = vld [vmem:[#allocation10 + $0xd0] sm:$0xff] }
 0x507   :  { %3323 = vtanh.f32 %v1447_v39 }
 0x50d   :  { %v3324_v59 = vpop.eup %3323 }
 0x50e   :  { %v1449_v38 = vsub.f32 %v4429_v60, %v3324_v59 }
 0x510   :  { %v1450_v8 = vmul.f32 %v1449_v38, %v1443_v46  ;;  %v4645_v38 = vld [vmem:[#allocation10 + $0x58] sm:$0xff] }
 0x512   :  { %v4502_v9 = vadd.f32 %v3324_v59, %v1450_v8  ;;  %v4634_v59 = vld [vmem:[#allocation10 + $0x88] sm:$0xff]  ;;  %v4650_v8 = vld [vmem:[#allocation10 + $0x40] sm:$0xff] }
 0x514   :  { %1526 = vmatmul.f32.vlgmr.msra.gmra.mxu3 %v4502_v9  ;;  %1546 = vmatmul.f32.vlgmr.msra.gmra.mxu0 %v4502_v9 }
 0x515   :  { %1566 = vmatmul.f32.vlgmr.msrb.gmra.mxu1 %v4502_v9  ;;  %1718 = vmatmul.f32.gmra.mxu2 %v4502_v9 }
 0x516   :  { %1908 = vmatpush.msrb.mxu1 %v4504_v57  ;;  %2048 = vmatpush.msra.mxu3 %v4440_v53 }
 0x517   :  { %2068 = vmatpush.msra.mxu0 %v4504_v57 }
 0x518   :  { %1909 = vmatpush.msrb.mxu1 %v4510_v42  ;;  %2049 = vmatpush.msra.mxu3 %v4443_v6 }
 0x519   :  { %2069 = vmatpush.msra.mxu0 %v4510_v42 }
 0x51a   :  { %1910 = vmatpush.msrb.mxu1 %v4514_v62  ;;  %2050 = vmatpush.msra.mxu3 %v4446_v54 }
 0x51b   :  { %2070 = vmatpush.msra.mxu0 %v4514_v62 }
 0x51c   :  { %1911 = vmatpush.msrb.mxu1 %v4519_v15  ;;  %1741 = vmatmul.f32.vlgmr.msrb.gmra.mxu3 %v5195_v14 }
 0x51d   :  { %1782 = vmatmul.f32.vlgmr.msrb.gmra.mxu0 %v5195_v14  ;;  %1904 = vmatmul.f32.vlgmr.msra.gmra.mxu1 %v5200_v1  ;;  %v1862_v14 = vld [vmem:[#allocation10 + $0xb0] sm:$0xff] }
 0x51e   :  { %1912 = vmatpush.msrb.mxu1 %v4524_v3  ;;  %2051 = vmatpush.msra.mxu3 %v4449_v61 }
 0x51f   :  { %2071 = vmatpush.msra.mxu0 %v4519_v15 }
 0x520   :  { %1913 = vmatpush.msrb.mxu1 %v4531_v24  ;;  %2052 = vmatpush.msra.mxu3 %v4452_v16 }
 0x521   :  { %2072 = vmatpush.msra.mxu0 %v4524_v3 }
 0x522   :  { %1914 = vmatpush.msrb.mxu1 %v4535_v17  ;;  %2053 = vmatpush.msra.mxu3 %v4455_v40 }
 0x523   :  { %2073 = vmatpush.msra.mxu0 %v4531_v24 }
 0x524   :  { %1915 = vmatpush.msrb.mxu1 %v4540_v41  ;;  %1744 = vmatmul.f32.gmra.mxu3 %v5196_v18 }
 0x525   :  { %1785 = vmatmul.f32.gmra.mxu0 %v5196_v18  ;;  %2054 = vmatpush.msra.mxu3 %v4458_v33  ;;  %v1847_v18 = vld [vmem:[#allocation10 + $0x38] sm:$0xff] }
 0x526   :  { %1916 = vmatpush.msrb.mxu1 %v1862_v14  ;;  %2074 = vmatpush.msra.mxu0 %v4535_v17 }
 0x527   :  { %2055 = vmatpush.msra.mxu3 %v4463_v29 }
 0x528   :  { %1917 = vmatpush.msrb.mxu1 %v1859_v51  ;;  %2075 = vmatpush.msra.mxu0 %v4540_v41 }
 0x529   :  { %2056 = vmatpush.msra.mxu3 %v4467_v35 }
 0x52a   :  { %1918 = vmatpush.msrb.mxu1 %v1856_v58  ;;  %2076 = vmatpush.msra.mxu0 %v1862_v14 }
 0x52b   :  { %2057 = vmatpush.msra.mxu3 %v4470_v25 }
 0x52c   :  { %1919 = vmatpush.msrb.mxu1 %v1853_v5  ;;  %1747 = vmatmul.f32.gmra.mxu3 %v4173_v12 }
 0x52d   :  { %1788 = vmatmul.f32.gmra.mxu0 %v4173_v12  ;;  %2058 = vmatpush.msra.mxu3 %v4473_v21  ;;  %v4585_v12 = vld [vmem:[#allocation10 + $0x160] sm:$0xff] }
 0x52e   :  { %1920 = vmatpush.msrb.mxu1 %v1850_v23  ;;  %2077 = vmatpush.msra.mxu0 %v1859_v51 }
 0x52f   :  { %2059 = vmatpush.msra.mxu3 %v4476_v50  ;;  %1929 = vmatpush.msrb.mxu2 %v4585_v12 }
 0x530   :  { %1921 = vmatpush.msrb.mxu1 %v1847_v18  ;;  %2078 = vmatpush.msra.mxu0 %v1856_v58 }
 0x531   :  { %2060 = vmatpush.msra.mxu3 %v4479_v20  ;;  %1930 = vmatpush.msrb.mxu2 %v4592_v10 }
 0x532   :  { %1922 = vmatpush.msrb.mxu1 %v1844_v63  ;;  %2079 = vmatpush.msra.mxu0 %v1853_v5 }
 0x533   :  { %2061 = vmatpush.msra.mxu3 %v4482_v11  ;;  %1931 = vmatpush.msrb.mxu2 %v4594_v31 }
 0x534   :  { %1923 = vmatpush.msrb.mxu1 %v1841_v44  ;;  %1750 = vmatmul.f32.gmra.mxu3 %v4349_v0 }
 0x535   :  { %1924 = vmatmul.f32.vlgmr.msrb.gmra.mxu1 %v5200_v1  ;;  %1791 = vmatmul.f32.gmra.mxu0 %v4349_v0  ;;  %v5201_v0 = vld [vmem:[#allocation29_spill] sm:$0xff] }
 0x536   :  { %2088 = vmatpush.msra.mxu1 %v4557_v48  ;;  %2062 = vmatpush.msra.mxu3 %v4487_v13 }
 0x537   :  { %2080 = vmatpush.msra.mxu0 %v1850_v23  ;;  %1932 = vmatpush.msrb.mxu2 %v4598_v32 }
 0x538   :  { %2063 = vmatpush.msra.mxu3 %v4491_v2  ;;  %2089 = vmatpush.msra.mxu1 %v4585_v12 }
 0x539   :  { %2081 = vmatpush.msra.mxu0 %v1847_v18 }
 0x53a   :  { %2228 = vmatpush.msrb.mxu3 %v4504_v57  ;;  %2090 = vmatpush.msra.mxu1 %v4592_v10 }
 0x53b   :  { %2082 = vmatpush.msra.mxu0 %v1844_v63 }
 0x53c   :  { %2229 = vmatpush.msrb.mxu3 %v4510_v42  ;;  %2091 = vmatpush.msra.mxu1 %v4594_v31 }
 0x53d   :  { %1753 = vmatmul.f32.gmra.mxu3 %v4396_v52  ;;  %1794 = vmatmul.f32.gmra.mxu0 %v4396_v52  ;;  %v229_v52 = vadd.f32 %v5201_v0, %v4018_v34  ;;  %v4603_v34 = vld [vmem:[#allocation10 + $0x100] sm:$0xff] }
 0x53e   :  { %2230 = vmatpush.msrb.mxu3 %v4514_v62  ;;  %2083 = vmatpush.msra.mxu0 %v1841_v44 }
 0x53f   :  { %2092 = vmatpush.msra.mxu1 %v4598_v32  ;;  %1933 = vmatpush.msrb.mxu2 %v4603_v34 }
 0x540   :  { %2248 = vmatpush.msrb.mxu0 %v4557_v48  ;;  %2231 = vmatpush.msrb.mxu3 %v4519_v15 }
 0x541   :  { %2093 = vmatpush.msra.mxu1 %v4603_v34  ;;  %1934 = vmatpush.msrb.mxu2 %v4609_v22 }
 0x542   :  { %2232 = vmatpush.msrb.mxu3 %v4524_v3  ;;  %2249 = vmatpush.msrb.mxu0 %v4585_v12 }
 0x543   :  { %2094 = vmatpush.msra.mxu1 %v4609_v22  ;;  %1935 = vmatpush.msrb.mxu2 %v4614_v26 }
 0x544   :  { %2233 = vmatpush.msrb.mxu3 %v4531_v24  ;;  %2250 = vmatpush.msrb.mxu0 %v4592_v10 }
 0x545   :  { %1756 = vmatmul.f32.gmra.mxu3 %v4429_v60  ;;  %1797 = vmatmul.f32.gmra.mxu0 %v4429_v60 }
 0x546   :  { %2234 = vmatpush.msrb.mxu3 %v4535_v17  ;;  %2251 = vmatpush.msrb.mxu0 %v4594_v31  ;;  %v4652_v17 = vld [vmem:[#allocation10 + $0x28] sm:$0xff] }
 0x547   :  { %2095 = vmatpush.msra.mxu1 %v4614_v26  ;;  %1936 = vmatpush.msrb.mxu2 %v4619_v37 }
 0x548   :  { %2235 = vmatpush.msrb.mxu3 %v4540_v41  ;;  %2252 = vmatpush.msrb.mxu0 %v4598_v32 }
 0x549   :  { %2096 = vmatpush.msra.mxu1 %v4619_v37  ;;  %1937 = vmatpush.msrb.mxu2 %v4630_v47 }
 0x54a   :  { %2236 = vmatpush.msrb.mxu3 %v1862_v14  ;;  %2253 = vmatpush.msrb.mxu0 %v4603_v34 }
 0x54b   :  { %2097 = vmatpush.msra.mxu1 %v4630_v47  ;;  %1938 = vmatpush.msrb.mxu2 %v4634_v59 }
 0x54c   :  { %2237 = vmatpush.msrb.mxu3 %v1859_v51  ;;  %2254 = vmatpush.msrb.mxu0 %v4609_v22  ;;  %v4657_v51 = vld [vmem:[#allocation10 + $0x10] sm:$0xff] }
 0x54d   :  { %1759 = vmatmul.f32.gmra.mxu3 %v4502_v9  ;;  %1800 = vmatmul.f32.gmra.mxu0 %v4502_v9 }
 0x54e   :  { %2238 = vmatpush.msrb.mxu3 %v1856_v58  ;;  %2255 = vmatpush.msrb.mxu0 %v4614_v26 }
 0x54f   :  { %2098 = vmatpush.msra.mxu1 %v4634_v59  ;;  %1939 = vmatpush.msrb.mxu2 %v4640_v7 }
 0x550   :  { %2239 = vmatpush.msrb.mxu3 %v1853_v5  ;;  %2256 = vmatpush.msrb.mxu0 %v4619_v37 }
 0x551   :  { %2099 = vmatpush.msra.mxu1 %v4640_v7  ;;  %1940 = vmatpush.msrb.mxu2 %v4645_v38 }
 0x552   :  { %2240 = vmatpush.msrb.mxu3 %v1850_v23  ;;  %2257 = vmatpush.msrb.mxu0 %v4630_v47 }
 0x553   :  { %2100 = vmatpush.msra.mxu1 %v4645_v38  ;;  %1941 = vmatpush.msrb.mxu2 %v4650_v8 }
 0x554   :  { %2241 = vmatpush.msrb.mxu3 %v1847_v18  ;;  %2258 = vmatpush.msrb.mxu0 %v4634_v59 }
 0x555   :  { %2101 = vmatpush.msra.mxu1 %v4650_v8  ;;  %1942 = vmatpush.msrb.mxu2 %v4652_v17 }
 0x556   :  { %2242 = vmatpush.msrb.mxu3 %v1844_v63  ;;  %2259 = vmatpush.msrb.mxu0 %v4640_v7 }
 0x557   :  { %2102 = vmatpush.msra.mxu1 %v4652_v17  ;;  %1943 = vmatpush.msrb.mxu2 %v4657_v51 }
 0x558   :  { %2243 = vmatpush.msrb.mxu3 %v1841_v44  ;;  %2260 = vmatpush.msrb.mxu0 %v4645_v38 }
 0x559   :  { %2103 = vmatpush.msra.mxu1 %v4657_v51  ;;  %2208 = vmatpush.msra.mxu2 %v4440_v53 }
 0x55a   :  { %2261 = vmatpush.msrb.mxu0 %v4650_v8 }
 0x55b   :  { %2209 = vmatpush.msra.mxu2 %v4443_v6 }
 0x55c   :  { %2262 = vmatpush.msrb.mxu0 %v4652_v17 }
 0x55d   :  { %2210 = vmatpush.msra.mxu2 %v4446_v54 }
 0x55e   :  { %2263 = vmatpush.msrb.mxu0 %v4657_v51 }
 0x55f   :  { %2211 = vmatpush.msra.mxu2 %v4449_v61 }
 0x561   :  { %2212 = vmatpush.msra.mxu2 %v4452_v16 }
 0x563   :  { %2213 = vmatpush.msra.mxu2 %v4455_v40 }
 0x565   :  { %2214 = vmatpush.msra.mxu2 %v4458_v33  ;;  %v1701_v33 = vpop.f32.mrf.mxu2 }
 0x567   :  { %2215 = vmatpush.msra.mxu2 %v4463_v29 }
 0x569   :  { %2216 = vmatpush.msra.mxu2 %v4467_v35  ;;  %v1676_v35 = vld [vmem:[%s5164_s7] sm:$0x7] }
 0x56b   :  { %2217 = vmatpush.msra.mxu2 %v4470_v25  ;;  %v4702_v25 = vperm.slane %v1676_v35, 0 }
 0x56d   :  { %2218 = vmatpush.msra.mxu2 %v4473_v21  ;;  %v4697_v29 = vpop.f32.mrf.mxu2 }
 0x56f   :  { %2219 = vmatpush.msra.mxu2 %v4476_v50 }
 0x571   :  { %2220 = vmatpush.msra.mxu2 %v4479_v20  ;;  %v1702_v20 = vadd.f32 %v1701_v33, %v4702_v25 }
 0x573   :  { %2221 = vmatpush.msra.mxu2 %v4482_v11 }
 0x575   :  { %2222 = vmatpush.msra.mxu2 %v4487_v13  ;;  %v4704_v21 = vpop.f32.mrf.mxu2 }
 0x577   :  { %2223 = vmatpush.msra.mxu2 %v4491_v2 }
 0x57d   :  { %v4707_v13 = vpop.f32.mrf.mxu2 }
 0x591   :  { %v1547_v60 = vpop.f32.mrf.mxu0 }
 0x592   :  { %v1590_v55 = vadd.f32 %v1547_v60, %v229_v52  ;;  %v1567_v44 = vpop.f32.mrf.mxu1 }
 0x594   :  { %v3223_v30 = vmul.f32 -1.442695, %v1590_v55  ;;  %v1610_v55 = vadd.f32 %v4423_v49, %v1567_v44 }
 0x596   :  { %3325 = vpow2.f32 %v3223_v30 }
 0x597   :  { %v1527_v36 = vpop.f32.mrf.mxu3 }
 0x598   :  { %v1570_v28 = vadd.f32 %v1527_v36, %v5202_v4  ;;  %v5203_v4 = vld [vmem:[#allocation30_spill] sm:$0xff] }
 0x59a   :  { %v3222_v19 = vmul.f32 -1.442695, %v1570_v28  ;;  %v270_v28 = vadd.f32 %v5203_v4, %v4027_v56  ;;  %v1905_v50 = vpop.f32.mrf.mxu1 }
 0x59b   :  { %v1948_v11 = vadd.f32 %v1905_v50, %v1702_v20 }
 0x59c   :  { %3327 = vpow2.f32 %v3222_v19  ;;  %v3326_v39 = vpop.eup %3325 }
 0x59d   :  { %v4628_v27 = vadd.f32 1.0, %v3326_v39  ;;  %v3224_v2 = vmul.f32 -1.442695, %v1948_v11 }
 0x59f   :  { %v1606_v49 = vand.u32 2147483648, %v4628_v27  ;;  %vm1600_vm14 = vweird.f32 %v4628_v27  ;;  %v1604_v6 = vand.u32 2147483647, %v4628_v27 }
 0x5a1   :  { %v1607_v61 = vor.u32 1.1754944e-38, %v1606_v49  ;;  %vm1605_vm0 = vcmp.eq.f32.partialorder %v1604_v6, 8.507059e+37 }
 0x5a2   :  { %v3328_v43 = vpop.eup %3327 }
 0x5a3   :  { %v1574_v45 = vadd.f32 1.0, %v3328_v43 }
 0x5a5   :  { %3329 = vrcp.f32 %v1574_v45  ;;  %v1586_v23 = vand.u32 2147483648, %v1574_v45  ;;  %v1584_v63 = vand.u32 2147483647, %v1574_v45  ;;  %vm1580_vm10 = vweird.f32 %v1574_v45 }
 0x5a6   :  { %3331 = vrcp.f32 %v4628_v27 }
 0x5a7   :  { %v1587_v60 = vor.u32 1.1754944e-38, %v1586_v23  ;;  %vm1585_vm12 = vcmp.eq.f32.partialorder %v1584_v63, 8.507059e+37 }
 0x5ab   :  { %v3330_v46 = vpop.eup %3329 }
 0x5ac   :  { %v3332_v41 = vpop.eup %3331  ;;  %v1576_v14 = vmul.f32 %v3330_v46, %v1574_v45  ;;  %vm1581_vm9 = vweird.f32 %v3330_v46 }
 0x5ad   :  { %v1596_v5 = vmul.f32 %v3332_v41, %v4628_v27  ;;  %vm1582_vm11 = vmor %vm1580_vm10, %vm1581_vm9  ;;  %vm1601_vm13 = vweird.f32 %v3332_v41 }
 0x5ae   :  { %v1577_v58 = vsub.f32 1.0, %v1576_v14  ;;  %vm1602_vm15 = vmor %vm1600_vm14, %vm1601_vm13 }
 0x5af   :  { %v1597_v52 = vsub.f32 1.0, %v1596_v5 }
 0x5b0   :  { %v1578_v18 = vmul.f32 %v3330_v46, %v1577_v58 }
 0x5b1   :  { %v1598_v19 = vmul.f32 %v3332_v41, %v1597_v52 }
 0x5b2   :  { %v1579_v0 = vadd.f32 %v3330_v46, %v1578_v18 }
 0x5b3   :  { %v1599_v43 = vadd.f32 %v3332_v41, %v1598_v19  ;;  %v1783_v19 = vpop.f32.mrf.mxu0 }
 0x5b4   :  { %v1583_v30 = vsel %vm1582_vm11, %v3330_v46, %v1579_v0 }
 0x5b5   :  { %v1588_v36 = vsel %vm1585_vm12, %v1587_v60, %v1583_v30  ;;  %v1603_v56 = vsel %vm1602_vm15, %v3332_v41, %v1599_v43 }
 0x5b6   :  { %v1611_v53 = vmul.f32 %v1610_v55, %v1588_v36  ;;  %v1608_v40 = vsel %vm1605_vm0, %v1607_v61, %v1603_v56  ;;  %v4723_v36 = vld [vmem:[%s5165_s8] ss:$0 sm:$0xff] }
 0x5b8   :  { %v1612_v39 = vadd.f32 %v1611_v53, %v270_v28  ;;  %v4725_v28 = vperm.slane %v1676_v35, 2 }
 0x5ba   :  { %3333 = vtanh.f32 %v1612_v39 }
 0x5bb   :  { %3335 = vpow2.f32 %v3224_v2 }
 0x5c0   :  { %v3334_v54 = vpop.eup %3333 }
 0x5c1   :  { %v1614_v16 = vsub.f32 %v4502_v9, %v3334_v54  ;;  %v4709_v9 = vperm.slane %v1676_v35, 1 }
 0x5c3   :  { %v1615_v45 = vmul.f32 %v1614_v16, %v1608_v40 }
 0x5c5   :  { %v1616_v46 = vadd.f32 %v3334_v54, %v1615_v45  ;;  %v1784_v54 = vadd.f32 %v1783_v19, %v4725_v28 }
 0x5c7   :  { %1721 = vmatmul.f32.gmra.mxu2 %v1616_v46  ;;  %1762 = vmatmul.f32.gmra.mxu3 %v1616_v46 }
 0x5c8   :  { %1803 = vmatmul.f32.gmra.mxu0 %v1616_v46 }
 0x5cf   :  { %1944 = vmatmul.f32.vlgmr.msrb.gmra.mxu2 %v5200_v1 }
 0x5d0   :  { %2388 = vmatpush.msrb.mxu2 %v4504_v57  ;;  %v1742_v57 = vpop.f32.mrf.mxu3 }
 0x5d2   :  { %2389 = vmatpush.msrb.mxu2 %v4510_v42  ;;  %v1925_v42 = vpop.f32.mrf.mxu1 }
 0x5d4   :  { %2390 = vmatpush.msrb.mxu2 %v4514_v62  ;;  %v1743_v62 = vadd.f32 %v1742_v57, %v4709_v9 }
 0x5d6   :  { %2391 = vmatpush.msrb.mxu2 %v4519_v15  ;;  %v3336_v15 = vpop.eup %3335  ;;  %v1968_v1 = vadd.f32 %v1925_v42, %v1743_v62 }
 0x5d8   :  { %2392 = vmatpush.msrb.mxu2 %v4524_v3  ;;  %v4712_v3 = vpop.f32.mrf.mxu2  ;;  %v3225_v27 = vmul.f32 -1.442695, %v1968_v1  ;;  %v1705_v1 = vadd.f32 %v4697_v29, %v4702_v25 }
 0x5da   :  { %2393 = vmatpush.msrb.mxu2 %v4531_v24  ;;  %v1952_v24 = vadd.f32 1.0, %v3336_v15 }
 0x5dc   :  { %3337 = vrcp.f32 %v1952_v24  ;;  %v1964_v30 = vand.u32 2147483648, %v1952_v24  ;;  %vm1958_vm2 = vweird.f32 %v1952_v24  ;;  %v1962_v4 = vand.u32 2147483647, %v1952_v24 }
 0x5dd   :  { %3339 = vpow2.f32 %v3225_v27 }
 0x5de   :  { %v1965_v49 = vor.u32 1.1754944e-38, %v1964_v30  ;;  %vm1963_vm4 = vcmp.eq.f32.partialorder %v1962_v4, 8.507059e+37 }
 0x5e0   :  { %v4714_v41 = vpop.f32.mrf.mxu2 }
 0x5e2   :  { %v3338_v14 = vpop.eup %3337 }
 0x5e3   :  { %v3340_v58 = vpop.eup %3339  ;;  %v1954_v23 = vmul.f32 %v3338_v14, %v1952_v24  ;;  %vm1959_vm1 = vweird.f32 %v3338_v14 }
 0x5e4   :  { %v1972_v5 = vadd.f32 1.0, %v3340_v58  ;;  %vm1960_vm3 = vmor %vm1958_vm2, %vm1959_vm1 }
 0x5e5   :  { %v1955_v63 = vsub.f32 1.0, %v1954_v23 }
 0x5e6   :  { %3341 = vrcp.f32 %v1972_v5  ;;  %v1984_v46 = vand.u32 2147483648, %v1972_v5  ;;  %vm1978_vm6 = vweird.f32 %v1972_v5  ;;  %v1982_v33 = vand.u32 2147483647, %v1972_v5 }
 0x5e7   :  { %v1956_v44 = vmul.f32 %v3338_v14, %v1955_v63 }
 0x5e8   :  { %v4716_v18 = vpop.f32.mrf.mxu2  ;;  %v1985_v20 = vor.u32 1.1754944e-38, %v1984_v46  ;;  %vm1983_vm8 = vcmp.eq.f32.partialorder %v1982_v33, 8.507059e+37 }
 0x5e9   :  { %v1957_v60 = vadd.f32 %v3338_v14, %v1956_v44 }
 0x5eb   :  { %v1961_v53 = vsel %vm1960_vm3, %v3338_v14, %v1957_v60 }
 0x5ec   :  { %v3342_v52 = vpop.eup %3341  ;;  %v1966_v56 = vsel %vm1963_vm4, %v1965_v49, %v1961_v53 }
 0x5ed   :  { %v1974_v55 = vmul.f32 %v3342_v52, %v1972_v5  ;;  %vm1979_vm5 = vweird.f32 %v3342_v52 }
 0x5ee   :  { %vm1980_vm7 = vmor %vm1978_vm6, %vm1979_vm5 }
 0x5ef   :  { %v1975_v39 = vsub.f32 1.0, %v1974_v55 }
 0x5f1   :  { %v1976_v16 = vmul.f32 %v3342_v52, %v1975_v39 }
 0x5f3   :  { %v1977_v45 = vadd.f32 %v3342_v52, %v1976_v16 }
 0x5f5   :  { %v1981_v35 = vsel %vm1980_vm7, %v3342_v52, %v1977_v45 }
 0x5f6   :  { %v1986_v2 = vsel %vm1983_vm8, %v1985_v20, %v1981_v35 }
 0x64a   :  { %v4718_v0 = vpop.f32.mrf.mxu2 }
 0x64b   :  { %5204 = vst [vmem:[#allocation23_spill] sm:$0xff] %v4718_v0 }
 0x652   :  { %v1945_v43 = vpop.f32.mrf.mxu2 }
 0x653   :  { %v1988_v6 = vadd.f32 %v4723_v36, %v1945_v43 }
 0x655   :  { %v1989_v61 = vmul.f32 %v1988_v6, %v1966_v56 }
 0x657   :  { %v1990_v40 = vadd.f32 %v1989_v61, %v1784_v54 }
 0x659   :  { %3343 = vtanh.f32 %v1990_v40 }
 0x65f   :  { %v3344_v50 = vpop.eup %3343 }
 0x660   :  { %v1992_v11 = vsub.f32 0.0, %v3344_v50 }
 0x662   :  { %v1993_v57 = vmul.f32 %v1992_v11, %v1986_v2 }
 0x664   :  { %v4729_v42 = vadd.f32 %v3344_v50, %v1993_v57 }
 0x666   :  { %2064 = vmatmul.f32.vlgmr.msra.gmra.mxu3 %v4729_v42  ;;  %2084 = vmatmul.f32.vlgmr.msra.gmra.mxu0 %v4729_v42 }
 0x667   :  { %2104 = vmatmul.f32.vlgmr.msra.gmra.mxu1 %v4729_v42  ;;  %2408 = vmatpush.msra.mxu3 %v4557_v48  ;;  %v1786_v48 = vpop.f32.mrf.mxu0 }
 0x668   :  { %v1787_v61 = vadd.f32 %v1786_v48, %v4725_v28  ;;  %v4785_v48 = vld [vmem:[#allocation10 + $0x168] sm:$0xff] }
 0x669   :  { %2409 = vmatpush.msra.mxu3 %v4585_v12  ;;  %v1745_v12 = vpop.f32.mrf.mxu3  ;;  %2368 = vmatpush.msrb.mxu1 %v4785_v48 }
 0x66a   :  { %2528 = vmatpush.msra.mxu0 %v4785_v48 }
 0x66b   :  { %2410 = vmatpush.msra.mxu3 %v4592_v10 }
 0x66d   :  { %2411 = vmatpush.msra.mxu3 %v4594_v31 }
 0x66f   :  { %2412 = vmatpush.msra.mxu3 %v4598_v32  ;;  %v4750_v10 = vpop.f32.mrf.mxu0 }
 0x671   :  { %2413 = vmatpush.msra.mxu3 %v4603_v34  ;;  %v4752_v31 = vpop.f32.mrf.mxu3 }
 0x673   :  { %2414 = vmatpush.msra.mxu3 %v4609_v22 }
 0x675   :  { %2415 = vmatpush.msra.mxu3 %v4614_v26 }
 0x677   :  { %2416 = vmatpush.msra.mxu3 %v4619_v37  ;;  %v4754_v32 = vpop.f32.mrf.mxu0 }
 0x679   :  { %2417 = vmatpush.msra.mxu3 %v4630_v47  ;;  %v4756_v34 = vpop.f32.mrf.mxu3 }
 0x67b   :  { %2418 = vmatpush.msra.mxu3 %v4634_v59 }
 0x67d   :  { %2419 = vmatpush.msra.mxu3 %v4640_v7 }
 0x67f   :  { %2420 = vmatpush.msra.mxu3 %v4645_v38  ;;  %v4758_v22 = vpop.f32.mrf.mxu0 }
 0x681   :  { %2421 = vmatpush.msra.mxu3 %v4650_v8  ;;  %v4760_v26 = vpop.f32.mrf.mxu3 }
 0x683   :  { %2422 = vmatpush.msra.mxu3 %v4652_v17  ;;  %v1746_v17 = vadd.f32 %v1745_v12, %v4709_v9 }
 0x685   :  { %2423 = vmatpush.msra.mxu3 %v4657_v51 }
 0x687   :  { %v4762_v37 = vpop.f32.mrf.mxu0 }
 0x689   :  { %v4764_v47 = vpop.f32.mrf.mxu3 }
 0x68f   :  { %v4766_v59 = vpop.f32.mrf.mxu0 }
 0x690   :  { %5205 = vst [vmem:[#allocation20_spill] sm:$0xff] %v4766_v59 }
 0x691   :  { %v4768_v7 = vpop.f32.mrf.mxu3 }
 0x697   :  { %v4770_v38 = vpop.f32.mrf.mxu0 }
 0x698   :  { %5206 = vst [vmem:[#allocation24_spill] sm:$0xff] %v4770_v38  ;;  %v1790_v38 = vadd.f32 %v4750_v10, %v4725_v28  ;;  %v4910_v10 = vld [vmem:[#allocation10 + $0x178] sm:$0xff] }
 0x699   :  { %v4772_v8 = vpop.f32.mrf.mxu3 }
 0x69a   :  { %5207 = vst [vmem:[#allocation21_spill] sm:$0xff] %v4772_v8 }
 0x6e3   :  { %v2085_v51 = vpop.f32.mrf.mxu0 }
 0x6e4   :  { %v2128_v62 = vadd.f32 %v2085_v51, %v1746_v17  ;;  %v2105_v19 = vpop.f32.mrf.mxu1  ;;  %v4789_v51 = vld [vmem:[#allocation10 + $0x150] sm:$0xff] }
 0x6e5   :  { %v2148_v6 = vadd.f32 %v4723_v36, %v2105_v19  ;;  %2369 = vmatpush.msrb.mxu1 %v4789_v51  ;;  %2529 = vmatpush.msra.mxu0 %v4789_v51  ;;  %v4848_v19 = vld [vmem:[#allocation10 + $0x78] sm:$0xff] }
 0x6e6   :  { %v3227_v15 = vmul.f32 -1.442695, %v2128_v62  ;;  %v4799_v62 = vld [vmem:[#allocation10 + $0x120] sm:$0xff] }
 0x6e8   :  { %3345 = vpow2.f32 %v3227_v15  ;;  %v4804_v15 = vld [vmem:[#allocation10 + $0x108] sm:$0xff] }
 0x6e9   :  { %v2065_v24 = vpop.f32.mrf.mxu3 }
 0x6ea   :  { %v2108_v27 = vadd.f32 %v2065_v24, %v1705_v1  ;;  %v4809_v1 = vld [vmem:[#allocation10 + $0xf0] sm:$0xff]  ;;  %v4811_v24 = vld [vmem:[#allocation10 + $0xd8] sm:$0xff] }
 0x6ec   :  { %v3226_v14 = vmul.f32 -1.442695, %v2108_v27  ;;  %v4813_v27 = vld [vmem:[#allocation10 + $0xe0] sm:$0xff] }
 0x6ed   :  { %2394 = vmatpush.msrb.mxu2 %v4813_v27 }
 0x6ee   :  { %3347 = vpow2.f32 %v3226_v14  ;;  %v3346_v58 = vpop.eup %3345  ;;  %v4818_v14 = vld [vmem:[#allocation10 + $0xc8] sm:$0xff] }
 0x6ef   :  { %v2132_v23 = vadd.f32 1.0, %v3346_v58  ;;  %v1708_v58 = vadd.f32 %v4704_v21, %v4702_v25  ;;  %2395 = vmatpush.msrb.mxu2 %v4818_v14  ;;  %v4832_v21 = vld [vmem:[#allocation10 + $0xa8] sm:$0xff] }
 0x6f1   :  { %v2144_v33 = vand.u32 2147483648, %v2132_v23  ;;  %vm2138_vm14 = vweird.f32 %v2132_v23  ;;  %v2142_v35 = vand.u32 2147483647, %v2132_v23 }
 0x6f3   :  { %v2145_v11 = vor.u32 1.1754944e-38, %v2144_v33  ;;  %vm2143_vm0 = vcmp.eq.f32.partialorder %v2142_v35, 8.507059e+37  ;;  %v4880_v33 = vld [vmem:[#allocation10 + $0x18] sm:$0xff]  ;;  %v4882_v35 = vld [vmem:[#allocation10 + $0x8] sm:$0xff] }
 0x6f4   :  { %v3348_v5 = vpop.eup %3347 }
 0x6f5   :  { %v2112_v63 = vadd.f32 1.0, %v3348_v5  ;;  %v1749_v5 = vadd.f32 %v4752_v31, %v4709_v9 }
 0x6f7   :  { %3349 = vrcp.f32 %v2112_v63  ;;  %v2124_v4 = vand.u32 2147483648, %v2112_v63  ;;  %v2122_v29 = vand.u32 2147483647, %v2112_v63  ;;  %vm2118_vm10 = vweird.f32 %v2112_v63 }
 0x6f8   :  { %3351 = vrcp.f32 %v2132_v23 }
 0x6f9   :  { %v2125_v49 = vor.u32 1.1754944e-38, %v2124_v4  ;;  %vm2123_vm12 = vcmp.eq.f32.partialorder %v2122_v29, 8.507059e+37  ;;  %v4842_v29 = vld [vmem:[#allocation10 + $0x80] sm:$0xff] }
 0x6fd   :  { %v3350_v44 = vpop.eup %3349 }
 0x6fe   :  { %v3352_v52 = vpop.eup %3351  ;;  %v2114_v60 = vmul.f32 %v3350_v44, %v2112_v63  ;;  %vm2119_vm9 = vweird.f32 %v3350_v44  ;;  %v4826_v63 = vld [vmem:[#allocation10 + $0xb0] sm:$0xff] }
 0x6ff   :  { %v2134_v30 = vmul.f32 %v3352_v52, %v2132_v23  ;;  %vm2120_vm11 = vmor %vm2118_vm10, %vm2119_vm9  ;;  %vm2139_vm13 = vweird.f32 %v3352_v52  ;;  %v4824_v23 = vld [vmem:[#allocation10 + $0xc0] sm:$0xff]  ;;  %2396 = vmatpush.msrb.mxu2 %v4826_v63 }
 0x700   :  { %v2115_v55 = vsub.f32 1.0, %v2114_v60  ;;  %vm2140_vm15 = vmor %vm2138_vm14, %vm2139_vm13 }
 0x701   :  { %v2135_v43 = vsub.f32 1.0, %v2134_v30  ;;  %v4834_v30 = vld [vmem:[#allocation10 + $0x98] sm:$0xff] }
 0x702   :  { %v2116_v53 = vmul.f32 %v3350_v44, %v2115_v55  ;;  %2397 = vmatpush.msrb.mxu2 %v4834_v30 }
 0x703   :  { %v2136_v40 = vmul.f32 %v3352_v52, %v2135_v43  ;;  %v4856_v43 = vld [vmem:[#allocation10 + $0x60] sm:$0xff] }
 0x704   :  { %v2117_v39 = vadd.f32 %v3350_v44, %v2116_v53  ;;  %v4840_v53 = vld [vmem:[#allocation10 + $0x90] sm:$0xff]  ;;  %2398 = vmatpush.msrb.mxu2 %v4842_v29 }
 0x705   :  { %v2137_v46 = vadd.f32 %v3352_v52, %v2136_v40 }
 0x706   :  { %v2121_v56 = vsel %vm2120_vm11, %v3350_v44, %v2117_v39  ;;  %v4850_v39 = vld [vmem:[#allocation10 + $0x68] sm:$0xff] }
 0x707   :  { %v2126_v54 = vsel %vm2123_vm12, %v2125_v49, %v2121_v56  ;;  %v2141_v50 = vsel %vm2140_vm15, %v3352_v52, %v2137_v46  ;;  %v4858_v49 = vld [vmem:[#allocation10 + $0x50] sm:$0xff]  ;;  %2399 = vmatpush.msrb.mxu2 %v4850_v39  ;;  %v4866_v56 = vld [vmem:[#allocation10 + $0x38] sm:$0xff] }
 0x708   :  { %v2149_v16 = vmul.f32 %v2148_v6, %v2126_v54  ;;  %v2146_v57 = vsel %vm2143_vm0, %v2145_v11, %v2141_v50  ;;  %v4864_v6 = vld [vmem:[#allocation10 + $0x48] sm:$0xff]  ;;  %v4888_v50 = vld [vmem:[#allocation10] sm:$0xff] }
 0x709   :  { %2400 = vmatpush.msrb.mxu2 %v4858_v49 }
 0x70a   :  { %v2150_v45 = vadd.f32 %v2149_v16, %v1787_v61  ;;  %v4872_v61 = vld [vmem:[#allocation10 + $0x30] sm:$0xff]  ;;  %v4874_v16 = vld [vmem:[#allocation10 + $0x20] sm:$0xff] }
 0x70b   :  { %2401 = vmatpush.msrb.mxu2 %v4866_v56 }
 0x70c   :  { %3353 = vtanh.f32 %v2150_v45 }
 0x70d   :  { %2402 = vmatpush.msrb.mxu2 %v4874_v16 }
 0x70f   :  { %2403 = vmatpush.msrb.mxu2 %v4882_v35 }
 0x712   :  { %v3354_v20 = vpop.eup %3353 }
 0x713   :  { %v2152_v2 = vsub.f32 %v4729_v42, %v3354_v20  ;;  %v4794_v42 = vld [vmem:[#allocation10 + $0x138] sm:$0xff] }
 0x714   :  { %2370 = vmatpush.msrb.mxu1 %v4794_v42  ;;  %2530 = vmatpush.msra.mxu0 %v4794_v42 }
 0x715   :  { %v2153_v12 = vmul.f32 %v2152_v2, %v2146_v57 }
 0x716   :  { %2371 = vmatpush.msrb.mxu1 %v4799_v62  ;;  %2531 = vmatpush.msra.mxu0 %v4799_v62 }
 0x717   :  { %v4780_v17 = vadd.f32 %v3354_v20, %v2153_v12 }
 0x718   :  { %2372 = vmatpush.msrb.mxu1 %v4804_v15  ;;  %2532 = vmatpush.msra.mxu0 %v4804_v15 }
 0x719   :  { %2224 = vmatmul.f32.vlgmr.msra.gmra.mxu2 %v4780_v17  ;;  %2244 = vmatmul.f32.vlgmr.msrb.gmra.mxu3 %v4780_v17 }
 0x71a   :  { %2264 = vmatmul.f32.vlgmr.msrb.gmra.mxu0 %v4780_v17  ;;  %2688 = vmatpush.msrb.mxu3 %v4785_v48 }
 0x71b   :  { %2373 = vmatpush.msrb.mxu1 %v4809_v1  ;;  %2533 = vmatpush.msra.mxu0 %v4809_v1 }
 0x71c   :  { %2689 = vmatpush.msrb.mxu3 %v4789_v51  ;;  %2568 = vmatpush.msra.mxu2 %v4910_v10 }
 0x71d   :  { %2374 = vmatpush.msrb.mxu1 %v4811_v24  ;;  %2534 = vmatpush.msra.mxu0 %v4811_v24 }
 0x71e   :  { %2690 = vmatpush.msrb.mxu3 %v4794_v42 }
 0x71f   :  { %2375 = vmatpush.msrb.mxu1 %v4824_v23  ;;  %2535 = vmatpush.msra.mxu0 %v4824_v23 }
 0x720   :  { %2691 = vmatpush.msrb.mxu3 %v4799_v62 }
 0x721   :  { %2376 = vmatpush.msrb.mxu1 %v4832_v21  ;;  %2536 = vmatpush.msra.mxu0 %v4832_v21 }
 0x722   :  { %2692 = vmatpush.msrb.mxu3 %v4804_v15 }
 0x723   :  { %2377 = vmatpush.msrb.mxu1 %v4840_v53  ;;  %2537 = vmatpush.msra.mxu0 %v4840_v53 }
 0x724   :  { %2693 = vmatpush.msrb.mxu3 %v4809_v1 }
 0x725   :  { %2378 = vmatpush.msrb.mxu1 %v4848_v19  ;;  %2538 = vmatpush.msra.mxu0 %v4848_v19 }
 0x726   :  { %2694 = vmatpush.msrb.mxu3 %v4811_v24 }
 0x727   :  { %2379 = vmatpush.msrb.mxu1 %v4856_v43  ;;  %2539 = vmatpush.msra.mxu0 %v4856_v43 }
 0x728   :  { %2695 = vmatpush.msrb.mxu3 %v4824_v23 }
 0x729   :  { %2380 = vmatpush.msrb.mxu1 %v4864_v6  ;;  %2540 = vmatpush.msra.mxu0 %v4864_v6 }
 0x72a   :  { %2696 = vmatpush.msrb.mxu3 %v4832_v21 }
 0x72b   :  { %2381 = vmatpush.msrb.mxu1 %v4872_v61  ;;  %2541 = vmatpush.msra.mxu0 %v4872_v61 }
 0x72c   :  { %2697 = vmatpush.msrb.mxu3 %v4840_v53 }
 0x72d   :  { %2382 = vmatpush.msrb.mxu1 %v4880_v33  ;;  %2542 = vmatpush.msra.mxu0 %v4880_v33 }
 0x72e   :  { %2698 = vmatpush.msrb.mxu3 %v4848_v19 }
 0x72f   :  { %2383 = vmatpush.msrb.mxu1 %v4888_v50  ;;  %2543 = vmatpush.msra.mxu0 %v4888_v50 }
 0x730   :  { %2699 = vmatpush.msrb.mxu3 %v4856_v43 }
 0x732   :  { %2700 = vmatpush.msrb.mxu3 %v4864_v6 }
 0x734   :  { %2701 = vmatpush.msrb.mxu3 %v4872_v61 }
 0x736   :  { %2702 = vmatpush.msrb.mxu3 %v4880_v33 }
 0x738   :  { %2703 = vmatpush.msrb.mxu3 %v4888_v50 }
 0x79c   :  { %v2225_v44 = vpop.f32.mrf.mxu2  ;;  %v2245_v52 = vpop.f32.mrf.mxu3 }
 0x79d   :  { %v2268_v60 = vadd.f32 %v2225_v44, %v1708_v58  ;;  %v2288_v55 = vadd.f32 %v2245_v52, %v1749_v5  ;;  %v2265_v52 = vpop.f32.mrf.mxu0 }
 0x79f   :  { %v3228_v31 = vmul.f32 -1.442695, %v2268_v60  ;;  %v3229_v4 = vmul.f32 -1.442695, %v2288_v55 }
 0x7a1   :  { %3355 = vpow2.f32 %v3228_v31 }
 0x7a2   :  { %3357 = vpow2.f32 %v3229_v4  ;;  %v2308_v4 = vadd.f32 %v4723_v36, %v2265_v52 }
 0x7a7   :  { %v3356_v54 = vpop.eup %3355 }
 0x7a8   :  { %v3358_v40 = vpop.eup %3357  ;;  %v2272_v45 = vadd.f32 1.0, %v3356_v54 }
 0x7a9   :  { %v2292_v46 = vadd.f32 1.0, %v3358_v40 }
 0x7aa   :  { %3359 = vrcp.f32 %v2272_v45  ;;  %v2284_v12 = vand.u32 2147483648, %v2272_v45  ;;  %v2282_v44 = vand.u32 2147483647, %v2272_v45  ;;  %vm2278_vm2 = vweird.f32 %v2272_v45 }
 0x7ab   :  { %3361 = vrcp.f32 %v2292_v46  ;;  %v2304_v59 = vand.u32 2147483648, %v2292_v46  ;;  %vm2298_vm6 = vweird.f32 %v2292_v46 }
 0x7ac   :  { %v2285_v55 = vor.u32 1.1754944e-38, %v2284_v12  ;;  %vm2283_vm4 = vcmp.eq.f32.partialorder %v2282_v44, 8.507059e+37 }
 0x7b0   :  { %v3360_v20 = vpop.eup %3359 }
 0x7b1   :  { %v3362_v11 = vpop.eup %3361  ;;  %v2274_v2 = vmul.f32 %v3360_v20, %v2272_v45  ;;  %vm2279_vm1 = vweird.f32 %v3360_v20  ;;  %v2302_v45 = vand.u32 2147483647, %v2292_v46 }
 0x7b2   :  { %v2294_v58 = vmul.f32 %v3362_v11, %v2292_v46  ;;  %vm2280_vm3 = vmor %vm2278_vm2, %vm2279_vm1  ;;  %vm2299_vm5 = vweird.f32 %v3362_v11  ;;  %v4930_v46 = vld [vmem:[#allocation10 + $0x128] sm:$0xff] }
 0x7b3   :  { %v2275_v57 = vsub.f32 1.0, %v2274_v2  ;;  %vm2300_vm7 = vmor %vm2298_vm6, %vm2299_vm5  ;;  %vm2303_vm8 = vcmp.eq.f32.partialorder %v2302_v45, 8.507059e+37 }
 0x7b4   :  { %v2295_v31 = vsub.f32 1.0, %v2294_v58 }
 0x7b5   :  { %v2276_v5 = vmul.f32 %v3360_v20, %v2275_v57 }
 0x7b6   :  { %v2296_v8 = vmul.f32 %v3362_v11, %v2295_v31  ;;  %v4940_v31 = vld [vmem:[#allocation10 + $0x118] sm:$0xff] }
 0x7b7   :  { %v2277_v60 = vadd.f32 %v3360_v20, %v2276_v5  ;;  %v2305_v5 = vor.u32 1.1754944e-38, %v2304_v59  ;;  %v4914_v59 = vld [vmem:[#allocation10 + $0x158] sm:$0xff] }
 0x7b8   :  { %v2297_v57 = vadd.f32 %v3362_v11, %v2296_v8  ;;  %v4922_v8 = vld [vmem:[#allocation10 + $0x140] sm:$0xff] }
 0x7b9   :  { %v2281_v54 = vsel %vm2280_vm3, %v3360_v20, %v2277_v60 }
 0x7ba   :  { %v2286_v40 = vsel %vm2283_vm4, %v2285_v55, %v2281_v54  ;;  %v2301_v12 = vsel %vm2300_vm7, %v3362_v11, %v2297_v57  ;;  %v4932_v11 = vld [vmem:[#allocation10 + $0x130] sm:$0xff]  ;;  %v4948_v54 = vld [vmem:[#allocation10 + $0x100] sm:$0xff] }
 0x7bb   :  { %v2309_v2 = vmul.f32 %v2308_v4, %v2286_v40  ;;  %v2306_v44 = vsel %vm2303_vm8, %v2305_v5, %v2301_v12  ;;  %v4938_v55 = vld [vmem:[#allocation10 + $0x110] sm:$0xff]  ;;  %v4946_v4 = vld [vmem:[#allocation10 + $0xf8] sm:$0xff]  ;;  %v1711_v40 = vadd.f32 %v4707_v13, %v4702_v25  ;;  %v4970_v5 = vld [vmem:[#allocation10 + $0xa0] sm:$0xff] }
 0x7bc   :  { %v4962_v12 = vld [vmem:[#allocation10 + $0xd0] sm:$0xff] }
 0x7bd   :  { %v2310_v0 = vadd.f32 %v2309_v2, %v1790_v38  ;;  %v4916_v38 = vld [vmem:[#allocation10 + $0x160] sm:$0xff]  ;;  %v4956_v2 = vld [vmem:[#allocation10 + $0xe8] sm:$0xff] }
 0x7be   :  { %2569 = vmatpush.msra.mxu2 %v4916_v38 }
 0x7bf   :  { %3363 = vtanh.f32 %v2310_v0  ;;  %v4908_v0 = vld [vmem:[#allocation10 + $0x170] sm:$0xff] }
 0x7c0   :  { %2548 = vmatpush.msra.mxu1 %v4908_v0  ;;  %2708 = vmatpush.msrb.mxu0 %v4908_v0 }
 0x7c2   :  { %2549 = vmatpush.msra.mxu1 %v4914_v59  ;;  %2709 = vmatpush.msrb.mxu0 %v4914_v59 }
 0x7c4   :  { %2550 = vmatpush.msra.mxu1 %v4922_v8  ;;  %2710 = vmatpush.msrb.mxu0 %v4922_v8 }
 0x7c5   :  { %v3364_v58 = vpop.eup %3363 }
 0x7c6   :  { %v2312_v20 = vsub.f32 %v4780_v17, %v3364_v58  ;;  %v4924_v17 = vld [vmem:[#allocation10 + $0x148] sm:$0xff]  ;;  %2551 = vmatpush.msra.mxu1 %v4930_v46  ;;  %2711 = vmatpush.msrb.mxu0 %v4930_v46 }
 0x7c7   :  { %2570 = vmatpush.msra.mxu2 %v4924_v17 }
 0x7c8   :  { %v2313_v52 = vmul.f32 %v2312_v20, %v2306_v44  ;;  %2552 = vmatpush.msra.mxu1 %v4938_v55  ;;  %2712 = vmatpush.msrb.mxu0 %v4938_v55  ;;  %v4978_v20 = vld [vmem:[#allocation10 + $0x88] sm:$0xff] }
 0x7c9   :  { %2571 = vmatpush.msra.mxu2 %v4932_v11 }
 0x7ca   :  { %v4903_v60 = vadd.f32 %v3364_v58, %v2313_v52  ;;  %2553 = vmatpush.msra.mxu1 %v4946_v4  ;;  %2713 = vmatpush.msrb.mxu0 %v4946_v4  ;;  %v4968_v58 = vld [vmem:[#allocation10 + $0xb8] sm:$0xff]  ;;  %v4984_v52 = vld [vmem:[#allocation10 + $0x70] sm:$0xff] }
 0x7cb   :  { %2572 = vmatpush.msra.mxu2 %v4940_v31 }
 0x7cc   :  { %2384 = vmatmul.f32.vlgmr.msrb.gmra.mxu1 %v4903_v60  ;;  %2404 = vmatmul.f32.vlgmr.msrb.gmra.mxu2 %v4903_v60 }
 0x7cd   :  { %2424 = vmatmul.f32.vlgmr.msra.gmra.mxu3 %v4903_v60  ;;  %2573 = vmatpush.msra.mxu2 %v4948_v54 }
 0x7ce   :  { %2868 = vmatpush.msra.mxu3 %v4908_v0  ;;  %2554 = vmatpush.msra.mxu1 %v4813_v27 }
 0x7cf   :  { %2574 = vmatpush.msra.mxu2 %v4956_v2  ;;  %2714 = vmatpush.msrb.mxu0 %v4813_v27 }
 0x7d0   :  { %2869 = vmatpush.msra.mxu3 %v4914_v59  ;;  %2555 = vmatpush.msra.mxu1 %v4818_v14 }
 0x7d1   :  { %2575 = vmatpush.msra.mxu2 %v4962_v12  ;;  %2715 = vmatpush.msrb.mxu0 %v4818_v14 }
 0x7d2   :  { %2870 = vmatpush.msra.mxu3 %v4922_v8  ;;  %2556 = vmatpush.msra.mxu1 %v4826_v63 }
 0x7d3   :  { %2576 = vmatpush.msra.mxu2 %v4968_v58  ;;  %2716 = vmatpush.msrb.mxu0 %v4826_v63 }
 0x7d4   :  { %2871 = vmatpush.msra.mxu3 %v4930_v46  ;;  %2557 = vmatpush.msra.mxu1 %v4834_v30 }
 0x7d5   :  { %2577 = vmatpush.msra.mxu2 %v4970_v5  ;;  %2717 = vmatpush.msrb.mxu0 %v4834_v30 }
 0x7d6   :  { %2872 = vmatpush.msra.mxu3 %v4938_v55  ;;  %2558 = vmatpush.msra.mxu1 %v4842_v29 }
 0x7d7   :  { %2578 = vmatpush.msra.mxu2 %v4978_v20  ;;  %2718 = vmatpush.msrb.mxu0 %v4842_v29 }
 0x7d8   :  { %2873 = vmatpush.msra.mxu3 %v4946_v4  ;;  %2559 = vmatpush.msra.mxu1 %v4850_v39 }
 0x7d9   :  { %2579 = vmatpush.msra.mxu2 %v4984_v52  ;;  %2719 = vmatpush.msrb.mxu0 %v4850_v39 }
 0x7da   :  { %2874 = vmatpush.msra.mxu3 %v4813_v27  ;;  %v1752_v27 = vadd.f32 %v4756_v34, %v4709_v9  ;;  %2560 = vmatpush.msra.mxu1 %v4858_v49 }
 0x7db   :  { %2720 = vmatpush.msrb.mxu0 %v4858_v49 }
 0x7dc   :  { %2875 = vmatpush.msra.mxu3 %v4818_v14  ;;  %2561 = vmatpush.msra.mxu1 %v4866_v56 }
 0x7dd   :  { %2721 = vmatpush.msrb.mxu0 %v4866_v56 }
 0x7de   :  { %2876 = vmatpush.msra.mxu3 %v4826_v63  ;;  %2562 = vmatpush.msra.mxu1 %v4874_v16 }
 0x7df   :  { %2722 = vmatpush.msrb.mxu0 %v4874_v16 }
 0x7e0   :  { %2877 = vmatpush.msra.mxu3 %v4834_v30  ;;  %2563 = vmatpush.msra.mxu1 %v4882_v35 }
 0x7e1   :  { %2723 = vmatpush.msrb.mxu0 %v4882_v35 }
 0x7e2   :  { %2878 = vmatpush.msra.mxu3 %v4842_v29  ;;  %v5008_v29 = vld [vmem:[#allocation10 + $0x10] sm:$0xff]  ;;  %2728 = vmatpush.msrb.mxu1 %v4910_v10 }
 0x7e4   :  { %2879 = vmatpush.msra.mxu3 %v4850_v39  ;;  %2729 = vmatpush.msrb.mxu1 %v4916_v38 }
 0x7e6   :  { %2880 = vmatpush.msra.mxu3 %v4858_v49  ;;  %2730 = vmatpush.msrb.mxu1 %v4924_v17 }
 0x7e8   :  { %2881 = vmatpush.msra.mxu3 %v4866_v56  ;;  %2731 = vmatpush.msrb.mxu1 %v4932_v11 }
 0x7ea   :  { %2882 = vmatpush.msra.mxu3 %v4874_v16  ;;  %2732 = vmatpush.msrb.mxu1 %v4940_v31 }
 0x7ec   :  { %2883 = vmatpush.msra.mxu3 %v4882_v35  ;;  %2733 = vmatpush.msrb.mxu1 %v4948_v54 }
 0x7ee   :  { %2734 = vmatpush.msrb.mxu1 %v4956_v2 }
 0x7f0   :  { %2735 = vmatpush.msrb.mxu1 %v4962_v12 }
 0x7f2   :  { %2736 = vmatpush.msrb.mxu1 %v4968_v58 }
 0x7f4   :  { %2737 = vmatpush.msrb.mxu1 %v4970_v5 }
 0x7f6   :  { %2738 = vmatpush.msrb.mxu1 %v4978_v20 }
 0x7f8   :  { %2739 = vmatpush.msrb.mxu1 %v4984_v52 }
 0x849   :  { %v2385_v57 = vpop.f32.mrf.mxu1 }
 0x84a   :  { %v2428_v45 = vadd.f32 %v2385_v57, %v1711_v40  ;;  %v4990_v40 = vld [vmem:[#allocation10 + $0x58] sm:$0xff]  ;;  %v4996_v57 = vld [vmem:[#allocation10 + $0x40] sm:$0xff] }
 0x84b   :  { %2580 = vmatpush.msra.mxu2 %v4990_v40  ;;  %2740 = vmatpush.msrb.mxu1 %v4990_v40 }
 0x84c   :  { %v3230_v13 = vmul.f32 -1.442695, %v2428_v45  ;;  %v5002_v45 = vld [vmem:[#allocation10 + $0x28] sm:$0xff] }
 0x84d   :  { %2581 = vmatpush.msra.mxu2 %v4996_v57  ;;  %2741 = vmatpush.msrb.mxu1 %v4996_v57 }
 0x84e   :  { %3365 = vpow2.f32 %v3230_v13 }
 0x84f   :  { %v2405_v44 = vpop.f32.mrf.mxu2  ;;  %2582 = vmatpush.msra.mxu2 %v5002_v45  ;;  %2742 = vmatpush.msrb.mxu1 %v5002_v45 }
 0x850   :  { %v2448_v14 = vadd.f32 %v2405_v44, %v1752_v27 }
 0x851   :  { %2583 = vmatpush.msra.mxu2 %v5008_v29  ;;  %2743 = vmatpush.msrb.mxu1 %v5008_v29 }
 0x852   :  { %v3231_v34 = vmul.f32 -1.442695, %v2448_v14 }
 0x853   :  { %2848 = vmatpush.msrb.mxu2 %v4785_v48  ;;  %v2425_v48 = vpop.f32.mrf.mxu3 }
 0x854   :  { %v3366_v63 = vpop.eup %3365  ;;  %3367 = vpow2.f32 %v3231_v34 }
 0x855   :  { %v2432_v30 = vadd.f32 1.0, %v3366_v63  ;;  %2849 = vmatpush.msrb.mxu2 %v4789_v51 }
 0x857   :  { %3369 = vrcp.f32 %v2432_v30  ;;  %v2444_v27 = vand.u32 2147483648, %v2432_v30  ;;  %2850 = vmatpush.msrb.mxu2 %v4794_v42  ;;  %v2442_v14 = vand.u32 2147483647, %v2432_v30  ;;  %vm2438_vm10 = vweird.f32 %v2432_v30 }
 0x859   :  { %2851 = vmatpush.msrb.mxu2 %v4799_v62  ;;  %v2445_v51 = vor.u32 1.1754944e-38, %v2444_v27  ;;  %vm2443_vm12 = vcmp.eq.f32.partialorder %v2442_v14, 8.507059e+37  ;;  %v1793_v62 = vadd.f32 %v4754_v32, %v4725_v28 }
 0x85a   :  { %v3368_v39 = vpop.eup %3367 }
 0x85b   :  { %v2452_v49 = vadd.f32 1.0, %v3368_v39  ;;  %2852 = vmatpush.msrb.mxu2 %v4804_v15 }
 0x85d   :  { %v3370_v13 = vpop.eup %3369  ;;  %3371 = vrcp.f32 %v2452_v49  ;;  %2853 = vmatpush.msrb.mxu2 %v4809_v1  ;;  %v2464_v1 = vand.u32 2147483648, %v2452_v49  ;;  %vm2458_vm14 = vweird.f32 %v2452_v49  ;;  %v2462_v32 = vand.u32 2147483647, %v2452_v49 }
 0x85e   :  { %v2434_v56 = vmul.f32 %v3370_v13, %v2432_v30  ;;  %vm2439_vm9 = vweird.f32 %v3370_v13 }
 0x85f   :  { %vm2440_vm11 = vmor %vm2438_vm10, %vm2439_vm9  ;;  %2854 = vmatpush.msrb.mxu2 %v4811_v24  ;;  %v2465_v27 = vor.u32 1.1754944e-38, %v2464_v1  ;;  %vm2463_vm0 = vcmp.eq.f32.partialorder %v2462_v32, 8.507059e+37 }
 0x860   :  { %v2435_v16 = vsub.f32 1.0, %v2434_v56  ;;  %v2468_v56 = vadd.f32 %v4723_v36, %v2425_v48 }
 0x861   :  { %2855 = vmatpush.msrb.mxu2 %v4824_v23 }
 0x862   :  { %v2436_v44 = vmul.f32 %v3370_v13, %v2435_v16 }
 0x863   :  { %v3372_v34 = vpop.eup %3371  ;;  %2856 = vmatpush.msrb.mxu2 %v4832_v21 }
 0x864   :  { %v2454_v35 = vmul.f32 %v3372_v34, %v2452_v49  ;;  %v2437_v63 = vadd.f32 %v3370_v13, %v2436_v44  ;;  %vm2459_vm13 = vweird.f32 %v3372_v34 }
 0x865   :  { %2857 = vmatpush.msrb.mxu2 %v4840_v53  ;;  %vm2460_vm15 = vmor %vm2458_vm14, %vm2459_vm13 }
 0x866   :  { %v2455_v39 = vsub.f32 1.0, %v2454_v35  ;;  %v2441_v42 = vsel %vm2440_vm11, %v3370_v13, %v2437_v63 }
 0x867   :  { %v2446_v16 = vsel %vm2443_vm12, %v2445_v51, %v2441_v42  ;;  %2858 = vmatpush.msrb.mxu2 %v4848_v19  ;;  %v1714_v19 = vadd.f32 %v4712_v3, %v4702_v25 }
 0x868   :  { %v2469_v30 = vmul.f32 %v2468_v56, %v2446_v16  ;;  %v2456_v44 = vmul.f32 %v3372_v34, %v2455_v39 }
 0x869   :  { %2859 = vmatpush.msrb.mxu2 %v4856_v43  ;;  %v1755_v43 = vadd.f32 %v4760_v26, %v4709_v9 }
 0x86a   :  { %v2470_v15 = vadd.f32 %v2469_v30, %v1793_v62  ;;  %v2457_v13 = vadd.f32 %v3372_v34, %v2456_v44 }
 0x86b   :  { %2860 = vmatpush.msrb.mxu2 %v4864_v6 }
 0x86c   :  { %3373 = vtanh.f32 %v2470_v15  ;;  %v2461_v24 = vsel %vm2460_vm15, %v3372_v34, %v2457_v13  ;;  %v1796_v15 = vadd.f32 %v4758_v22, %v4725_v28  ;;  %v1758_v22 = vadd.f32 %v4764_v47, %v4709_v9 }
 0x86d   :  { %v2466_v14 = vsel %vm2463_vm0, %v2465_v27, %v2461_v24  ;;  %2861 = vmatpush.msrb.mxu2 %v4872_v61 }
 0x86f   :  { %2862 = vmatpush.msrb.mxu2 %v4880_v33 }
 0x871   :  { %2863 = vmatpush.msrb.mxu2 %v4888_v50 }
 0x872   :  { %v3374_v23 = vpop.eup %3373 }
 0x873   :  { %v2472_v21 = vsub.f32 %v4903_v60, %v3374_v23 }
 0x875   :  { %v2473_v49 = vmul.f32 %v2472_v21, %v2466_v14 }
 0x877   :  { %v5051_v53 = vadd.f32 %v3374_v23, %v2473_v49 }
 0x879   :  { %2544 = vmatmul.f32.vlgmr.msra.gmra.mxu0 %v5051_v53  ;;  %2564 = vmatmul.f32.vlgmr.msra.gmra.mxu1 %v5051_v53 }
 0x87a   :  { %2584 = vmatmul.f32.vlgmr.msra.gmra.mxu2 %v5051_v53  ;;  %2888 = vmatpush.msra.mxu0 %v4910_v10 }
 0x87b   :  { %3028 = vmatpush.msra.mxu2 %v4908_v0 }
 0x87c   :  { %2889 = vmatpush.msra.mxu0 %v4916_v38 }
 0x87d   :  { %3029 = vmatpush.msra.mxu2 %v4914_v59 }
 0x87e   :  { %2890 = vmatpush.msra.mxu0 %v4924_v17 }
 0x87f   :  { %3030 = vmatpush.msra.mxu2 %v4922_v8 }
 0x880   :  { %2891 = vmatpush.msra.mxu0 %v4932_v11 }
 0x881   :  { %3031 = vmatpush.msra.mxu2 %v4930_v46 }
 0x882   :  { %2892 = vmatpush.msra.mxu0 %v4940_v31 }
 0x883   :  { %3032 = vmatpush.msra.mxu2 %v4938_v55 }
 0x884   :  { %2893 = vmatpush.msra.mxu0 %v4948_v54 }
 0x885   :  { %3033 = vmatpush.msra.mxu2 %v4946_v4 }
 0x886   :  { %2894 = vmatpush.msra.mxu0 %v4956_v2 }
 0x888   :  { %2895 = vmatpush.msra.mxu0 %v4962_v12 }
 0x88a   :  { %2896 = vmatpush.msra.mxu0 %v4968_v58 }
 0x88c   :  { %2897 = vmatpush.msra.mxu0 %v4970_v5 }
 0x88e   :  { %2898 = vmatpush.msra.mxu0 %v4978_v20 }
 0x890   :  { %2899 = vmatpush.msra.mxu0 %v4984_v52 }
 0x892   :  { %2900 = vmatpush.msra.mxu0 %v4990_v40 }
 0x894   :  { %2901 = vmatpush.msra.mxu0 %v4996_v57 }
 0x896   :  { %2902 = vmatpush.msra.mxu0 %v5002_v45 }
 0x898   :  { %2903 = vmatpush.msra.mxu0 %v5008_v29 }
 0x8f6   :  { %v2545_v6 = vpop.f32.mrf.mxu0  ;;  %v2565_v61 = vpop.f32.mrf.mxu1 }
 0x8f7   :  { %v2588_v33 = vadd.f32 %v2545_v6, %v1714_v19  ;;  %v2608_v50 = vadd.f32 %v2565_v61, %v1755_v43 }
 0x8f9   :  { %v3232_v60 = vmul.f32 -1.442695, %v2588_v33  ;;  %v3233_v0 = vmul.f32 -1.442695, %v2608_v50 }
 0x8fb   :  { %3375 = vpow2.f32 %v3232_v60 }
 0x8fc   :  { %3377 = vpow2.f32 %v3233_v0  ;;  %v5119_v0 = vld [vmem:[%s5165_s8] ss:$0 sm:$0xff] }
 0x8fd   :  { %v2585_v39 = vpop.f32.mrf.mxu2 }
 0x8fe   :  { %v2628_v30 = vadd.f32 %v4723_v36, %v2585_v39 }
 0x901   :  { %v3376_v59 = vpop.eup %3375 }
 0x902   :  { %v3378_v8 = vpop.eup %3377  ;;  %v2592_v46 = vadd.f32 1.0, %v3376_v59 }
 0x903   :  { %v2612_v55 = vadd.f32 1.0, %v3378_v8 }
 0x904   :  { %3379 = vrcp.f32 %v2592_v46  ;;  %v2604_v26 = vand.u32 2147483648, %v2592_v46  ;;  %v2602_v51 = vand.u32 2147483647, %v2592_v46  ;;  %vm2598_vm2 = vweird.f32 %v2592_v46 }
 0x905   :  { %3381 = vrcp.f32 %v2612_v55  ;;  %v2624_v23 = vand.u32 2147483648, %v2612_v55  ;;  %vm2618_vm6 = vweird.f32 %v2612_v55  ;;  %v2622_v27 = vand.u32 2147483647, %v2612_v55 }
 0x906   :  { %v2605_v16 = vor.u32 1.1754944e-38, %v2604_v26  ;;  %vm2603_vm4 = vcmp.eq.f32.partialorder %v2602_v51, 8.507059e+37 }
 0x907   :  { %v2625_v49 = vor.u32 1.1754944e-38, %v2624_v23  ;;  %vm2623_vm8 = vcmp.eq.f32.partialorder %v2622_v27, 8.507059e+37  ;;  %v2985_v23 = vld [vmem:[#allocation10 + $0xc8] sm:$0xff]  ;;  %v1720_v27 = vadd.f32 %v4716_v18, %v4702_v25  ;;  %v2975_v18 = vld [vmem:[#allocation10 + $0x78] sm:$0xff] }
 0x90a   :  { %v3380_v4 = vpop.eup %3379 }
 0x90b   :  { %v3382_v34 = vpop.eup %3381  ;;  %v2594_v3 = vmul.f32 %v3380_v4, %v2592_v46  ;;  %vm2599_vm1 = vweird.f32 %v3380_v4 }
 0x90c   :  { %v2614_v35 = vmul.f32 %v3382_v34, %v2612_v55  ;;  %vm2600_vm3 = vmor %vm2598_vm2, %vm2599_vm1  ;;  %vm2619_vm5 = vweird.f32 %v3382_v34  ;;  %v1799_v55 = vadd.f32 %v4762_v37, %v4725_v28  ;;  %v3005_v37 = vld [vmem:[#allocation10 + $0x168] sm:$0xff] }
 0x90d   :  { %v2595_v48 = vsub.f32 1.0, %v2594_v3  ;;  %vm2620_vm7 = vmor %vm2618_vm6, %vm2619_vm5  ;;  %3008 = vmatpush.msra.mxu1 %v3005_v37 }
 0x90e   :  { %v2615_v56 = vsub.f32 1.0, %v2614_v35 }
 0x90f   :  { %v2596_v63 = vmul.f32 %v3380_v4, %v2595_v48 }
 0x910   :  { %v2616_v1 = vmul.f32 %v3382_v34, %v2615_v56 }
 0x911   :  { %v2597_v42 = vadd.f32 %v3380_v4, %v2596_v63 }
 0x912   :  { %v2617_v24 = vadd.f32 %v3382_v34, %v2616_v1  ;;  %v2990_v1 = vld [vmem:[#allocation10 + $0xf0] sm:$0xff] }
 0x913   :  { %v2601_v62 = vsel %vm2600_vm3, %v3380_v4, %v2597_v42 }
 0x914   :  { %v2606_v44 = vsel %vm2603_vm4, %v2605_v16, %v2601_v62  ;;  %v2621_v21 = vsel %vm2620_vm7, %v3382_v34, %v2617_v24  ;;  %v2988_v24 = vld [vmem:[#allocation10 + $0xe0] sm:$0xff] }
 0x915   :  { %v2629_v13 = vmul.f32 %v2628_v30, %v2606_v44  ;;  %v2626_v19 = vsel %vm2623_vm8, %v2625_v49, %v2621_v21  ;;  %v3002_v30 = vld [vmem:[#allocation10 + $0x150] sm:$0xff]  ;;  %v2999_v44 = vld [vmem:[#allocation10 + $0x138] sm:$0xff]  ;;  %3034 = vmatpush.msra.mxu2 %v2988_v24  ;;  %v1761_v21 = vadd.f32 %v4768_v7, %v4709_v9  ;;  %v2973_v7 = vld [vmem:[#allocation10 + $0x68] sm:$0xff] }
 0x916   :  { %3009 = vmatpush.msra.mxu1 %v3002_v30  ;;  %v2982_v49 = vld [vmem:[#allocation10 + $0xb0] sm:$0xff] }
 0x917   :  { %v2630_v32 = vadd.f32 %v2629_v13, %v1796_v15  ;;  %v2996_v15 = vld [vmem:[#allocation10 + $0x120] sm:$0xff]  ;;  %v2993_v13 = vld [vmem:[#allocation10 + $0x108] sm:$0xff]  ;;  %3035 = vmatpush.msra.mxu2 %v2985_v23 }
 0x918   :  { %3010 = vmatpush.msra.mxu1 %v2999_v44 }
 0x919   :  { %3383 = vtanh.f32 %v2630_v32  ;;  %v2987_v32 = vld [vmem:[#allocation10 + $0xd8] sm:$0xff]  ;;  %3036 = vmatpush.msra.mxu2 %v2982_v49  ;;  %v3129_v49 = vld [vmem:[#allocation11 + $0x60] sm:$0xff] }
 0x91a   :  { %3011 = vmatpush.msra.mxu1 %v2996_v15 }
 0x91c   :  { %3012 = vmatpush.msra.mxu1 %v2993_v13 }
 0x91e   :  { %3013 = vmatpush.msra.mxu1 %v2990_v1 }
 0x91f   :  { %v3384_v14 = vpop.eup %3383 }
 0x920   :  { %v2632_v36 = vsub.f32 %v5051_v53, %v3384_v14  ;;  %3014 = vmatpush.msra.mxu1 %v2987_v32 }
 0x922   :  { %v2633_v43 = vmul.f32 %v2632_v36, %v2626_v19 }
 0x924   :  { %v5091_v6 = vadd.f32 %v3384_v14, %v2633_v43  ;;  %v2984_v14 = vld [vmem:[#allocation10 + $0xc0] sm:$0xff] }
 0x925   :  { %3015 = vmatpush.msra.mxu1 %v2984_v14  ;;  %v3130_v14 = vld [vmem:[#allocation11 + $0x68] sm:$0xff] }
 0x926   :  { %2704 = vmatmul.f32.vlgmr.msrb.gmra.mxu3 %v5091_v6  ;;  %2724 = vmatmul.f32.vlgmr.msrb.gmra.mxu0 %v5091_v6 }
 0x927   :  { %2744 = vmatmul.f32.vlgmr.msrb.gmra.mxu1 %v5091_v6  ;;  %3048 = vmatpush.msrb.mxu3 %v4910_v10 }
 0x929   :  { %3049 = vmatpush.msrb.mxu3 %v4916_v38 }
 0x92b   :  { %3050 = vmatpush.msrb.mxu3 %v4924_v17 }
 0x92d   :  { %3051 = vmatpush.msrb.mxu3 %v4932_v11  ;;  %v1717_v11 = vadd.f32 %v4714_v41, %v4702_v25 }
 0x92f   :  { %3052 = vmatpush.msrb.mxu3 %v4940_v31 }
 0x931   :  { %3053 = vmatpush.msrb.mxu3 %v4948_v54 }
 0x933   :  { %3054 = vmatpush.msrb.mxu3 %v4956_v2 }
 0x935   :  { %3055 = vmatpush.msrb.mxu3 %v4962_v12 }
 0x937   :  { %3056 = vmatpush.msrb.mxu3 %v4968_v58 }
 0x939   :  { %3057 = vmatpush.msrb.mxu3 %v4970_v5 }
 0x93b   :  { %3058 = vmatpush.msrb.mxu3 %v4978_v20 }
 0x93d   :  { %3059 = vmatpush.msrb.mxu3 %v4984_v52 }
 0x93f   :  { %3060 = vmatpush.msrb.mxu3 %v4990_v40 }
 0x941   :  { %3061 = vmatpush.msrb.mxu3 %v4996_v57 }
 0x943   :  { %3062 = vmatpush.msrb.mxu3 %v5002_v45 }
 0x945   :  { %3063 = vmatpush.msrb.mxu3 %v5008_v29 }
 0x9a3   :  { %v2725_v10 = vpop.f32.mrf.mxu0 }
 0x9a4   :  { %v2768_v38 = vadd.f32 %v2725_v10, %v1758_v22  ;;  %v2745_v61 = vpop.f32.mrf.mxu1  ;;  %v2981_v22 = vld [vmem:[#allocation10 + $0xa8] sm:$0xff]  ;;  %v2979_v10 = vld [vmem:[#allocation10 + $0x98] sm:$0xff] }
 0x9a5   :  { %v2788_v59 = vadd.f32 %v5119_v0, %v2745_v61  ;;  %3016 = vmatpush.msra.mxu1 %v2981_v22  ;;  %3037 = vmatpush.msra.mxu2 %v2979_v10 }
 0x9a6   :  { %v3235_v17 = vmul.f32 -1.442695, %v2768_v38 }
 0x9a8   :  { %3385 = vpow2.f32 %v3235_v17 }
 0x9a9   :  { %v2705_v31 = vpop.f32.mrf.mxu3 }
 0x9aa   :  { %v2748_v54 = vadd.f32 %v2705_v31, %v1717_v11  ;;  %v2978_v11 = vld [vmem:[#allocation10 + $0x90] sm:$0xff]  ;;  %v2976_v31 = vld [vmem:[#allocation10 + $0x80] sm:$0xff] }
 0x9ab   :  { %3017 = vmatpush.msra.mxu1 %v2978_v11  ;;  %3038 = vmatpush.msra.mxu2 %v2976_v31  ;;  %v3124_v11 = vld [vmem:[#allocation11 + $0x38] sm:$0xff]  ;;  %v5210_v31 = vld [vmem:[#allocation21_spill] sm:$0xff] }
 0x9ac   :  { %v3234_v2 = vmul.f32 -1.442695, %v2748_v54  ;;  %v2972_v54 = vld [vmem:[#allocation10 + $0x60] sm:$0xff] }
 0x9ad   :  { %3018 = vmatpush.msra.mxu1 %v2975_v18  ;;  %3039 = vmatpush.msra.mxu2 %v2973_v7  ;;  %v1764_v18 = vadd.f32 %v5210_v31, %v4709_v9  ;;  %v3123_v7 = vld [vmem:[#allocation11 + $0x30] sm:$0xff]  ;;  %v3117_v9 = vld [vmem:[#allocation11] sm:$0xff] }
 0x9ae   :  { %3387 = vpow2.f32 %v3234_v2  ;;  %v3386_v12 = vpop.eup %3385  ;;  %v2970_v2 = vld [vmem:[#allocation10 + $0x50] sm:$0xff] }
 0x9af   :  { %v2772_v5 = vadd.f32 1.0, %v3386_v12  ;;  %v2969_v12 = vld [vmem:[#allocation10 + $0x48] sm:$0xff]  ;;  %3019 = vmatpush.msra.mxu1 %v2972_v54  ;;  %3040 = vmatpush.msra.mxu2 %v2970_v2 }
 0x9b1   :  { %v2784_v35 = vand.u32 2147483648, %v2772_v5  ;;  %vm2778_vm14 = vweird.f32 %v2772_v5  ;;  %v2782_v26 = vand.u32 2147483647, %v2772_v5  ;;  %3020 = vmatpush.msra.mxu1 %v2969_v12  ;;  %v3122_v12 = vld [vmem:[#allocation11 + $0x28] sm:$0xff] }
 0x9b3   :  { %v2785_v39 = vor.u32 1.1754944e-38, %v2784_v35  ;;  %vm2783_vm0 = vcmp.eq.f32.partialorder %v2782_v26, 8.507059e+37 }
 0x9b4   :  { %v3388_v58 = vpop.eup %3387 }
 0x9b5   :  { %v2752_v20 = vadd.f32 1.0, %v3388_v58  ;;  %v2967_v58 = vld [vmem:[#allocation10 + $0x38] sm:$0xff] }
 0x9b6   :  { %3041 = vmatpush.msra.mxu2 %v2967_v58  ;;  %v3121_v58 = vld [vmem:[#allocation11 + $0x20] sm:$0xff] }
 0x9b7   :  { %3389 = vrcp.f32 %v2752_v20  ;;  %v2764_v29 = vand.u32 2147483648, %v2752_v20  ;;  %v2762_v41 = vand.u32 2147483647, %v2752_v20  ;;  %vm2758_vm10 = vweird.f32 %v2752_v20 }
 0x9b8   :  { %3391 = vrcp.f32 %v2772_v5 }
 0x9b9   :  { %v2765_v60 = vor.u32 1.1754944e-38, %v2764_v29  ;;  %vm2763_vm12 = vcmp.eq.f32.partialorder %v2762_v41, 8.507059e+37  ;;  %v2961_v29 = vld [vmem:[#allocation10 + $0x8] sm:$0xff] }
 0x9bd   :  { %v3390_v52 = vpop.eup %3389 }
 0x9be   :  { %v3392_v40 = vpop.eup %3391  ;;  %v2754_v47 = vmul.f32 %v3390_v52, %v2752_v20  ;;  %vm2759_vm9 = vweird.f32 %v3390_v52  ;;  %v2966_v20 = vld [vmem:[#allocation10 + $0x30] sm:$0xff] }
 0x9bf   :  { %v2774_v45 = vmul.f32 %v3392_v40, %v2772_v5  ;;  %vm2760_vm11 = vmor %vm2758_vm10, %vm2759_vm9  ;;  %vm2779_vm13 = vweird.f32 %v3392_v40  ;;  %3021 = vmatpush.msra.mxu1 %v2966_v20 }
 0x9c0   :  { %v2755_v57 = vsub.f32 1.0, %v2754_v47  ;;  %vm2780_vm15 = vmor %vm2778_vm14, %vm2779_vm13 }
 0x9c1   :  { %v2775_v50 = vsub.f32 1.0, %v2774_v45  ;;  %v2963_v45 = vld [vmem:[#allocation10 + $0x18] sm:$0xff] }
 0x9c2   :  { %v2756_v53 = vmul.f32 %v3390_v52, %v2755_v57  ;;  %3022 = vmatpush.msra.mxu1 %v2963_v45 }
 0x9c3   :  { %v2776_v34 = vmul.f32 %v3392_v40, %v2775_v50 }
 0x9c4   :  { %v2757_v33 = vadd.f32 %v3390_v52, %v2756_v53  ;;  %v2960_v53 = vld [vmem:[#allocation10] sm:$0xff] }
 0x9c5   :  { %v2777_v48 = vadd.f32 %v3392_v40, %v2776_v34  ;;  %3023 = vmatpush.msra.mxu1 %v2960_v53 }
 0x9c6   :  { %v2761_v8 = vsel %vm2760_vm11, %v3390_v52, %v2757_v33  ;;  %v2964_v52 = vld [vmem:[#allocation10 + $0x20] sm:$0xff] }
 0x9c7   :  { %v2766_v46 = vsel %vm2763_vm12, %v2765_v60, %v2761_v8  ;;  %v2781_v63 = vsel %vm2780_vm15, %v3392_v40, %v2777_v48  ;;  %3042 = vmatpush.msra.mxu2 %v2964_v52  ;;  %v3119_v52 = vld [vmem:[#allocation11 + $0x10] sm:$0xff] }
 0x9c8   :  { %v2789_v4 = vmul.f32 %v2788_v59, %v2766_v46  ;;  %v2786_v56 = vsel %vm2783_vm0, %v2785_v39, %v2781_v63  ;;  %v5208_v63 = vld [vmem:[#allocation20_spill] sm:$0xff] }
 0x9c9   :  { %3043 = vmatpush.msra.mxu2 %v2961_v29 }
 0x9ca   :  { %v2790_v3 = vadd.f32 %v2789_v4, %v1799_v55 }
 0x9cc   :  { %3393 = vtanh.f32 %v2790_v3 }
 0x9d2   :  { %v3394_v51 = vpop.eup %3393 }
 0x9d3   :  { %v2792_v42 = vsub.f32 %v5091_v6, %v3394_v51 }
 0x9d5   :  { %v2793_v16 = vmul.f32 %v2792_v42, %v2786_v56 }
 0x9d7   :  { %v5125_v62 = vadd.f32 %v3394_v51, %v2793_v16  ;;  %v1802_v51 = vadd.f32 %v5208_v63, %v4725_v28 }
 0x9d9   :  { %2864 = vmatmul.f32.vlgmr.msrb.gmra.mxu2 %v5125_v62  ;;  %2884 = vmatmul.f32.vlgmr.msra.gmra.mxu3 %v5125_v62 }
 0x9da   :  { %2904 = vmatmul.f32.vlgmr.msra.gmra.mxu0 %v5125_v62 }
 0xa57   :  { %v2905_v55 = vpop.f32.mrf.mxu0 }
 0xa58   :  { %v2948_v48 = vadd.f32 %v5119_v0, %v2905_v55 }
 0xa5c   :  { %v2865_v36 = vpop.f32.mrf.mxu2  ;;  %v2885_v19 = vpop.f32.mrf.mxu3 }
 0xa5d   :  { %v2908_v43 = vadd.f32 %v2865_v36, %v1720_v27  ;;  %v2928_v6 = vadd.f32 %v2885_v19, %v1761_v21  ;;  %v3132_v27 = vld [vmem:[#allocation11 + $0x78] sm:$0xff]  ;;  %v3131_v21 = vld [vmem:[#allocation11 + $0x70] sm:$0xff] }
 0xa5e   :  { %3137 = vmatpush.msrb.mxu0 %v3132_v27  ;;  %v3128_v36 = vld [vmem:[#allocation11 + $0x58] sm:$0xff]  ;;  %v5209_v19 = vld [vmem:[#allocation23_spill] sm:$0xff] }
 0xa5f   :  { %v3236_v38 = vmul.f32 -1.442695, %v2908_v43  ;;  %v3237_v17 = vmul.f32 -1.442695, %v2928_v6  ;;  %v1723_v43 = vadd.f32 %v5209_v19, %v4702_v25  ;;  %v3126_v6 = vld [vmem:[#allocation11 + $0x48] sm:$0xff] }
 0xa60   :  { %3138 = vmatpush.msrb.mxu0 %v3131_v21 }
 0xa61   :  { %3395 = vpow2.f32 %v3236_v38  ;;  %v3125_v38 = vld [vmem:[#allocation11 + $0x40] sm:$0xff] }
 0xa62   :  { %3397 = vpow2.f32 %v3237_v17  ;;  %3139 = vmatpush.msrb.mxu0 %v3130_v14 }
 0xa64   :  { %3140 = vmatpush.msrb.mxu0 %v3129_v49 }
 0xa66   :  { %3141 = vmatpush.msrb.mxu0 %v3128_v36 }
 0xa67   :  { %v3396_v5 = vpop.eup %3395 }
 0xa68   :  { %v3398_v40 = vpop.eup %3397  ;;  %v2912_v47 = vadd.f32 1.0, %v3396_v5  ;;  %v3120_v5 = vld [vmem:[#allocation11 + $0x18] sm:$0xff] }
 0xa69   :  { %v2932_v57 = vadd.f32 1.0, %v3398_v40 }
 0xa6a   :  { %3399 = vrcp.f32 %v2912_v47  ;;  %v2924_v60 = vand.u32 2147483648, %v2912_v47  ;;  %v2922_v46 = vand.u32 2147483647, %v2912_v47  ;;  %vm2918_vm2 = vweird.f32 %v2912_v47 }
 0xa6b   :  { %3401 = vrcp.f32 %v2932_v57  ;;  %v2944_v37 = vand.u32 2147483648, %v2932_v57  ;;  %vm2938_vm6 = vweird.f32 %v2932_v57  ;;  %v2942_v30 = vand.u32 2147483647, %v2932_v57 }
 0xa6c   :  { %v2925_v34 = vor.u32 1.1754944e-38, %v2924_v60  ;;  %vm2923_vm4 = vcmp.eq.f32.partialorder %v2922_v46, 8.507059e+37 }
 0xa6d   :  { %v2945_v13 = vor.u32 1.1754944e-38, %v2944_v37  ;;  %vm2943_vm8 = vcmp.eq.f32.partialorder %v2942_v30, 8.507059e+37 }
 0xa70   :  { %v3400_v41 = vpop.eup %3399 }
 0xa71   :  { %v3402_v61 = vpop.eup %3401  ;;  %v2914_v33 = vmul.f32 %v3400_v41, %v2912_v47  ;;  %vm2919_vm1 = vweird.f32 %v3400_v41  ;;  %v3118_v47 = vld [vmem:[#allocation11 + $0x8] sm:$0xff] }
 0xa72   :  { %v2934_v59 = vmul.f32 %v3402_v61, %v2932_v57  ;;  %vm2920_vm3 = vmor %vm2918_vm2, %vm2919_vm1  ;;  %vm2939_vm5 = vweird.f32 %v3402_v61 }
 0xa73   :  { %v2915_v50 = vsub.f32 1.0, %v2914_v33  ;;  %vm2940_vm7 = vmor %vm2938_vm6, %vm2939_vm5 }
 0xa74   :  { %v2935_v3 = vsub.f32 1.0, %v2934_v59 }
 0xa75   :  { %v2916_v8 = vmul.f32 %v3400_v41, %v2915_v50 }
 0xa76   :  { %v2936_v42 = vmul.f32 %v3402_v61, %v2935_v3 }
 0xa77   :  { %v2917_v4 = vadd.f32 %v3400_v41, %v2916_v8 }
 0xa78   :  { %v2937_v16 = vadd.f32 %v3402_v61, %v2936_v42 }
 0xa79   :  { %v2921_v35 = vsel %vm2920_vm3, %v3400_v41, %v2917_v4 }
 0xa7a   :  { %v2926_v26 = vsel %vm2923_vm4, %v2925_v34, %v2921_v35  ;;  %v2941_v44 = vsel %vm2940_vm7, %v3402_v61, %v2937_v16  ;;  %v5211_v35 = vld [vmem:[#allocation24_spill] sm:$0xff] }
 0xa7b   :  { %v2949_v39 = vmul.f32 %v2948_v48, %v2926_v26  ;;  %v2946_v32 = vsel %vm2943_vm8, %v2945_v13, %v2941_v44  ;;  %v1805_v26 = vadd.f32 %v5211_v35, %v4725_v28  ;;  %v3254_v28 = vld [vmem:[%s5167_s10] ss:$0 sm:$0xff] }
 0xa7d   :  { %v2950_v56 = vadd.f32 %v2949_v39, %v1802_v51 }
 0xa7f   :  { %3403 = vtanh.f32 %v2950_v56 }
 0xa85   :  { %v3404_v15 = vpop.eup %3403 }
 0xa86   :  { %v2952_v1 = vsub.f32 %v5125_v62, %v3404_v15  ;;  %v3127_v62 = vld [vmem:[#allocation11 + $0x50] sm:$0xff] }
 0xa87   :  { %3142 = vmatpush.msrb.mxu0 %v3127_v62 }
 0xa88   :  { %v2953_v24 = vmul.f32 %v2952_v1, %v2946_v32 }
 0xa89   :  { %3143 = vmatpush.msrb.mxu0 %v3126_v6 }
 0xa8a   :  { %v5138_v23 = vadd.f32 %v3404_v15, %v2953_v24 }
 0xa8b   :  { %3144 = vmatpush.msrb.mxu0 %v3125_v38 }
 0xa8c   :  { %3024 = vmatmul.f32.vlgmr.msra.gmra.mxu1 %v5138_v23  ;;  %3044 = vmatmul.f32.vlgmr.msra.gmra.mxu2 %v5138_v23 }
 0xa8d   :  { %3064 = vmatmul.f32.vlgmr.msrb.gmra.mxu3 %v5138_v23  ;;  %3145 = vmatpush.msrb.mxu0 %v3124_v11 }
 0xa8f   :  { %3146 = vmatpush.msrb.mxu0 %v3123_v7 }
 0xa91   :  { %3147 = vmatpush.msrb.mxu0 %v3122_v12 }
 0xa93   :  { %3148 = vmatpush.msrb.mxu0 %v3121_v58 }
 0xa95   :  { %3149 = vmatpush.msrb.mxu0 %v3120_v5 }
 0xa97   :  { %3150 = vmatpush.msrb.mxu0 %v3119_v52 }
 0xa99   :  { %3151 = vmatpush.msrb.mxu0 %v3118_v47 }
 0xa9b   :  { %3152 = vmatpush.msrb.mxu0 %v3117_v9 }
 0xb09   :  { %v3025_v22 = vpop.f32.mrf.mxu1 }
 0xb0a   :  { %v3068_v10 = vadd.f32 %v3025_v22, %v1723_v43 }
 0xb0c   :  { %v3238_v17 = vmul.f32 -1.442695, %v3068_v10 }
 0xb0e   :  { %3405 = vpow2.f32 %v3238_v17 }
 0xb0f   :  { %v3045_v54 = vpop.f32.mrf.mxu2 }
 0xb10   :  { %v3088_v2 = vadd.f32 %v3045_v54, %v1764_v18  ;;  %v3065_v59 = vpop.f32.mrf.mxu3 }
 0xb11   :  { %v3108_v3 = vadd.f32 %v5119_v0, %v3065_v59 }
 0xb12   :  { %v3239_v25 = vmul.f32 -1.442695, %v3088_v2 }
 0xb14   :  { %v3406_v20 = vpop.eup %3405  ;;  %3407 = vpow2.f32 %v3239_v25 }
 0xb15   :  { %v3072_v40 = vadd.f32 1.0, %v3406_v20 }
 0xb17   :  { %3409 = vrcp.f32 %v3072_v40  ;;  %v3084_v61 = vand.u32 2147483648, %v3072_v40  ;;  %v3082_v50 = vand.u32 2147483647, %v3072_v40  ;;  %vm3078_vm10 = vweird.f32 %v3072_v40 }
 0xb19   :  { %v3085_v55 = vor.u32 1.1754944e-38, %v3084_v61  ;;  %vm3083_vm12 = vcmp.eq.f32.partialorder %v3082_v50, 8.507059e+37 }
 0xb1a   :  { %v3408_v57 = vpop.eup %3407 }
 0xb1b   :  { %v3092_v45 = vadd.f32 1.0, %v3408_v57 }
 0xb1d   :  { %v3410_v29 = vpop.eup %3409  ;;  %3411 = vrcp.f32 %v3092_v45  ;;  %v3104_v56 = vand.u32 2147483648, %v3092_v45  ;;  %vm3098_vm14 = vweird.f32 %v3092_v45  ;;  %v3102_v16 = vand.u32 2147483647, %v3092_v45 }
 0xb1e   :  { %v3074_v53 = vmul.f32 %v3410_v29, %v3072_v40  ;;  %vm3079_vm9 = vweird.f32 %v3410_v29 }
 0xb1f   :  { %vm3080_vm11 = vmor %vm3078_vm10, %vm3079_vm9  ;;  %v3105_v44 = vor.u32 1.1754944e-38, %v3104_v56  ;;  %vm3103_vm0 = vcmp.eq.f32.partialorder %v3102_v16, 8.507059e+37 }
 0xb20   :  { %v3075_v41 = vsub.f32 1.0, %v3074_v53 }
 0xb22   :  { %v3076_v33 = vmul.f32 %v3410_v29, %v3075_v41 }
 0xb23   :  { %v3412_v60 = vpop.eup %3411 }
 0xb24   :  { %v3094_v8 = vmul.f32 %v3412_v60, %v3092_v45  ;;  %v3077_v46 = vadd.f32 %v3410_v29, %v3076_v33  ;;  %vm3099_vm13 = vweird.f32 %v3412_v60 }
 0xb25   :  { %vm3100_vm15 = vmor %vm3098_vm14, %vm3099_vm13 }
 0xb26   :  { %v3095_v4 = vsub.f32 1.0, %v3094_v8  ;;  %v3081_v34 = vsel %vm3080_vm11, %v3410_v29, %v3077_v46 }
 0xb27   :  { %v3086_v48 = vsel %vm3083_vm12, %v3085_v55, %v3081_v34 }
 0xb28   :  { %v3109_v63 = vmul.f32 %v3108_v3, %v3086_v48  ;;  %v3096_v51 = vmul.f32 %v3412_v60, %v3095_v4 }
 0xb2a   :  { %v3110_v39 = vadd.f32 %v3109_v63, %v1805_v26  ;;  %v3097_v42 = vadd.f32 %v3412_v60, %v3096_v51 }
 0xb2c   :  { %3413 = vtanh.f32 %v3110_v39  ;;  %v3101_v37 = vsel %vm3100_vm15, %v3412_v60, %v3097_v42 }
 0xb2d   :  { %v3106_v15 = vsel %vm3103_vm0, %v3105_v44, %v3101_v37 }
 0xb32   :  { %v3414_v30 = vpop.eup %3413 }
 0xb33   :  { %v3112_v0 = vsub.f32 %v5138_v23, %v3414_v30 }
 0xb35   :  { %v3113_v13 = vmul.f32 %v3112_v0, %v3106_v15 }
 0xb37   :  { %v3114_v1 = vadd.f32 %v3414_v30, %v3113_v13 }
 0xb39   :  { %3153 = vmatmul.f32.vlgmr.msrb.gmra.mxu0 %v3114_v1 }
 0xbb6   :  { %v3154_v32 = vpop.f32.mrf.mxu0 }
 0xbb7   :  { %v3155_v24 = vadd.f32 %v3254_v28, %v3154_v32 }
 0xbb9   :  { %3157 = vst [vmem:[#allocation13] sm:$0xff] %v3155_v24 }
 0xbba   :  { %3168 = dma.vmem_to_hbm [thread:$0]  %s3164_s5, 128, %s3166_s15, [#allocation7]  }
 0xbbb   :  { %3543 = dma.done.wait [#allocation7], 128  }
 0xbbc   :  { %3544 = vsyncadd [#allocation7], 4294967168 }
 0xbbd   :  { %3173 = vsyncpa [#allocation6], 1 }
 0xbbe   :  { %3174 = vsyncpa [#allocation9], 1 }
 0xbbf   :  { %3175 = vsyncpa [#allocation12], 1 }
 0xbc0   :  { %3176 = vsyncpa [#allocation7], 1 }

</bundles_post_ra>
